<compile_context>
chip_gen: v7x
topology: tpu7x:2x2x1
jax: 0.10.0
libtpu: 0.0.40
codegen_flags: <defaults>
</compile_context>

<pallas_src>
import functools

import numpy as np
import jax
import jax.numpy as jnp
from jax import lax
from jax.experimental import pallas as pl
from jax.experimental.pallas import tpu as pltpu

EPS = 1e-5  # nn.BatchNorm2d default


# ---------------------------------------------------------------------------
# Conv kernel: k x k, stride 1, "same" padding, bias-free (cancelled by BN).
# Grid: one step per image.  Each step does kh*kw MXU matmuls
#     (Hout*Wp, Cin) @ (Cin, Cout)
# accumulated in f32, writes the (masked) per-image output slab, and
# accumulates per-channel [sum, sum^2] BN statistics across the grid.
# ---------------------------------------------------------------------------
def _conv_tap_kernel(x_ref, w_ref, mask_ref, y_ref, stats_ref, *, kh, kw, wp):
    n = pl.program_id(0)
    x = x_ref[0]                              # (L, Cin) f32, flattened padded rows
    rows = y_ref.shape[1]                     # Hout * Wp
    cout = w_ref.shape[-1]

    acc = jnp.zeros((rows, cout), jnp.float32)
    for di in range(kh):                      # static unroll over taps
        for dj in range(kw):
            off = di * wp + dj                # static row offset of this tap
            lhs = x[off:off + rows, :].astype(jnp.bfloat16)
            acc = acc + jnp.dot(lhs, w_ref[di, dj],
                                preferred_element_type=jnp.float32)

    acc = acc * mask_ref[...]                 # zero the width-gap positions

    y_ref[0] = acc

    @pl.when(n == 0)
    def _init():
        stats_ref[...] = jnp.zeros_like(stats_ref)

    stats_ref[0:1, :] += jnp.sum(acc, axis=0, keepdims=True)
    stats_ref[1:2, :] += jnp.sum(acc * acc, axis=0, keepdims=True)


def conv2d_tap_stats(x_nhwc, w_bf16, pad):
    """Stride-1 'same' conv (no bias) + fused per-channel BN statistics."""
    n, h, w, cin = x_nhwc.shape
    kh, kw, cin_w, cout = w_bf16.shape
    assert cin_w == cin
    hp, wp = h + 2 * pad, w + 2 * pad

    # Single zero-pad copy (replaces the old 9x im2col expansion); one extra
    # zero row at the bottom keeps every tap's flat slice in bounds.
    xp = jnp.pad(x_nhwc, ((0, 0), (pad, pad + 1), (pad, pad), (0, 0)))
    xf = xp.reshape(n, (hp + 1) * wp, cin)

    rows = h * wp
    # 1.0 where the flattened position is a real output column (w < Wout).
    mask = jnp.asarray(
        ((np.arange(rows) % wp) < w).astype(np.float32).reshape(rows, 1))

    kern = functools.partial(_conv_tap_kernel, kh=kh, kw=kw, wp=wp)
    yf, stats = pl.pallas_call(
        kern,
        out_shape=(jax.ShapeDtypeStruct((n, rows, cout), jnp.float32),
                   jax.ShapeDtypeStruct((2, cout), jnp.float32)),
        grid=(n,),
        in_specs=[pl.BlockSpec((1, (hp + 1) * wp, cin), lambda i: (i, 0, 0)),
                  pl.BlockSpec((kh, kw, cin, cout), lambda i: (0, 0, 0, 0)),
                  pl.BlockSpec((rows, 1), lambda i: (0, 0))],
        out_specs=(pl.BlockSpec((1, rows, cout), lambda i: (i, 0, 0)),
                   pl.BlockSpec((2, cout), lambda i: (0, 0))),
        compiler_params=pltpu.CompilerParams(
            # BN statistics accumulate across the batch axis -> sequential.
            dimension_semantics=("arbitrary",)),
    )(xf, w_bf16, mask)

    y = yf.reshape(n, h, wp, cout)[:, :, :w, :]       # drop the width gap
    return y, stats


# ---------------------------------------------------------------------------
# Fused BatchNorm (training-mode batch statistics) + optional residual + ReLU,
# tiled over row blocks of the lane-dense-folded (M/f, C*f) view.
# ---------------------------------------------------------------------------
def _bn_act_kernel(x_ref, stats_ref, g_ref, b_ref, o_ref, *, inv_m, relu):
    mean = stats_ref[0:1, :] * inv_m
    var = stats_ref[1:2, :] * inv_m - mean * mean     # biased var (train mode)
    scale = g_ref[...] * lax.rsqrt(var + EPS)
    y = (x_ref[...] - mean) * scale + b_ref[...]
    if relu:
        y = jnp.maximum(y, 0.0)
    o_ref[...] = y


def _bn_add_act_kernel(x_ref, stats_ref, g_ref, b_ref, r_ref, o_ref, *,
                       inv_m, relu):
    mean = stats_ref[0:1, :] * inv_m
    var = stats_ref[1:2, :] * inv_m - mean * mean
    scale = g_ref[...] * lax.rsqrt(var + EPS)
    y = (x_ref[...] - mean) * scale + b_ref[...] + r_ref[...]
    if relu:
        y = jnp.maximum(y, 0.0)
    o_ref[...] = y


def batch_norm_act(y_nhwc, stats, gamma, beta, *, relu, residual=None):
    n, h, w, c = y_nhwc.shape
    m = n * h * w
    inv_m = 1.0 / float(m)

    # Lane-density fold: view (M, C) as (M/f, C*f) so stores are full 128-lane.
    f = 1
    if c < 128 and 128 % c == 0 and m % (128 // c) == 0:
        f = 128 // c
    mf, cf = m // f, c * f

    x2 = y_nhwc.reshape(mf, cf)
    st = jnp.tile(stats, (1, f))
    g2 = jnp.tile(gamma.reshape(1, c), (1, f))
    b2 = jnp.tile(beta.reshape(1, c), (1, f))

    tm = mf
    for cand in (512, 256, 128, 64, 32, 16, 8):
        if mf % cand == 0:
            tm = cand
            break

    in_specs = [pl.BlockSpec((tm, cf), lambda i: (i, 0)),
                pl.BlockSpec((2, cf), lambda i: (0, 0)),
                pl.BlockSpec((1, cf), lambda i: (0, 0)),
                pl.BlockSpec((1, cf), lambda i: (0, 0))]
    args = [x2, st, g2, b2]
    if residual is None:
        kern = functools.partial(_bn_act_kernel, inv_m=inv_m, relu=relu)
    else:
        kern = functools.partial(_bn_add_act_kernel, inv_m=inv_m, relu=relu)
        in_specs.append(pl.BlockSpec((tm, cf), lambda i: (i, 0)))
        args.append(residual.reshape(mf, cf))

    out = pl.pallas_call(
        kern,
        out_shape=jax.ShapeDtypeStruct((mf, cf), jnp.float32),
        grid=(mf // tm,),
        in_specs=in_specs,
        out_specs=pl.BlockSpec((tm, cf), lambda i: (i, 0)),
        compiler_params=pltpu.CompilerParams(
            dimension_semantics=("parallel",)),
    )(*args)
    return out.reshape(n, h, w, c)


# ---------------------------------------------------------------------------
# skip_connection forward (public interface is NCHW like the PyTorch module).
# ---------------------------------------------------------------------------
def skip_connection_forward(params, x_nchw, *, pad):
    x = jnp.transpose(x_nchw, (0, 2, 3, 1)).astype(jnp.float32)    # NCHW->NHWC

    y1, s1 = conv2d_tap_stats(x, params["w1"], pad)
    a1 = batch_norm_act(y1, s1, params["g1"], params["b1"], relu=True)

    y2, s2 = conv2d_tap_stats(a1, params["w2"], pad)
    out = batch_norm_act(y2, s2, params["g2"], params["b2"],
                         relu=True, residual=x)        # bn2 + skip, then relu

    return jnp.transpose(out, (0, 3, 1, 2))                        # NHWC->NCHW


def make_params(key, channels, kernel):
    f1, f2, f3 = channels
    assert f1 == f3, "residual add requires F3 == F1"
    k1, k2, k3, k4, k5, k6 = jax.random.split(key, 6)
    w1 = jax.random.normal(k1, (kernel, kernel, f1, f2), jnp.float32) * float(
        np.sqrt(2.0 / (kernel * kernel * f1)))
    w2 = jax.random.normal(k2, (kernel, kernel, f2, f3), jnp.float32) * float(
        np.sqrt(2.0 / (kernel * kernel * f2)))
    # NOTE: conv biases are intentionally not applied -- a per-channel constant
    # before training-mode BatchNorm is cancelled exactly by the mean
    # subtraction, so the block output is unchanged (perf-review item).
    # Weights are stored pre-cast to bf16 (MXU operands); accumulation is f32.
    return {
        "w1": w1.astype(jnp.bfloat16),
        "w2": w2.astype(jnp.bfloat16),
        "g1": 1.0 + 0.1 * jax.random.normal(k3, (f2,), jnp.float32),
        "b1": 0.1 * jax.random.normal(k4, (f2,), jnp.float32),
        "g2": 1.0 + 0.1 * jax.random.normal(k5, (f3,), jnp.float32),
        "b2": 0.1 * jax.random.normal(k6, (f3,), jnp.float32),
    }


def reference_forward(params, x_nchw, *, pad):
    """Pure-JAX/XLA reference of the PyTorch skip_connection forward."""
    x = jnp.transpose(x_nchw, (0, 2, 3, 1)).astype(jnp.float32)

    def conv(v, wgt):
        return lax.conv_general_dilated(
            v, wgt.astype(jnp.float32), window_strides=(1, 1),
            padding=((pad, pad), (pad, pad)),
            dimension_numbers=("NHWC", "HWIO", "NHWC"))

    def bn(v, g, b):
        mean = jnp.mean(v, axis=(0, 1, 2), keepdims=True)
        var = jnp.mean((v - mean) ** 2, axis=(0, 1, 2), keepdims=True)
        return ((v - mean) * lax.rsqrt(var + EPS) * g.reshape(1, 1, 1, -1)
                + b.reshape(1, 1, 1, -1))

    y = jax.nn.relu(bn(conv(x, params["w1"]), params["g1"], params["b1"]))
    z = bn(conv(y, params["w2"]), params["g2"], params["b2"]) + x
    z = jax.nn.relu(z)
    return jnp.transpose(z, (0, 3, 1, 2))


if __name__ == "__main__":
    key = jax.random.PRNGKey(0)
    k_param, k_x = jax.random.split(key)

    channels = (64, 32, 64)       # (F1, F2, F3); F3 == F1 for the residual add
    kernel = 3
    pad = (kernel - 1) // 2
    batch, height, width = 2, 16, 16

    params = make_params(k_param, channels, kernel)
    x = jax.random.normal(k_x, (batch, channels[0], height, width), jnp.float32)

    fwd = jax.jit(functools.partial(skip_connection_forward, pad=pad))
    out = jax.block_until_ready(fwd(params, x))

    assert out.shape == (batch, channels[2], height, width), out.shape
    assert bool(jnp.all(jnp.isfinite(out)))

    # Pure-JAX reference check (bf16 MXU operands -> loose tolerance).
    ref = reference_forward(params, x, pad=pad)
    np.testing.assert_allclose(np.asarray(out), np.asarray(ref),
                               rtol=5e-2, atol=5e-2)

    print("KERNEL_OK")
</pallas_src>

<mosaic_0001>
module attributes {stable_mosaic.version = 11 : i64} {
  func.func @_conv_tap_kernel(%arg0: i32, %arg1: memref<1x342x64xf32, #tpu.memory_space<vmem>>, %arg2: memref<3x3x64x32xbf16, #tpu.memory_space<vmem>>, %arg3: memref<288x1xf32, #tpu.memory_space<vmem>>, %arg4: memref<1x288x32xf32, #tpu.memory_space<vmem>>, %arg5: memref<2x32xf32, #tpu.memory_space<vmem>>) attributes {dimension_semantics = [#tpu.dimension_semantics<arbitrary>], iteration_bounds = array<i64: 2>, scalar_prefetch = 0 : i64, scratch_operands = 0 : i64, tpu.core_type = #tpu.core_type<tc>, window_params = [{transform_indices = @transform_0, window_bounds = array<i64: 1, 342, 64>}, {pipeline_mode = #tpu.pipeline_mode<synchronous>, transform_indices = @transform_1, window_bounds = array<i64: 3, 3, 64, 32>}, {pipeline_mode = #tpu.pipeline_mode<synchronous>, transform_indices = @transform_2, window_bounds = array<i64: 288, 1>}, {transform_indices = @transform_3, window_bounds = array<i64: 1, 288, 32>}, {pipeline_mode = #tpu.pipeline_mode<synchronous>, transform_indices = @transform_4, window_bounds = array<i64: 2, 32>}]} {
    %c0 = arith.constant 0 : index
    %c0_0 = arith.constant 0 : index
    %c0_1 = arith.constant 0 : index
    %0 = vector.load %arg1[%c0, %c0_0, %c0_1] : memref<1x342x64xf32, #tpu.memory_space<vmem>>, vector<1x342x64xf32>
    %1 = vector.shape_cast %0 : vector<1x342x64xf32> to vector<342x64xf32>
    %cst = arith.constant 0.000000e+00 : f32
    %2 = vector.broadcast %cst : f32 to vector<288x32xf32>
    %3 = vector.extract_strided_slice %1 {offsets = [0, 0], sizes = [288, 64], strides = [1, 1]} : vector<342x64xf32> to vector<288x64xf32>
    %4 = arith.truncf %3 : vector<288x64xf32> to vector<288x64xbf16>
    %c0_2 = arith.constant 0 : index
    %c0_3 = arith.constant 0 : index
    %c0_4 = arith.constant 0 : index
    %c0_5 = arith.constant 0 : index
    %5 = vector.load %arg2[%c0_2, %c0_3, %c0_4, %c0_5] : memref<3x3x64x32xbf16, #tpu.memory_space<vmem>>, vector<1x1x64x32xbf16>
    %6 = vector.shape_cast %5 : vector<1x1x64x32xbf16> to vector<64x32xbf16>
    %cst_6 = arith.constant dense<0.000000e+00> : vector<288x32xf32>
    %7 = tpu.matmul %4, %6, %cst_6 {dimension_numbers = #tpu.dot_dimension_numbers<[1], [0], [0], [1], [0, 0, 1, 1], [], []>} : vector<288x64xbf16>, vector<64x32xbf16>, vector<288x32xf32> -> vector<288x32xf32>
    %8 = arith.addf %2, %7 : vector<288x32xf32>
    %9 = vector.extract_strided_slice %1 {offsets = [1, 0], sizes = [288, 64], strides = [1, 1]} : vector<342x64xf32> to vector<288x64xf32>
    %10 = arith.truncf %9 : vector<288x64xf32> to vector<288x64xbf16>
    %c0_7 = arith.constant 0 : index
    %c1 = arith.constant 1 : index
    %c0_8 = arith.constant 0 : index
    %c0_9 = arith.constant 0 : index
    %11 = vector.load %arg2[%c0_7, %c1, %c0_8, %c0_9] : memref<3x3x64x32xbf16, #tpu.memory_space<vmem>>, vector<1x1x64x32xbf16>
    %12 = vector.shape_cast %11 : vector<1x1x64x32xbf16> to vector<64x32xbf16>
    %cst_10 = arith.constant dense<0.000000e+00> : vector<288x32xf32>
    %13 = tpu.matmul %10, %12, %cst_10 {dimension_numbers = #tpu.dot_dimension_numbers<[1], [0], [0], [1], [0, 0, 1, 1], [], []>} : vector<288x64xbf16>, vector<64x32xbf16>, vector<288x32xf32> -> vector<288x32xf32>
    %14 = arith.addf %8, %13 : vector<288x32xf32>
    %15 = vector.extract_strided_slice %1 {offsets = [2, 0], sizes = [288, 64], strides = [1, 1]} : vector<342x64xf32> to vector<288x64xf32>
    %16 = arith.truncf %15 : vector<288x64xf32> to vector<288x64xbf16>
    %c0_11 = arith.constant 0 : index
    %c2 = arith.constant 2 : index
    %c0_12 = arith.constant 0 : index
    %c0_13 = arith.constant 0 : index
    %17 = vector.load %arg2[%c0_11, %c2, %c0_12, %c0_13] : memref<3x3x64x32xbf16, #tpu.memory_space<vmem>>, vector<1x1x64x32xbf16>
    %18 = vector.shape_cast %17 : vector<1x1x64x32xbf16> to vector<64x32xbf16>
    %cst_14 = arith.constant dense<0.000000e+00> : vector<288x32xf32>
    %19 = tpu.matmul %16, %18, %cst_14 {dimension_numbers = #tpu.dot_dimension_numbers<[1], [0], [0], [1], [0, 0, 1, 1], [], []>} : vector<288x64xbf16>, vector<64x32xbf16>, vector<288x32xf32> -> vector<288x32xf32>
    %20 = arith.addf %14, %19 : vector<288x32xf32>
    %21 = vector.extract_strided_slice %1 {offsets = [18, 0], sizes = [288, 64], strides = [1, 1]} : vector<342x64xf32> to vector<288x64xf32>
    %22 = arith.truncf %21 : vector<288x64xf32> to vector<288x64xbf16>
    %c1_15 = arith.constant 1 : index
    %c0_16 = arith.constant 0 : index
    %c0_17 = arith.constant 0 : index
    %c0_18 = arith.constant 0 : index
    %23 = vector.load %arg2[%c1_15, %c0_16, %c0_17, %c0_18] : memref<3x3x64x32xbf16, #tpu.memory_space<vmem>>, vector<1x1x64x32xbf16>
    %24 = vector.shape_cast %23 : vector<1x1x64x32xbf16> to vector<64x32xbf16>
    %cst_19 = arith.constant dense<0.000000e+00> : vector<288x32xf32>
    %25 = tpu.matmul %22, %24, %cst_19 {dimension_numbers = #tpu.dot_dimension_numbers<[1], [0], [0], [1], [0, 0, 1, 1], [], []>} : vector<288x64xbf16>, vector<64x32xbf16>, vector<288x32xf32> -> vector<288x32xf32>
    %26 = arith.addf %20, %25 : vector<288x32xf32>
    %27 = vector.extract_strided_slice %1 {offsets = [19, 0], sizes = [288, 64], strides = [1, 1]} : vector<342x64xf32> to vector<288x64xf32>
    %28 = arith.truncf %27 : vector<288x64xf32> to vector<288x64xbf16>
    %c1_20 = arith.constant 1 : index
    %c1_21 = arith.constant 1 : index
    %c0_22 = arith.constant 0 : index
    %c0_23 = arith.constant 0 : index
    %29 = vector.load %arg2[%c1_20, %c1_21, %c0_22, %c0_23] : memref<3x3x64x32xbf16, #tpu.memory_space<vmem>>, vector<1x1x64x32xbf16>
    %30 = vector.shape_cast %29 : vector<1x1x64x32xbf16> to vector<64x32xbf16>
    %cst_24 = arith.constant dense<0.000000e+00> : vector<288x32xf32>
    %31 = tpu.matmul %28, %30, %cst_24 {dimension_numbers = #tpu.dot_dimension_numbers<[1], [0], [0], [1], [0, 0, 1, 1], [], []>} : vector<288x64xbf16>, vector<64x32xbf16>, vector<288x32xf32> -> vector<288x32xf32>
    %32 = arith.addf %26, %31 : vector<288x32xf32>
    %33 = vector.extract_strided_slice %1 {offsets = [20, 0], sizes = [288, 64], strides = [1, 1]} : vector<342x64xf32> to vector<288x64xf32>
    %34 = arith.truncf %33 : vector<288x64xf32> to vector<288x64xbf16>
    %c1_25 = arith.constant 1 : index
    %c2_26 = arith.constant 2 : index
    %c0_27 = arith.constant 0 : index
    %c0_28 = arith.constant 0 : index
    %35 = vector.load %arg2[%c1_25, %c2_26, %c0_27, %c0_28] : memref<3x3x64x32xbf16, #tpu.memory_space<vmem>>, vector<1x1x64x32xbf16>
    %36 = vector.shape_cast %35 : vector<1x1x64x32xbf16> to vector<64x32xbf16>
    %cst_29 = arith.constant dense<0.000000e+00> : vector<288x32xf32>
    %37 = tpu.matmul %34, %36, %cst_29 {dimension_numbers = #tpu.dot_dimension_numbers<[1], [0], [0], [1], [0, 0, 1, 1], [], []>} : vector<288x64xbf16>, vector<64x32xbf16>, vector<288x32xf32> -> vector<288x32xf32>
    %38 = arith.addf %32, %37 : vector<288x32xf32>
    %39 = vector.extract_strided_slice %1 {offsets = [36, 0], sizes = [288, 64], strides = [1, 1]} : vector<342x64xf32> to vector<288x64xf32>
    %40 = arith.truncf %39 : vector<288x64xf32> to vector<288x64xbf16>
    %c2_30 = arith.constant 2 : index
    %c0_31 = arith.constant 0 : index
    %c0_32 = arith.constant 0 : index
    %c0_33 = arith.constant 0 : index
    %41 = vector.load %arg2[%c2_30, %c0_31, %c0_32, %c0_33] : memref<3x3x64x32xbf16, #tpu.memory_space<vmem>>, vector<1x1x64x32xbf16>
    %42 = vector.shape_cast %41 : vector<1x1x64x32xbf16> to vector<64x32xbf16>
    %cst_34 = arith.constant dense<0.000000e+00> : vector<288x32xf32>
    %43 = tpu.matmul %40, %42, %cst_34 {dimension_numbers = #tpu.dot_dimension_numbers<[1], [0], [0], [1], [0, 0, 1, 1], [], []>} : vector<288x64xbf16>, vector<64x32xbf16>, vector<288x32xf32> -> vector<288x32xf32>
    %44 = arith.addf %38, %43 : vector<288x32xf32>
    %45 = vector.extract_strided_slice %1 {offsets = [37, 0], sizes = [288, 64], strides = [1, 1]} : vector<342x64xf32> to vector<288x64xf32>
    %46 = arith.truncf %45 : vector<288x64xf32> to vector<288x64xbf16>
    %c2_35 = arith.constant 2 : index
    %c1_36 = arith.constant 1 : index
    %c0_37 = arith.constant 0 : index
    %c0_38 = arith.constant 0 : index
    %47 = vector.load %arg2[%c2_35, %c1_36, %c0_37, %c0_38] : memref<3x3x64x32xbf16, #tpu.memory_space<vmem>>, vector<1x1x64x32xbf16>
    %48 = vector.shape_cast %47 : vector<1x1x64x32xbf16> to vector<64x32xbf16>
    %cst_39 = arith.constant dense<0.000000e+00> : vector<288x32xf32>
    %49 = tpu.matmul %46, %48, %cst_39 {dimension_numbers = #tpu.dot_dimension_numbers<[1], [0], [0], [1], [0, 0, 1, 1], [], []>} : vector<288x64xbf16>, vector<64x32xbf16>, vector<288x32xf32> -> vector<288x32xf32>
    %50 = arith.addf %44, %49 : vector<288x32xf32>
    %51 = vector.extract_strided_slice %1 {offsets = [38, 0], sizes = [288, 64], strides = [1, 1]} : vector<342x64xf32> to vector<288x64xf32>
    %52 = arith.truncf %51 : vector<288x64xf32> to vector<288x64xbf16>
    %c2_40 = arith.constant 2 : index
    %c2_41 = arith.constant 2 : index
    %c0_42 = arith.constant 0 : index
    %c0_43 = arith.constant 0 : index
    %53 = vector.load %arg2[%c2_40, %c2_41, %c0_42, %c0_43] : memref<3x3x64x32xbf16, #tpu.memory_space<vmem>>, vector<1x1x64x32xbf16>
    %54 = vector.shape_cast %53 : vector<1x1x64x32xbf16> to vector<64x32xbf16>
    %cst_44 = arith.constant dense<0.000000e+00> : vector<288x32xf32>
    %55 = tpu.matmul %52, %54, %cst_44 {dimension_numbers = #tpu.dot_dimension_numbers<[1], [0], [0], [1], [0, 0, 1, 1], [], []>} : vector<288x64xbf16>, vector<64x32xbf16>, vector<288x32xf32> -> vector<288x32xf32>
    %56 = arith.addf %50, %55 : vector<288x32xf32>
    %c0_45 = arith.constant 0 : index
    %c0_46 = arith.constant 0 : index
    %57 = vector.load %arg3[%c0_45, %c0_46] : memref<288x1xf32, #tpu.memory_space<vmem>>, vector<288x1xf32>
    %58 = vector.broadcast %57 : vector<288x1xf32> to vector<288x32xf32>
    %59 = arith.mulf %56, %58 : vector<288x32xf32>
    %c0_47 = arith.constant 0 : index
    %c0_48 = arith.constant 0 : index
    %c0_49 = arith.constant 0 : index
    %60 = vector.load %arg4[%c0_47, %c0_48, %c0_49] : memref<1x288x32xf32, #tpu.memory_space<vmem>>, vector<1x288x32xf32>
    %61 = vector.shape_cast %60 : vector<1x288x32xf32> to vector<288x32xf32>
    %62 = vector.shape_cast %59 : vector<288x32xf32> to vector<1x288x32xf32>
    tpu.vector_store %arg4[%c0_47, %c0_48, %c0_49], %62 {strides = array<i32>} : memref<1x288x32xf32, #tpu.memory_space<vmem>>, vector<1x288x32xf32>,
    %c0_i32 = arith.constant 0 : i32
    %63 = arith.cmpi eq, %arg0, %c0_i32 : i32
    %64 = arith.extui %63 : i1 to i32
    %c0_i32_50 = arith.constant 0 : i32
    %65 = arith.cmpi ne, %64, %c0_i32_50 : i32
    scf.if %65 {
      %cst_61 = arith.constant 0.000000e+00 : f32
      %77 = vector.broadcast %cst_61 : f32 to vector<2x32xf32>
      %c0_62 = arith.constant 0 : index
      %c0_63 = arith.constant 0 : index
      %78 = vector.load %arg5[%c0_62, %c0_63] : memref<2x32xf32, #tpu.memory_space<vmem>>, vector<2x32xf32>
      tpu.vector_store %arg5[%c0_62, %c0_63], %77 {strides = array<i32>} : memref<2x32xf32, #tpu.memory_space<vmem>>, vector<2x32xf32>,
    } else {
    }
    %c0_51 = arith.constant 0 : index
    %c0_52 = arith.constant 0 : index
    %66 = vector.load %arg5[%c0_51, %c0_52] : memref<2x32xf32, #tpu.memory_space<vmem>>, vector<1x32xf32>
    %cst_53 = arith.constant dense<0.000000e+00> : vector<32xf32>
    %67 = vector.multi_reduction <add>, %59, %cst_53 [0] : vector<288x32xf32> to vector<32xf32>
    %68 = vector.shape_cast %67 : vector<32xf32> to vector<1x32xf32>
    %69 = arith.addf %66, %68 : vector<1x32xf32>
    %c0_54 = arith.constant 0 : index
    %c0_55 = arith.constant 0 : index
    %70 = vector.load %arg5[%c0_54, %c0_55] : memref<2x32xf32, #tpu.memory_space<vmem>>, vector<1x32xf32>
    tpu.vector_store %arg5[%c0_54, %c0_55], %69 {strides = array<i32>} : memref<2x32xf32, #tpu.memory_space<vmem>>, vector<1x32xf32>,
    %c1_56 = arith.constant 1 : index
    %c0_57 = arith.constant 0 : index
    %71 = vector.load %arg5[%c1_56, %c0_57] : memref<2x32xf32, #tpu.memory_space<vmem>>, vector<1x32xf32>
    %72 = arith.mulf %59, %59 : vector<288x32xf32>
    %cst_58 = arith.constant dense<0.000000e+00> : vector<32xf32>
    %73 = vector.multi_reduction <add>, %72, %cst_58 [0] : vector<288x32xf32> to vector<32xf32>
    %74 = vector.shape_cast %73 : vector<32xf32> to vector<1x32xf32>
    %75 = arith.addf %71, %74 : vector<1x32xf32>
    %c1_59 = arith.constant 1 : index
    %c0_60 = arith.constant 0 : index
    %76 = vector.load %arg5[%c1_59, %c0_60] : memref<2x32xf32, #tpu.memory_space<vmem>>, vector<1x32xf32>
    tpu.vector_store %arg5[%c1_59, %c0_60], %75 {strides = array<i32>} : memref<2x32xf32, #tpu.memory_space<vmem>>, vector<1x32xf32>,
    return
  }
  func.func @transform_0(%arg0: i32) -> (i32, i32, i32) {
    %c0_i32 = arith.constant 0 : i32
    %c0_i32_0 = arith.constant 0 : i32
    %c0_i32_1 = arith.constant 0 : i32
    return %arg0, %c0_i32, %c0_i32_0 : i32, i32, i32
  }
  func.func @transform_1(%arg0: i32) -> (i32, i32, i32, i32) {
    %c0_i32 = arith.constant 0 : i32
    %c0_i32_0 = arith.constant 0 : i32
    %c0_i32_1 = arith.constant 0 : i32
    %c0_i32_2 = arith.constant 0 : i32
    %c0_i32_3 = arith.constant 0 : i32
    return %c0_i32, %c0_i32_0, %c0_i32_1, %c0_i32_2 : i32, i32, i32, i32
  }
  func.func @transform_2(%arg0: i32) -> (i32, i32) {
    %c0_i32 = arith.constant 0 : i32
    %c0_i32_0 = arith.constant 0 : i32
    %c0_i32_1 = arith.constant 0 : i32
    return %c0_i32, %c0_i32_0 : i32, i32
  }
  func.func @transform_3(%arg0: i32) -> (i32, i32, i32) {
    %c0_i32 = arith.constant 0 : i32
    %c0_i32_0 = arith.constant 0 : i32
    %c0_i32_1 = arith.constant 0 : i32
    return %arg0, %c0_i32, %c0_i32_0 : i32, i32, i32
  }
  func.func @transform_4(%arg0: i32) -> (i32, i32) {
    %c0_i32 = arith.constant 0 : i32
    %c0_i32_0 = arith.constant 0 : i32
    %c0_i32_1 = arith.constant 0 : i32
    return %c0_i32, %c0_i32_0 : i32, i32
  }
}

module attributes {stable_mosaic.version = 11 : i64} {
  func.func @_bn_act_kernel(%arg0: i32, %arg1: memref<128x128xf32, #tpu.memory_space<vmem>>, %arg2: memref<2x128xf32, #tpu.memory_space<vmem>>, %arg3: memref<1x128xf32, #tpu.memory_space<vmem>>, %arg4: memref<1x128xf32, #tpu.memory_space<vmem>>, %arg5: memref<128x128xf32, #tpu.memory_space<vmem>>) attributes {dimension_semantics = [#tpu.dimension_semantics<parallel>], iteration_bounds = array<i64: 1>, scalar_prefetch = 0 : i64, scratch_operands = 0 : i64, tpu.core_type = #tpu.core_type<tc>, window_params = [{transform_indices = @transform_0, window_bounds = array<i64: 128, 128>}, {pipeline_mode = #tpu.pipeline_mode<synchronous>, transform_indices = @transform_1, window_bounds = array<i64: 2, 128>}, {pipeline_mode = #tpu.pipeline_mode<synchronous>, transform_indices = @transform_2, window_bounds = array<i64: 1, 128>}, {pipeline_mode = #tpu.pipeline_mode<synchronous>, transform_indices = @transform_3, window_bounds = array<i64: 1, 128>}, {transform_indices = @transform_4, window_bounds = array<i64: 128, 128>}]} {
    %c0 = arith.constant 0 : index
    %c0_0 = arith.constant 0 : index
    %0 = vector.load %arg2[%c0, %c0_0] : memref<2x128xf32, #tpu.memory_space<vmem>>, vector<1x128xf32>
    %cst = arith.constant 0.001953125 : f32
    %1 = vector.broadcast %cst : f32 to vector<1x128xf32>
    %2 = arith.mulf %0, %1 : vector<1x128xf32>
    %c1 = arith.constant 1 : index
    %c0_1 = arith.constant 0 : index
    %3 = vector.load %arg2[%c1, %c0_1] : memref<2x128xf32, #tpu.memory_space<vmem>>, vector<1x128xf32>
    %cst_2 = arith.constant 0.001953125 : f32
    %4 = vector.broadcast %cst_2 : f32 to vector<1x128xf32>
    %5 = arith.mulf %3, %4 : vector<1x128xf32>
    %6 = arith.mulf %2, %2 : vector<1x128xf32>
    %7 = arith.subf %5, %6 : vector<1x128xf32>
    %c0_3 = arith.constant 0 : index
    %c0_4 = arith.constant 0 : index
    %8 = vector.load %arg3[%c0_3, %c0_4] : memref<1x128xf32, #tpu.memory_space<vmem>>, vector<1x128xf32>
    %cst_5 = arith.constant 9.99999974E-6 : f32
    %9 = vector.broadcast %cst_5 : f32 to vector<1x128xf32>
    %10 = arith.addf %7, %9 : vector<1x128xf32>
    %11 = math.rsqrt %10 : vector<1x128xf32>
    %12 = arith.mulf %8, %11 : vector<1x128xf32>
    %c0_6 = arith.constant 0 : index
    %c0_7 = arith.constant 0 : index
    %13 = vector.load %arg1[%c0_6, %c0_7] : memref<128x128xf32, #tpu.memory_space<vmem>>, vector<128x128xf32>
    %14 = vector.broadcast %2 : vector<1x128xf32> to vector<128x128xf32>
    %15 = arith.subf %13, %14 : vector<128x128xf32>
    %16 = vector.broadcast %12 : vector<1x128xf32> to vector<128x128xf32>
    %17 = arith.mulf %15, %16 : vector<128x128xf32>
    %c0_8 = arith.constant 0 : index
    %c0_9 = arith.constant 0 : index
    %18 = vector.load %arg4[%c0_8, %c0_9] : memref<1x128xf32, #tpu.memory_space<vmem>>, vector<1x128xf32>
    %19 = vector.broadcast %18 : vector<1x128xf32> to vector<128x128xf32>
    %20 = arith.addf %17, %19 : vector<128x128xf32>
    %cst_10 = arith.constant 0.000000e+00 : f32
    %21 = vector.broadcast %cst_10 : f32 to vector<128x128xf32>
    %22 = arith.maximumf %20, %21 : vector<128x128xf32>
    %c0_11 = arith.constant 0 : index
    %c0_12 = arith.constant 0 : index
    %23 = vector.load %arg5[%c0_11, %c0_12] : memref<128x128xf32, #tpu.memory_space<vmem>>, vector<128x128xf32>
    tpu.vector_store %arg5[%c0_11, %c0_12], %22 {strides = array<i32>} : memref<128x128xf32, #tpu.memory_space<vmem>>, vector<128x128xf32>,
    return
  }
  func.func @transform_0(%arg0: i32) -> (i32, i32) {
    %c0_i32 = arith.constant 0 : i32
    %c0_i32_0 = arith.constant 0 : i32
    return %arg0, %c0_i32 : i32, i32
  }
  func.func @transform_1(%arg0: i32) -> (i32, i32) {
    %c0_i32 = arith.constant 0 : i32
    %c0_i32_0 = arith.constant 0 : i32
    %c0_i32_1 = arith.constant 0 : i32
    return %c0_i32, %c0_i32_0 : i32, i32
  }
  func.func @transform_2(%arg0: i32) -> (i32, i32) {
    %c0_i32 = arith.constant 0 : i32
    %c0_i32_0 = arith.constant 0 : i32
    %c0_i32_1 = arith.constant 0 : i32
    return %c0_i32, %c0_i32_0 : i32, i32
  }
  func.func @transform_3(%arg0: i32) -> (i32, i32) {
    %c0_i32 = arith.constant 0 : i32
    %c0_i32_0 = arith.constant 0 : i32
    %c0_i32_1 = arith.constant 0 : i32
    return %c0_i32, %c0_i32_0 : i32, i32
  }
  func.func @transform_4(%arg0: i32) -> (i32, i32) {
    %c0_i32 = arith.constant 0 : i32
    %c0_i32_0 = arith.constant 0 : i32
    return %arg0, %c0_i32 : i32, i32
  }
}

module attributes {stable_mosaic.version = 11 : i64} {
  func.func @_conv_tap_kernel(%arg0: i32, %arg1: memref<1x342x32xf32, #tpu.memory_space<vmem>>, %arg2: memref<3x3x32x64xbf16, #tpu.memory_space<vmem>>, %arg3: memref<288x1xf32, #tpu.memory_space<vmem>>, %arg4: memref<1x288x64xf32, #tpu.memory_space<vmem>>, %arg5: memref<2x64xf32, #tpu.memory_space<vmem>>) attributes {dimension_semantics = [#tpu.dimension_semantics<arbitrary>], iteration_bounds = array<i64: 2>, scalar_prefetch = 0 : i64, scratch_operands = 0 : i64, tpu.core_type = #tpu.core_type<tc>, window_params = [{transform_indices = @transform_0, window_bounds = array<i64: 1, 342, 32>}, {pipeline_mode = #tpu.pipeline_mode<synchronous>, transform_indices = @transform_1, window_bounds = array<i64: 3, 3, 32, 64>}, {pipeline_mode = #tpu.pipeline_mode<synchronous>, transform_indices = @transform_2, window_bounds = array<i64: 288, 1>}, {transform_indices = @transform_3, window_bounds = array<i64: 1, 288, 64>}, {pipeline_mode = #tpu.pipeline_mode<synchronous>, transform_indices = @transform_4, window_bounds = array<i64: 2, 64>}]} {
    %c0 = arith.constant 0 : index
    %c0_0 = arith.constant 0 : index
    %c0_1 = arith.constant 0 : index
    %0 = vector.load %arg1[%c0, %c0_0, %c0_1] : memref<1x342x32xf32, #tpu.memory_space<vmem>>, vector<1x342x32xf32>
    %1 = vector.shape_cast %0 : vector<1x342x32xf32> to vector<342x32xf32>
    %cst = arith.constant 0.000000e+00 : f32
    %2 = vector.broadcast %cst : f32 to vector<288x64xf32>
    %3 = vector.extract_strided_slice %1 {offsets = [0, 0], sizes = [288, 32], strides = [1, 1]} : vector<342x32xf32> to vector<288x32xf32>
    %4 = arith.truncf %3 : vector<288x32xf32> to vector<288x32xbf16>
    %c0_2 = arith.constant 0 : index
    %c0_3 = arith.constant 0 : index
    %c0_4 = arith.constant 0 : index
    %c0_5 = arith.constant 0 : index
    %5 = vector.load %arg2[%c0_2, %c0_3, %c0_4, %c0_5] : memref<3x3x32x64xbf16, #tpu.memory_space<vmem>>, vector<1x1x32x64xbf16>
    %6 = vector.shape_cast %5 : vector<1x1x32x64xbf16> to vector<32x64xbf16>
    %cst_6 = arith.constant dense<0.000000e+00> : vector<288x64xf32>
    %7 = tpu.matmul %4, %6, %cst_6 {dimension_numbers = #tpu.dot_dimension_numbers<[1], [0], [0], [1], [0, 0, 1, 1], [], []>} : vector<288x32xbf16>, vector<32x64xbf16>, vector<288x64xf32> -> vector<288x64xf32>
    %8 = arith.addf %2, %7 : vector<288x64xf32>
    %9 = vector.extract_strided_slice %1 {offsets = [1, 0], sizes = [288, 32], strides = [1, 1]} : vector<342x32xf32> to vector<288x32xf32>
    %10 = arith.truncf %9 : vector<288x32xf32> to vector<288x32xbf16>
    %c0_7 = arith.constant 0 : index
    %c1 = arith.constant 1 : index
    %c0_8 = arith.constant 0 : index
    %c0_9 = arith.constant 0 : index
    %11 = vector.load %arg2[%c0_7, %c1, %c0_8, %c0_9] : memref<3x3x32x64xbf16, #tpu.memory_space<vmem>>, vector<1x1x32x64xbf16>
    %12 = vector.shape_cast %11 : vector<1x1x32x64xbf16> to vector<32x64xbf16>
    %cst_10 = arith.constant dense<0.000000e+00> : vector<288x64xf32>
    %13 = tpu.matmul %10, %12, %cst_10 {dimension_numbers = #tpu.dot_dimension_numbers<[1], [0], [0], [1], [0, 0, 1, 1], [], []>} : vector<288x32xbf16>, vector<32x64xbf16>, vector<288x64xf32> -> vector<288x64xf32>
    %14 = arith.addf %8, %13 : vector<288x64xf32>
    %15 = vector.extract_strided_slice %1 {offsets = [2, 0], sizes = [288, 32], strides = [1, 1]} : vector<342x32xf32> to vector<288x32xf32>
    %16 = arith.truncf %15 : vector<288x32xf32> to vector<288x32xbf16>
    %c0_11 = arith.constant 0 : index
    %c2 = arith.constant 2 : index
    %c0_12 = arith.constant 0 : index
    %c0_13 = arith.constant 0 : index
    %17 = vector.load %arg2[%c0_11, %c2, %c0_12, %c0_13] : memref<3x3x32x64xbf16, #tpu.memory_space<vmem>>, vector<1x1x32x64xbf16>
    %18 = vector.shape_cast %17 : vector<1x1x32x64xbf16> to vector<32x64xbf16>
    %cst_14 = arith.constant dense<0.000000e+00> : vector<288x64xf32>
    %19 = tpu.matmul %16, %18, %cst_14 {dimension_numbers = #tpu.dot_dimension_numbers<[1], [0], [0], [1], [0, 0, 1, 1], [], []>} : vector<288x32xbf16>, vector<32x64xbf16>, vector<288x64xf32> -> vector<288x64xf32>
    %20 = arith.addf %14, %19 : vector<288x64xf32>
    %21 = vector.extract_strided_slice %1 {offsets = [18, 0], sizes = [288, 32], strides = [1, 1]} : vector<342x32xf32> to vector<288x32xf32>
    %22 = arith.truncf %21 : vector<288x32xf32> to vector<288x32xbf16>
    %c1_15 = arith.constant 1 : index
    %c0_16 = arith.constant 0 : index
    %c0_17 = arith.constant 0 : index
    %c0_18 = arith.constant 0 : index
    %23 = vector.load %arg2[%c1_15, %c0_16, %c0_17, %c0_18] : memref<3x3x32x64xbf16, #tpu.memory_space<vmem>>, vector<1x1x32x64xbf16>
    %24 = vector.shape_cast %23 : vector<1x1x32x64xbf16> to vector<32x64xbf16>
    %cst_19 = arith.constant dense<0.000000e+00> : vector<288x64xf32>
    %25 = tpu.matmul %22, %24, %cst_19 {dimension_numbers = #tpu.dot_dimension_numbers<[1], [0], [0], [1], [0, 0, 1, 1], [], []>} : vector<288x32xbf16>, vector<32x64xbf16>, vector<288x64xf32> -> vector<288x64xf32>
    %26 = arith.addf %20, %25 : vector<288x64xf32>
    %27 = vector.extract_strided_slice %1 {offsets = [19, 0], sizes = [288, 32], strides = [1, 1]} : vector<342x32xf32> to vector<288x32xf32>
    %28 = arith.truncf %27 : vector<288x32xf32> to vector<288x32xbf16>
    %c1_20 = arith.constant 1 : index
    %c1_21 = arith.constant 1 : index
    %c0_22 = arith.constant 0 : index
    %c0_23 = arith.constant 0 : index
    %29 = vector.load %arg2[%c1_20, %c1_21, %c0_22, %c0_23] : memref<3x3x32x64xbf16, #tpu.memory_space<vmem>>, vector<1x1x32x64xbf16>
    %30 = vector.shape_cast %29 : vector<1x1x32x64xbf16> to vector<32x64xbf16>
    %cst_24 = arith.constant dense<0.000000e+00> : vector<288x64xf32>
    %31 = tpu.matmul %28, %30, %cst_24 {dimension_numbers = #tpu.dot_dimension_numbers<[1], [0], [0], [1], [0, 0, 1, 1], [], []>} : vector<288x32xbf16>, vector<32x64xbf16>, vector<288x64xf32> -> vector<288x64xf32>
    %32 = arith.addf %26, %31 : vector<288x64xf32>
    %33 = vector.extract_strided_slice %1 {offsets = [20, 0], sizes = [288, 32], strides = [1, 1]} : vector<342x32xf32> to vector<288x32xf32>
    %34 = arith.truncf %33 : vector<288x32xf32> to vector<288x32xbf16>
    %c1_25 = arith.constant 1 : index
    %c2_26 = arith.constant 2 : index
    %c0_27 = arith.constant 0 : index
    %c0_28 = arith.constant 0 : index
    %35 = vector.load %arg2[%c1_25, %c2_26, %c0_27, %c0_28] : memref<3x3x32x64xbf16, #tpu.memory_space<vmem>>, vector<1x1x32x64xbf16>
    %36 = vector.shape_cast %35 : vector<1x1x32x64xbf16> to vector<32x64xbf16>
    %cst_29 = arith.constant dense<0.000000e+00> : vector<288x64xf32>
    %37 = tpu.matmul %34, %36, %cst_29 {dimension_numbers = #tpu.dot_dimension_numbers<[1], [0], [0], [1], [0, 0, 1, 1], [], []>} : vector<288x32xbf16>, vector<32x64xbf16>, vector<288x64xf32> -> vector<288x64xf32>
    %38 = arith.addf %32, %37 : vector<288x64xf32>
    %39 = vector.extract_strided_slice %1 {offsets = [36, 0], sizes = [288, 32], strides = [1, 1]} : vector<342x32xf32> to vector<288x32xf32>
    %40 = arith.truncf %39 : vector<288x32xf32> to vector<288x32xbf16>
    %c2_30 = arith.constant 2 : index
    %c0_31 = arith.constant 0 : index
    %c0_32 = arith.constant 0 : index
    %c0_33 = arith.constant 0 : index
    %41 = vector.load %arg2[%c2_30, %c0_31, %c0_32, %c0_33] : memref<3x3x32x64xbf16, #tpu.memory_space<vmem>>, vector<1x1x32x64xbf16>
    %42 = vector.shape_cast %41 : vector<1x1x32x64xbf16> to vector<32x64xbf16>
    %cst_34 = arith.constant dense<0.000000e+00> : vector<288x64xf32>
    %43 = tpu.matmul %40, %42, %cst_34 {dimension_numbers = #tpu.dot_dimension_numbers<[1], [0], [0], [1], [0, 0, 1, 1], [], []>} : vector<288x32xbf16>, vector<32x64xbf16>, vector<288x64xf32> -> vector<288x64xf32>
    %44 = arith.addf %38, %43 : vector<288x64xf32>
    %45 = vector.extract_strided_slice %1 {offsets = [37, 0], sizes = [288, 32], strides = [1, 1]} : vector<342x32xf32> to vector<288x32xf32>
    %46 = arith.truncf %45 : vector<288x32xf32> to vector<288x32xbf16>
    %c2_35 = arith.constant 2 : index
    %c1_36 = arith.constant 1 : index
    %c0_37 = arith.constant 0 : index
    %c0_38 = arith.constant 0 : index
    %47 = vector.load %arg2[%c2_35, %c1_36, %c0_37, %c0_38] : memref<3x3x32x64xbf16, #tpu.memory_space<vmem>>, vector<1x1x32x64xbf16>
    %48 = vector.shape_cast %47 : vector<1x1x32x64xbf16> to vector<32x64xbf16>
    %cst_39 = arith.constant dense<0.000000e+00> : vector<288x64xf32>
    %49 = tpu.matmul %46, %48, %cst_39 {dimension_numbers = #tpu.dot_dimension_numbers<[1], [0], [0], [1], [0, 0, 1, 1], [], []>} : vector<288x32xbf16>, vector<32x64xbf16>, vector<288x64xf32> -> vector<288x64xf32>
    %50 = arith.addf %44, %49 : vector<288x64xf32>
    %51 = vector.extract_strided_slice %1 {offsets = [38, 0], sizes = [288, 32], strides = [1, 1]} : vector<342x32xf32> to vector<288x32xf32>
    %52 = arith.truncf %51 : vector<288x32xf32> to vector<288x32xbf16>
    %c2_40 = arith.constant 2 : index
    %c2_41 = arith.constant 2 : index
    %c0_42 = arith.constant 0 : index
    %c0_43 = arith.constant 0 : index
    %53 = vector.load %arg2[%c2_40, %c2_41, %c0_42, %c0_43] : memref<3x3x32x64xbf16, #tpu.memory_space<vmem>>, vector<1x1x32x64xbf16>
    %54 = vector.shape_cast %53 : vector<1x1x32x64xbf16> to vector<32x64xbf16>
    %cst_44 = arith.constant dense<0.000000e+00> : vector<288x64xf32>
    %55 = tpu.matmul %52, %54, %cst_44 {dimension_numbers = #tpu.dot_dimension_numbers<[1], [0], [0], [1], [0, 0, 1, 1], [], []>} : vector<288x32xbf16>, vector<32x64xbf16>, vector<288x64xf32> -> vector<288x64xf32>
    %56 = arith.addf %50, %55 : vector<288x64xf32>
    %c0_45 = arith.constant 0 : index
    %c0_46 = arith.constant 0 : index
    %57 = vector.load %arg3[%c0_45, %c0_46] : memref<288x1xf32, #tpu.memory_space<vmem>>, vector<288x1xf32>
    %58 = vector.broadcast %57 : vector<288x1xf32> to vector<288x64xf32>
    %59 = arith.mulf %56, %58 : vector<288x64xf32>
    %c0_47 = arith.constant 0 : index
    %c0_48 = arith.constant 0 : index
    %c0_49 = arith.constant 0 : index
    %60 = vector.load %arg4[%c0_47, %c0_48, %c0_49] : memref<1x288x64xf32, #tpu.memory_space<vmem>>, vector<1x288x64xf32>
    %61 = vector.shape_cast %60 : vector<1x288x64xf32> to vector<288x64xf32>
    %62 = vector.shape_cast %59 : vector<288x64xf32> to vector<1x288x64xf32>
    tpu.vector_store %arg4[%c0_47, %c0_48, %c0_49], %62 {strides = array<i32>} : memref<1x288x64xf32, #tpu.memory_space<vmem>>, vector<1x288x64xf32>,
    %c0_i32 = arith.constant 0 : i32
    %63 = arith.cmpi eq, %arg0, %c0_i32 : i32
    %64 = arith.extui %63 : i1 to i32
    %c0_i32_50 = arith.constant 0 : i32
    %65 = arith.cmpi ne, %64, %c0_i32_50 : i32
    scf.if %65 {
      %cst_61 = arith.constant 0.000000e+00 : f32
      %77 = vector.broadcast %cst_61 : f32 to vector<2x64xf32>
      %c0_62 = arith.constant 0 : index
      %c0_63 = arith.constant 0 : index
      %78 = vector.load %arg5[%c0_62, %c0_63] : memref<2x64xf32, #tpu.memory_space<vmem>>, vector<2x64xf32>
      tpu.vector_store %arg5[%c0_62, %c0_63], %77 {strides = array<i32>} : memref<2x64xf32, #tpu.memory_space<vmem>>, vector<2x64xf32>,
    } else {
    }
    %c0_51 = arith.constant 0 : index
    %c0_52 = arith.constant 0 : index
    %66 = vector.load %arg5[%c0_51, %c0_52] : memref<2x64xf32, #tpu.memory_space<vmem>>, vector<1x64xf32>
    %cst_53 = arith.constant dense<0.000000e+00> : vector<64xf32>
    %67 = vector.multi_reduction <add>, %59, %cst_53 [0] : vector<288x64xf32> to vector<64xf32>
    %68 = vector.shape_cast %67 : vector<64xf32> to vector<1x64xf32>
    %69 = arith.addf %66, %68 : vector<1x64xf32>
    %c0_54 = arith.constant 0 : index
    %c0_55 = arith.constant 0 : index
    %70 = vector.load %arg5[%c0_54, %c0_55] : memref<2x64xf32, #tpu.memory_space<vmem>>, vector<1x64xf32>
    tpu.vector_store %arg5[%c0_54, %c0_55], %69 {strides = array<i32>} : memref<2x64xf32, #tpu.memory_space<vmem>>, vector<1x64xf32>,
    %c1_56 = arith.constant 1 : index
    %c0_57 = arith.constant 0 : index
    %71 = vector.load %arg5[%c1_56, %c0_57] : memref<2x64xf32, #tpu.memory_space<vmem>>, vector<1x64xf32>
    %72 = arith.mulf %59, %59 : vector<288x64xf32>
    %cst_58 = arith.constant dense<0.000000e+00> : vector<64xf32>
    %73 = vector.multi_reduction <add>, %72, %cst_58 [0] : vector<288x64xf32> to vector<64xf32>
    %74 = vector.shape_cast %73 : vector<64xf32> to vector<1x64xf32>
    %75 = arith.addf %71, %74 : vector<1x64xf32>
    %c1_59 = arith.constant 1 : index
    %c0_60 = arith.constant 0 : index
    %76 = vector.load %arg5[%c1_59, %c0_60] : memref<2x64xf32, #tpu.memory_space<vmem>>, vector<1x64xf32>
    tpu.vector_store %arg5[%c1_59, %c0_60], %75 {strides = array<i32>} : memref<2x64xf32, #tpu.memory_space<vmem>>, vector<1x64xf32>,
    return
  }
  func.func @transform_0(%arg0: i32) -> (i32, i32, i32) {
    %c0_i32 = arith.constant 0 : i32
    %c0_i32_0 = arith.constant 0 : i32
    %c0_i32_1 = arith.constant 0 : i32
    return %arg0, %c0_i32, %c0_i32_0 : i32, i32, i32
  }
  func.func @transform_1(%arg0: i32) -> (i32, i32, i32, i32) {
    %c0_i32 = arith.constant 0 : i32
    %c0_i32_0 = arith.constant 0 : i32
    %c0_i32_1 = arith.constant 0 : i32
    %c0_i32_2 = arith.constant 0 : i32
    %c0_i32_3 = arith.constant 0 : i32
    return %c0_i32, %c0_i32_0, %c0_i32_1, %c0_i32_2 : i32, i32, i32, i32
  }
  func.func @transform_2(%arg0: i32) -> (i32, i32) {
    %c0_i32 = arith.constant 0 : i32
    %c0_i32_0 = arith.constant 0 : i32
    %c0_i32_1 = arith.constant 0 : i32
    return %c0_i32, %c0_i32_0 : i32, i32
  }
  func.func @transform_3(%arg0: i32) -> (i32, i32, i32) {
    %c0_i32 = arith.constant 0 : i32
    %c0_i32_0 = arith.constant 0 : i32
    %c0_i32_1 = arith.constant 0 : i32
    return %arg0, %c0_i32, %c0_i32_0 : i32, i32, i32
  }
  func.func @transform_4(%arg0: i32) -> (i32, i32) {
    %c0_i32 = arith.constant 0 : i32
    %c0_i32_0 = arith.constant 0 : i32
    %c0_i32_1 = arith.constant 0 : i32
    return %c0_i32, %c0_i32_0 : i32, i32
  }
}

module attributes {stable_mosaic.version = 11 : i64} {
  func.func @_bn_add_act_kernel(%arg0: i32, %arg1: memref<256x128xf32, #tpu.memory_space<vmem>>, %arg2: memref<2x128xf32, #tpu.memory_space<vmem>>, %arg3: memref<1x128xf32, #tpu.memory_space<vmem>>, %arg4: memref<1x128xf32, #tpu.memory_space<vmem>>, %arg5: memref<256x128xf32, #tpu.memory_space<vmem>>, %arg6: memref<256x128xf32, #tpu.memory_space<vmem>>) attributes {dimension_semantics = [#tpu.dimension_semantics<parallel>], iteration_bounds = array<i64: 1>, scalar_prefetch = 0 : i64, scratch_operands = 0 : i64, tpu.core_type = #tpu.core_type<tc>, window_params = [{transform_indices = @transform_0, window_bounds = array<i64: 256, 128>}, {pipeline_mode = #tpu.pipeline_mode<synchronous>, transform_indices = @transform_1, window_bounds = array<i64: 2, 128>}, {pipeline_mode = #tpu.pipeline_mode<synchronous>, transform_indices = @transform_2, window_bounds = array<i64: 1, 128>}, {pipeline_mode = #tpu.pipeline_mode<synchronous>, transform_indices = @transform_3, window_bounds = array<i64: 1, 128>}, {transform_indices = @transform_4, window_bounds = array<i64: 256, 128>}, {transform_indices = @transform_5, window_bounds = array<i64: 256, 128>}]} {
    %c0 = arith.constant 0 : index
    %c0_0 = arith.constant 0 : index
    %0 = vector.load %arg2[%c0, %c0_0] : memref<2x128xf32, #tpu.memory_space<vmem>>, vector<1x128xf32>
    %cst = arith.constant 0.001953125 : f32
    %1 = vector.broadcast %cst : f32 to vector<1x128xf32>
    %2 = arith.mulf %0, %1 : vector<1x128xf32>
    %c1 = arith.constant 1 : index
    %c0_1 = arith.constant 0 : index
    %3 = vector.load %arg2[%c1, %c0_1] : memref<2x128xf32, #tpu.memory_space<vmem>>, vector<1x128xf32>
    %cst_2 = arith.constant 0.001953125 : f32
    %4 = vector.broadcast %cst_2 : f32 to vector<1x128xf32>
    %5 = arith.mulf %3, %4 : vector<1x128xf32>
    %6 = arith.mulf %2, %2 : vector<1x128xf32>
    %7 = arith.subf %5, %6 : vector<1x128xf32>
    %c0_3 = arith.constant 0 : index
    %c0_4 = arith.constant 0 : index
    %8 = vector.load %arg3[%c0_3, %c0_4] : memref<1x128xf32, #tpu.memory_space<vmem>>, vector<1x128xf32>
    %cst_5 = arith.constant 9.99999974E-6 : f32
    %9 = vector.broadcast %cst_5 : f32 to vector<1x128xf32>
    %10 = arith.addf %7, %9 : vector<1x128xf32>
    %11 = math.rsqrt %10 : vector<1x128xf32>
    %12 = arith.mulf %8, %11 : vector<1x128xf32>
    %c0_6 = arith.constant 0 : index
    %c0_7 = arith.constant 0 : index
    %13 = vector.load %arg1[%c0_6, %c0_7] : memref<256x128xf32, #tpu.memory_space<vmem>>, vector<256x128xf32>
    %14 = vector.broadcast %2 : vector<1x128xf32> to vector<256x128xf32>
    %15 = arith.subf %13, %14 : vector<256x128xf32>
    %16 = vector.broadcast %12 : vector<1x128xf32> to vector<256x128xf32>
    %17 = arith.mulf %15, %16 : vector<256x128xf32>
    %c0_8 = arith.constant 0 : index
    %c0_9 = arith.constant 0 : index
    %18 = vector.load %arg4[%c0_8, %c0_9] : memref<1x128xf32, #tpu.memory_space<vmem>>, vector<1x128xf32>
    %19 = vector.broadcast %18 : vector<1x128xf32> to vector<256x128xf32>
    %20 = arith.addf %17, %19 : vector<256x128xf32>
    %c0_10 = arith.constant 0 : index
    %c0_11 = arith.constant 0 : index
    %21 = vector.load %arg5[%c0_10, %c0_11] : memref<256x128xf32, #tpu.memory_space<vmem>>, vector<256x128xf32>
    %22 = arith.addf %20, %21 : vector<256x128xf32>
    %cst_12 = arith.constant 0.000000e+00 : f32
    %23 = vector.broadcast %cst_12 : f32 to vector<256x128xf32>
    %24 = arith.maximumf %22, %23 : vector<256x128xf32>
    %c0_13 = arith.constant 0 : index
    %c0_14 = arith.constant 0 : index
    %25 = vector.load %arg6[%c0_13, %c0_14] : memref<256x128xf32, #tpu.memory_space<vmem>>, vector<256x128xf32>
    tpu.vector_store %arg6[%c0_13, %c0_14], %24 {strides = array<i32>} : memref<256x128xf32, #tpu.memory_space<vmem>>, vector<256x128xf32>,
    return
  }
  func.func @transform_0(%arg0: i32) -> (i32, i32) {
    %c0_i32 = arith.constant 0 : i32
    %c0_i32_0 = arith.constant 0 : i32
    return %arg0, %c0_i32 : i32, i32
  }
  func.func @transform_1(%arg0: i32) -> (i32, i32) {
    %c0_i32 = arith.constant 0 : i32
    %c0_i32_0 = arith.constant 0 : i32
    %c0_i32_1 = arith.constant 0 : i32
    return %c0_i32, %c0_i32_0 : i32, i32
  }
  func.func @transform_2(%arg0: i32) -> (i32, i32) {
    %c0_i32 = arith.constant 0 : i32
    %c0_i32_0 = arith.constant 0 : i32
    %c0_i32_1 = arith.constant 0 : i32
    return %c0_i32, %c0_i32_0 : i32, i32
  }
  func.func @transform_3(%arg0: i32) -> (i32, i32) {
    %c0_i32 = arith.constant 0 : i32
    %c0_i32_0 = arith.constant 0 : i32
    %c0_i32_1 = arith.constant 0 : i32
    return %c0_i32, %c0_i32_0 : i32, i32
  }
  func.func @transform_4(%arg0: i32) -> (i32, i32) {
    %c0_i32 = arith.constant 0 : i32
    %c0_i32_0 = arith.constant 0 : i32
    return %arg0, %c0_i32 : i32, i32
  }
  func.func @transform_5(%arg0: i32) -> (i32, i32) {
    %c0_i32 = arith.constant 0 : i32
    %c0_i32_0 = arith.constant 0 : i32
    return %arg0, %c0_i32 : i32, i32
  }
}

</mosaic_0001>

<bundles_post_ra>
// kernel: tile.30
= control target key start
LH: loop header
LB: loop body
LE: loop exit
PB: predicated region body
PF: predicated region fallthrough
CT: control target
= control target key end

     0   :  { %s29_s10 = smov 3  ;;  %s10_s11 = smov 3  ;;  %vm12_vm0 = vcmask 261120   ;;  %vm19_vm1 = vcmask 1048320   ;;  %vm26_vm2 = vcmask 785920   ;;  %vm33_vm3 = vcmask 523520   ;;  %s67_s0 = inlined_call_operand.vmem [shape: f32[2,4,32], index: 0, kind: input, shape index: {}]   ;;  %s68_s1 = inlined_call_operand.vmem [shape: f32[2,128], index: 1, kind: output, shape index: {}]  }
   0x1   :  { %v41_v0 = vld [vmem:[%s67_s0 + $0x4] sm:$0xf]  ;;  %v8_v1 = vld [vmem:[%s67_s0] sm:$0xf]  ;;  %s15_s0 = smov 3  ;;  %s22_s12 = smov 3 }
   0x2   :  { %7 = vst [vmem:[#allocation1 + $0x8] sm:$0xf] %v41_v0  ;;  %9 = vst [vmem:[#allocation1] sm:$0xf] %v8_v1  ;;  %s45_s13 = smov 96   ;;  %s46_s14 = smov 32  }
   0x3   :  { %s47_s15 = smov 64  }
   0x9   :  { %v16_v2 = vld [vmem:[#allocation1 + $0x3] ss:$8 sm:%s15_s0]   ;;  %v30_v3 = vld [vmem:[#allocation1 + $0x1] ss:$8 sm:%s29_s10]   ;;  %v11_v4 = vld [vmem:[#allocation1] ss:$8 sm:%s10_s11]  }
   0xa   :  { %17 = vrot.lane.b32.xlu0 %v16_v2, %s45_s13  ;;  %31 = vrot.lane.b32.xlu1 %v30_v3, %s46_s14  ;;  %v23_v5 = vld [vmem:[#allocation1 + $0x2] ss:$8 sm:%s22_s12]   ;;  %13 = vst.msk [vmem:[#allocation0] sm:$0x3] %vm12_vm0, %v11_v4  }
   0xe   :  { %24 = vrot.lane.b32.xlu0 %v23_v5, %s47_s15 }
  0x7c   :  { %v18_v6 = vpop.permute.xlu0 %17   ;;  %v32_v7 = vpop.permute.xlu1 %31  }
  0x7d   :  { %20 = vst.msk [vmem:[#allocation0] sm:$0x3] %vm19_vm1, %v18_v6  }
  0x80   :  { %v25_v8 = vpop.permute.xlu0 %24  }
  0x81   :  { %27 = vst.msk [vmem:[#allocation0] sm:$0x3] %vm26_vm2, %v25_v8  }
  0x82   :  { %34 = vst.msk [vmem:[#allocation0] sm:$0x3] %vm33_vm3, %v32_v7  }
  0x89   :  { %v38_v9 = vld [vmem:[#allocation0] sm:$0x3] }
  0x8a   :  { %40 = vst [vmem:[%s68_s1] sm:$0x3] %v38_v9 }

// kernel: skip_connection_forward.5
= control target key start
LH: loop header
LB: loop body
LE: loop exit
PB: predicated region body
PF: predicated region fallthrough
CT: control target
= control target key end

     0   :  { %v43_v5 = vlaneseq  ;;  %s298_s1 = inlined_call_operand.vmem [shape: f32[2,128], index: 1, kind: input, shape index: {}]   ;;  %s299_s0 = inlined_call_operand.vmem [shape: f32[128,128], index: 0, kind: input, shape index: {}]   ;;  %s300_s2 = inlined_call_operand.vmem [shape: f32[1,128], index: 2, kind: input, shape index: {}]   ;;  %s301_s3 = inlined_call_operand.vmem [shape: f32[1,128], index: 3, kind: input, shape index: {}]   ;;  %s302_s4 = inlined_call_operand.vmem [shape: f32[128,128], index: 4, kind: output, shape index: {}]  }
   0x1   :  { %v17_v0 = vld [vmem:[%s298_s1] sm:$0x1]  ;;  %v19_v1 = vld [vmem:[%s298_s1 + $0x1] sm:$0x1]  ;;  %v28_v13 = vld [vmem:[%s299_s0 + $0x8] sm:$0xff] }
   0x2   :  { %v18_v2 = vmul.f32 0.001953125, %v17_v0  ;;  %v20_v3 = vmul.f32 0.001953125, %v19_v1  ;;  %v44_v8 = vshrl.u32 %v43_v5, 7  ;;  %v23_v10 = vld [vmem:[%s300_s2] sm:$0x1]  ;;  %v29_v14 = vld [vmem:[%s299_s0 + $0x10] sm:$0xff] }
   0x3   :  { %v27_v11 = vld [vmem:[%s299_s0] sm:$0xff]  ;;  %v30_v15 = vld [vmem:[%s299_s0 + $0x18] sm:$0xff]  ;;  %v32_v17 = vld [vmem:[%s299_s0 + $0x28] sm:$0xff] }
   0x4   :  { %v21_v4 = vmul.f32 %v18_v2, %v18_v2  ;;  %v45_v9 = vsub.s32 0, %v44_v8  ;;  %v31_v16 = vld [vmem:[%s299_s0 + $0x20] sm:$0xff]  ;;  %v33_v18 = vld [vmem:[%s299_s0 + $0x30] sm:$0xff]  ;;  %v34_v19 = vld [vmem:[%s299_s0 + $0x38] sm:$0xff] }
   0x5   :  { %v35_v20 = vld [vmem:[%s299_s0 + $0x40] sm:$0xff]  ;;  %v36_v21 = vld [vmem:[%s299_s0 + $0x48] sm:$0xff]  ;;  %v37_v25 = vld [vmem:[%s299_s0 + $0x50] sm:$0xff] }
   0x6   :  { %v22_v6 = vsub.f32 %v20_v3, %v21_v4  ;;  %v184_v12 = vrot.slane %v18_v2, %v45_v9  ;;  %v38_v26 = vld [vmem:[%s299_s0 + $0x58] sm:$0xff]  ;;  %v39_v27 = vld [vmem:[%s299_s0 + $0x60] sm:$0xff]  ;;  %v40_v32 = vld [vmem:[%s299_s0 + $0x68] sm:$0xff] }
   0x7   :  { %v41_v33 = vld [vmem:[%s299_s0 + $0x70] sm:$0xff]  ;;  %v42_v34 = vld [vmem:[%s299_s0 + $0x78] sm:$0xff]  ;;  %v144_v43 = vld [vmem:[%s301_s3] ss:$0 sm:$0xff] }
   0x8   :  { %v24_v7 = vadd.f32 1e-05, %v22_v6  ;;  %v47_v23 = vsub.f32 %v27_v11, %v184_v12  ;;  %v48_v24 = vsub.f32 %v28_v13, %v184_v12  ;;  %v49_v29 = vsub.f32 %v29_v14, %v184_v12 }
   0x9   :  { %v50_v30 = vsub.f32 %v30_v15, %v184_v12  ;;  %v51_v31 = vsub.f32 %v31_v16, %v184_v12  ;;  %v52_v35 = vsub.f32 %v32_v17, %v184_v12  ;;  %v53_v36 = vsub.f32 %v33_v18, %v184_v12 }
   0xa   :  { %145 = vrsqrt.f32 %v24_v7  ;;  %v54_v37 = vsub.f32 %v34_v19, %v184_v12  ;;  %v55_v38 = vsub.f32 %v35_v20, %v184_v12  ;;  %v56_v40 = vsub.f32 %v36_v21, %v184_v12 }
   0xb   :  { %v57_v41 = vsub.f32 %v37_v25, %v184_v12  ;;  %v58_v42 = vsub.f32 %v38_v26, %v184_v12  ;;  %v59_v44 = vsub.f32 %v39_v27, %v184_v12  ;;  %v60_v45 = vsub.f32 %v40_v32, %v184_v12 }
   0xc   :  { %v61_v46 = vsub.f32 %v41_v33, %v184_v12  ;;  %v62_v47 = vsub.f32 %v42_v34, %v184_v12 }
  0x14   :  { %v146_v22 = vpop.eup %145 }
  0x15   :  { %v26_v28 = vmul.f32 %v146_v22, %v23_v10 }
  0x17   :  { %v67_v39 = vrot.slane %v26_v28, %v45_v9 }
  0x19   :  { %v69_v48 = vmul.f32 %v67_v39, %v47_v23  ;;  %v70_v49 = vmul.f32 %v67_v39, %v48_v24  ;;  %v71_v50 = vmul.f32 %v67_v39, %v49_v29  ;;  %v72_v51 = vmul.f32 %v67_v39, %v50_v30 }
  0x1a   :  { %v73_v52 = vmul.f32 %v67_v39, %v51_v31  ;;  %v74_v53 = vmul.f32 %v67_v39, %v52_v35  ;;  %v75_v54 = vmul.f32 %v67_v39, %v53_v36  ;;  %v76_v55 = vmul.f32 %v67_v39, %v54_v37 }
  0x1b   :  { %v92_v56 = vadd.f32 %v144_v43, %v69_v48  ;;  %v93_v57 = vadd.f32 %v144_v43, %v70_v49  ;;  %v94_v58 = vadd.f32 %v144_v43, %v71_v50  ;;  %v95_v59 = vadd.f32 %v144_v43, %v72_v51 }
  0x1c   :  { %v96_v60 = vadd.f32 %v144_v43, %v73_v52  ;;  %v97_v61 = vadd.f32 %v144_v43, %v74_v53  ;;  %v98_v62 = vadd.f32 %v144_v43, %v75_v54  ;;  %v99_v63 = vadd.f32 %v144_v43, %v76_v55 }
  0x1d   :  { %v108_v0 = vmax.f32 %v92_v56, 0.0  ;;  %v109_v1 = vmax.f32 %v93_v57, 0.0  ;;  %v110_v2 = vmax.f32 %v94_v58, 0.0  ;;  %v111_v3 = vmax.f32 %v95_v59, 0.0 }
  0x1e   :  { %v112_v4 = vmax.f32 %v96_v60, 0.0  ;;  %v113_v5 = vmax.f32 %v97_v61, 0.0  ;;  %v114_v6 = vmax.f32 %v98_v62, 0.0  ;;  %v115_v7 = vmax.f32 %v99_v63, 0.0 }
  0x1f   :  { %124 = vst [vmem:[%s302_s4] sm:$0xff] %v108_v0  ;;  %125 = vst [vmem:[%s302_s4 + $0x8] sm:$0xff] %v109_v1  ;;  %v77_v8 = vmul.f32 %v67_v39, %v55_v38  ;;  %v78_v9 = vmul.f32 %v67_v39, %v56_v40  ;;  %v79_v10 = vmul.f32 %v67_v39, %v57_v41 }
  0x20   :  { %126 = vst [vmem:[%s302_s4 + $0x10] sm:$0xff] %v110_v2  ;;  %127 = vst [vmem:[%s302_s4 + $0x18] sm:$0xff] %v111_v3  ;;  %v80_v11 = vmul.f32 %v67_v39, %v58_v42  ;;  %v81_v12 = vmul.f32 %v67_v39, %v59_v44  ;;  %v82_v13 = vmul.f32 %v67_v39, %v60_v45 }
  0x21   :  { %128 = vst [vmem:[%s302_s4 + $0x20] sm:$0xff] %v112_v4  ;;  %129 = vst [vmem:[%s302_s4 + $0x28] sm:$0xff] %v113_v5  ;;  %v83_v14 = vmul.f32 %v67_v39, %v61_v46  ;;  %v84_v15 = vmul.f32 %v67_v39, %v62_v47  ;;  %v100_v16 = vadd.f32 %v144_v43, %v77_v8 }
  0x22   :  { %130 = vst [vmem:[%s302_s4 + $0x30] sm:$0xff] %v114_v6  ;;  %131 = vst [vmem:[%s302_s4 + $0x38] sm:$0xff] %v115_v7  ;;  %v101_v17 = vadd.f32 %v144_v43, %v78_v9  ;;  %v102_v18 = vadd.f32 %v144_v43, %v79_v10  ;;  %v103_v19 = vadd.f32 %v144_v43, %v80_v11 }
  0x23   :  { %v104_v20 = vadd.f32 %v144_v43, %v81_v12  ;;  %v105_v21 = vadd.f32 %v144_v43, %v82_v13  ;;  %v106_v22 = vadd.f32 %v144_v43, %v83_v14  ;;  %v107_v23 = vadd.f32 %v144_v43, %v84_v15 }
  0x24   :  { %v116_v24 = vmax.f32 %v100_v16, 0.0  ;;  %v117_v25 = vmax.f32 %v101_v17, 0.0  ;;  %v118_v26 = vmax.f32 %v102_v18, 0.0  ;;  %v119_v27 = vmax.f32 %v103_v19, 0.0 }
  0x25   :  { %v120_v28 = vmax.f32 %v104_v20, 0.0  ;;  %v121_v29 = vmax.f32 %v105_v21, 0.0  ;;  %v122_v30 = vmax.f32 %v106_v22, 0.0  ;;  %v123_v31 = vmax.f32 %v107_v23, 0.0 }
  0x26   :  { %132 = vst [vmem:[%s302_s4 + $0x40] sm:$0xff] %v116_v24  ;;  %133 = vst [vmem:[%s302_s4 + $0x48] sm:$0xff] %v117_v25 }
  0x27   :  { %134 = vst [vmem:[%s302_s4 + $0x50] sm:$0xff] %v118_v26  ;;  %135 = vst [vmem:[%s302_s4 + $0x58] sm:$0xff] %v119_v27 }
  0x28   :  { %136 = vst [vmem:[%s302_s4 + $0x60] sm:$0xff] %v120_v28  ;;  %137 = vst [vmem:[%s302_s4 + $0x68] sm:$0xff] %v121_v29 }
  0x29   :  { %138 = vst [vmem:[%s302_s4 + $0x70] sm:$0xff] %v122_v30  ;;  %139 = vst [vmem:[%s302_s4 + $0x78] sm:$0xff] %v123_v31 }

// kernel: skip_connection_forward.4
= control target key start
LH: loop header
LB: loop body
LE: loop exit
PB: predicated region body
PF: predicated region fallthrough
CT: control target
= control target key end

     0   :  { %s5045_s15 = smov 0   ;;  %s6622_s0 = inlined_call_operand.vmem [shape: f32[2,342,64], index: 0, kind: input, shape index: {}]   ;;  %s6623_s1 = inlined_call_operand.vmem [shape: bf16[3,3,64,32], index: 1, kind: input, shape index: {}]   ;;  %s6624_s2 = inlined_call_operand.vmem [shape: f32[288,1], index: 2, kind: input, shape index: {}]   ;;  %s6625_s3 = inlined_call_operand.vmem [shape: f32[2,288,32], index: 3, kind: output, shape index: {0}]   ;;  %s6626_s4 = inlined_call_operand.vmem [shape: f32[2,32], index: 4, kind: output, shape index: {1}]  }
   0x1 LB: > { %s5051_s16 = sadd.s32 4294967295, %s5016_s15   ;;  %p3798_p0 = scmp.ge.s32.totalorder %s5016_s15, 1  ;;  %s5016_s15 = sphi %s5045_s15, %s15_s15  }
   0x2   : > { %p160_p1 = scmp.lt.s32.totalorder %s5016_s15, 3 }
   0x4   : > { %p161_p2 = pnand %p3798_p0, %p160_p1 }
   0x6   : > { %164 = sbr.rel (%p161_p2) target bundleno = 669 (0x29d), region = 32 }
   0xd   : > { %v4970_v0 = vld [vmem:[%s6623_s1 + $0x20] sm:$0xff]   ;;  %p186_p3 = scmp.lt.s32.totalorder %s5051_s16, 1  ;;  %v4972_v2 = vld [vmem:[%s6623_s1 + $0x28] sm:$0xff]   ;;  %v4974_v4 = vld [vmem:[%s6623_s1 + $0x30] sm:$0xff]   ;;  %vm274_vm0 = vsmask.f32 7424 }
   0xe   : > { %v4971_v1 = vld [vmem:[%s6623_s1 + $0x80] sm:$0xff]   ;;  %4264 = vmatprep.subr.bf16.mxu1 %v4970_v0  ;;  %v4973_v3 = vld [vmem:[%s6623_s1 + $0x88] sm:$0xff]   ;;  %v4975_v5 = vld [vmem:[%s6623_s1 + $0x90] sm:$0xff]   ;;  %vm1542_vm1 = vsmask.f32 6400  ;;  %vm447_vm2 = vcmask 523264  }
   0xf   : > { %s5066_s23 = scalar_select %p186_p3, %s5051_s16, 1  ;;  %4440 = vmatprep.subr.bf16.mxu0 %v4971_v1  ;;  %4265 = vmatpush3.bf16.msra.mxu1 %v4970_v0  ;;  %v4976_v6 = vld [vmem:[%s6623_s1 + $0x38] sm:$0xff]   ;;  %v4979_v28 = vld [vmem:[%s6623_s1] sm:$0xff]   ;;  %v4980_v0 = vld [vmem:[%s6623_s1 + $0xa8] sm:$0xff]   ;;  %vm1928_vm3 = vcmask 1045504   ;;  %vm944_vm5 = vcmask 1046528  }
  0x10   : > { %4441 = vmatpush3.bf16.msra.mxu0 %v4971_v1  ;;  %4266 = vmatprep.subr.bf16.mxu1 %v4972_v2  ;;  %v4977_v7 = vld [vmem:[%s6623_s1 + $0x98] sm:$0xff]   ;;  %v4978_v32 = vld [vmem:[%s6623_s1 + $0xa0] sm:$0xff]   ;;  %vm2526_vm4 = vsmask.f32 5376  ;;  %vm2912_vm6 = vcmask 1044480   ;;  %vm3493_vm7 = vcmask 261120  }
  0x11   : > { %s4956_s28 = smul.u32 344, %s5066_s23  ;;  %4442 = vmatprep.subr.bf16.mxu0 %v4973_v3  ;;  %p4063_p4 = scmp.ne.s32.totalorder %s5051_s16, 0 }
  0x12   : > { %s4957_s13 = smul.u32 288, %s5066_s23  ;;  %vm3534_vm8 = vcmask (!%p4063_p4), 254976  }
  0x13   : > { %s5084_s9 = scalar_lea.vmem %s6622_s0, %s4956_s28  ;;  %4267 = vmatpush3.bf16.msra.mxu1 %v4972_v2 }
  0x14   : > { %4443 = vmatpush3.bf16.msra.mxu0 %v4973_v3  ;;  %4268 = vmatprep.subr.bf16.mxu1 %v4974_v4  ;;  %v197_v8 = vld [vmem:[%s5084_s9] sm:$0xff]  ;;  %v198_v9 = vld [vmem:[%s5084_s9 + $0x8] sm:$0xff]  ;;  %v199_v10 = vld [vmem:[%s5084_s9 + $0x10] sm:$0xff]  ;;  %s6204_s18 = scalar_lea.vmem %s6625_s3, %s4957_s13 }
  0x15   : > { %4444 = vmatprep.subr.bf16.mxu0 %v4975_v5  ;;  %v200_v11 = vld [vmem:[%s5084_s9 + $0x18] sm:$0xff]  ;;  %v5093_v12 = vpack.c.bf16 %v198_v9, %v197_v8  ;;  %v201_v13 = vld [vmem:[%s5084_s9 + $0x20] sm:$0xff]  ;;  %v202_v14 = vld [vmem:[%s5084_s9 + $0x28] sm:$0xff] }
  0x16   : > { %v5097_v15 = vpack.c.bf16 %v200_v11, %v199_v10  ;;  %v5099_v16 = vpack.c.bf16 %v202_v14, %v201_v13  ;;  %v203_v17 = vld [vmem:[%s5084_s9 + $0x30] sm:$0xff]  ;;  %v204_v18 = vld [vmem:[%s5084_s9 + $0x38] sm:$0xff]  ;;  %v205_v22 = vld [vmem:[%s5084_s9 + $0x40] sm:$0xff] }
  0x17   : > { %4269 = vmatpush3.bf16.msra.mxu1 %v4974_v4  ;;  %v276_v19 = vshrl.u32 %v5093_v12, 16  ;;  %v278_v20 = vshll.u32 %v5093_v12, 16  ;;  %v5105_v21 = vpack.c.bf16 %v204_v18, %v203_v17  ;;  %v206_v27 = vld [vmem:[%s5084_s9 + $0x48] sm:$0xff]  ;;  %v207_v46 = vld [vmem:[%s5084_s9 + $0x50] sm:$0xff]  ;;  %v208_v47 = vld [vmem:[%s5084_s9 + $0x58] sm:$0xff] }
  0x18   : > { %4445 = vmatpush3.bf16.msra.mxu0 %v4975_v5  ;;  %4270 = vmatprep.subr.bf16.mxu1 %v4976_v6  ;;  %v283_v23 = vshll.u32 %v5097_v15, 16  ;;  %v287_v24 = vshrl.u32 %v5097_v15, 16  ;;  %v5111_v25 = vshll.u32 %v5099_v16, 16  ;;  %v5114_v26 = vshrl.u32 %v5099_v16, 16  ;;  %v209_v52 = vld [vmem:[%s5084_s9 + $0x60] sm:$0xff]  ;;  %v210_v53 = vld [vmem:[%s5084_s9 + $0x68] sm:$0xff] }
  0x19   : > { %4446 = vmatprep.subr.bf16.mxu0 %v4977_v7  ;;  %v280_v29 = vrot.slane %v278_v20, 1  ;;  %v5121_v30 = vshll.u32 %v5105_v21, 16  ;;  %v5124_v31 = vshrl.u32 %v5105_v21, 16  ;;  %v5129_v33 = vpack.c.bf16 %v206_v27, %v205_v22  ;;  %v211_v54 = vld [vmem:[%s5084_s9 + $0x70] sm:$0xff]  ;;  %v212_v59 = vld [vmem:[%s5084_s9 + $0x78] sm:$0xff]  ;;  %v213_v1 = vld [vmem:[%s5084_s9 + $0x80] sm:$0xff] }
  0x1a   : > { %v285_v34 = vrot.slane %v283_v23, 1  ;;  %v1543_v35 = vrot.slane %v287_v24, 1  ;;  %v1544_v36 = vrot.slane %v283_v23, 2  ;;  %v1546_v37 = vrot.slane %v5114_v26, 1  ;;  %v4982_v10 = vld [vmem:[%s6623_s1 + $0x8] sm:$0xff]   ;;  %v4981_v22 = vld [vmem:[%s6623_s1 + $0xb0] sm:$0xff]  }
  0x1b   : > { %4271 = vmatpush3.bf16.msra.mxu1 %v4976_v6  ;;  %v281_v38 = vor.u32 %v280_v29, %v276_v19  ;;  %v1547_v39 = vrot.slane %v5111_v25, 2  ;;  %v293_v40 = vrot.slane %v5111_v25, 1  ;;  %v1550_v41 = vrot.slane %v5124_v31, 1  ;;  %v214_v6 = vld [vmem:[%s5084_s9 + $0x88] sm:$0xff] }
  0x1c   : > { %4447 = vmatpush3.bf16.msra.mxu0 %v4977_v7  ;;  %v289_v42 = vor.u32 %v287_v24, %v285_v34  ;;  %v1545_v43 = vor.u32 %v1544_v36, %v1543_v35  ;;  %v1551_v44 = vrot.slane %v5121_v30, 2  ;;  %v301_v45 = vrot.slane %v5121_v30, 1  ;;  %4308 = vmatprep.subr.bf16.mxu1 %v4979_v28  ;;  %v215_v35 = vld [vmem:[%s5084_s9 + $0x90] sm:$0xff] }
  0x1d   : > { %v286_v48 = vsel %vm274_vm0, %v281_v38, %v285_v34  ;;  %v1548_v49 = vor.u32 %v1547_v39, %v1546_v37  ;;  %4484 = vmatprep.subr.bf16.mxu0 %v4978_v32  ;;  %v297_v50 = vor.u32 %v5114_v26, %v293_v40  ;;  %v5142_v51 = vshll.u32 %v5129_v33, 16 }
  0x1e   : > { %4272 = vmatprep.mubr.msk.bf16.mxu1 %vm447_vm2, %v286_v48  ;;  %v294_v55 = vsel %vm274_vm0, %v289_v42, %v293_v40  ;;  %v1552_v56 = vor.u32 %v1551_v44, %v1550_v41  ;;  %v5150_v57 = vshrl.u32 %v5129_v33, 16  ;;  %v305_v58 = vor.u32 %v5124_v31, %v301_v45  ;;  %v4983_v44 = vld [vmem:[%s6623_s1 + $0xb8] sm:$0xff]  }
  0x1f   : > { %v1549_v60 = vsel %vm1542_vm1, %v1545_v43, %v1548_v49  ;;  %4273 = vmatmul.mubr.msk.bf16.vlgmr.msra.gmra.mrb[0].mxu1 %vm447_vm2, %v294_v55  ;;  %v302_v61 = vsel %vm274_vm0, %v297_v50, %v301_v45  ;;  %v1555_v62 = vrot.slane %v5142_v51, 2  ;;  %v309_v63 = vrot.slane %v5142_v51, 1  ;;  %v216_v43 = vld [vmem:[%s5084_s9 + $0x98] sm:$0xff]  ;;  %v4985_v45 = vld [vmem:[%s6623_s1 + $0x10] sm:$0xff]   ;;  %v218_v50 = vld [vmem:[%s5084_s9 + $0xa8] sm:$0xff] }
  0x20   : > { %4448 = vmatprep.mubr.msk.bf16.mxu0 %vm447_vm2, %v1549_v60  ;;  %v1553_v2 = vsel %vm1542_vm1, %v1548_v49, %v1552_v56  ;;  %4276 = vmatprep.mubr.msk.bf16.mxu1 %vm447_vm2, %v302_v61  ;;  %v1554_v3 = vrot.slane %v5150_v57, 1  ;;  %v5167_v4 = vpack.c.bf16 %v208_v47, %v207_v46  ;;  %v5169_v5 = vpack.c.bf16 %v210_v53, %v209_v52  ;;  %v217_v49 = vld [vmem:[%s5084_s9 + $0xa0] sm:$0xff]  ;;  %v220_v61 = vld [vmem:[%s5084_s9 + $0xb8] sm:$0xff] }
  0x21   : > { %4449 = vmatmul.mubr.msk.bf16.vlgmr.msra.gmra.mrb[0].mxu0 %vm447_vm2, %v1553_v2  ;;  %v310_v7 = vsel %vm274_vm0, %v305_v58, %v309_v63  ;;  %4309 = vmatpush3.bf16.msra.mxu1 %v4979_v28  ;;  %v313_v8 = vor.u32 %v5150_v57, %v309_v63  ;;  %v5175_v9 = vpack.c.bf16 %v212_v59, %v211_v54  ;;  %v5250_v63 = vld [vmem:[%s6623_s1 + $0xc0] sm:$0xff]  }
  0x22   : > { %4485 = vmatpush3.bf16.msra.mxu0 %v4978_v32  ;;  %v1556_v11 = vor.u32 %v1555_v62, %v1554_v3  ;;  %v5181_v13 = vshll.u32 %v5167_v4, 16  ;;  %v5184_v14 = vshrl.u32 %v5167_v4, 16  ;;  %v5187_v17 = vshll.u32 %v5169_v5, 16  ;;  %4310 = vmatprep.subr.bf16.mxu1 %v4982_v10 }
  0x23   : > { %4486 = vmatprep.subr.bf16.mxu0 %v4980_v0  ;;  %v5190_v18 = vshrl.u32 %v5169_v5, 16  ;;  %v5193_v19 = vshll.u32 %v5175_v9, 16  ;;  %v5196_v20 = vshrl.u32 %v5175_v9, 16  ;;  %v5201_v23 = vpack.c.bf16 %v214_v6, %v213_v1  ;;  %v4987_v6 = vld [vmem:[%s6623_s1 + $0x18] sm:$0xff]  }
  0x24   : > { %v1557_v24 = vsel %vm1542_vm1, %v1552_v56, %v1556_v11  ;;  %v1558_v27 = vrot.slane %v5184_v14, 1  ;;  %v1559_v28 = vrot.slane %v5181_v13, 2  ;;  %v317_v29 = vrot.slane %v5181_v13, 1  ;;  %v219_v56 = vld [vmem:[%s5084_s9 + $0xb0] sm:$0xff] }
  0x25   : > { %4452 = vmatprep.mubr.msk.bf16.mxu0 %vm447_vm2, %v1557_v24  ;;  %v1562_v32 = vrot.slane %v5190_v18, 1  ;;  %v1563_v34 = vrot.slane %v5187_v17, 2  ;;  %4311 = vmatpush3.bf16.msra.mxu1 %v4982_v10  ;;  %v1566_v38 = vrot.slane %v5196_v20, 1  ;;  %v1567_v39 = vrot.slane %v5193_v19, 2 }
  0x26   : > { %v1560_v36 = vor.u32 %v1559_v28, %v1558_v27  ;;  %4487 = vmatpush3.bf16.msra.mxu0 %v4980_v0  ;;  %v318_v37 = vsel %vm274_vm0, %v313_v8, %v317_v29  ;;  %v325_v41 = vrot.slane %v5187_v17, 1  ;;  %v5217_v42 = vshll.u32 %v5201_v23, 16  ;;  %4312 = vmatprep.subr.bf16.mxu1 %v4985_v45  ;;  %v5277_v28 = vld [vmem:[%s6623_s1 + $0x40] sm:$0xff]  }
  0x27   : > { %4277 = vmatmul.mubr.msk.bf16.gmra.mrb[4].mxu1 %vm447_vm2, %v310_v7  ;;  %v1564_v40 = vor.u32 %v1563_v34, %v1562_v32  ;;  %4488 = vmatprep.subr.bf16.mxu0 %v4981_v22  ;;  %v321_v47 = vor.u32 %v5184_v14, %v317_v29  ;;  %v5230_v48 = vshrl.u32 %v5201_v23, 16  ;;  %v333_v54 = vrot.slane %v5193_v19, 1 }
  0x28   : > { %v1561_v46 = vsel %vm1542_vm1, %v1556_v11, %v1560_v36  ;;  %4280 = vmatprep.mubr.msk.bf16.mxu1 %vm447_vm2, %v318_v37  ;;  %v329_v53 = vor.u32 %v5190_v18, %v325_v41  ;;  %v1571_v55 = vrot.slane %v5217_v42, 2  ;;  %v1568_v58 = vor.u32 %v1567_v39, %v1566_v38 }
  0x29   : > { %4453 = vmatmul.mubr.msk.bf16.gmra.mrb[4].mxu0 %vm447_vm2, %v1561_v46  ;;  %v1565_v52 = vsel %vm1542_vm1, %v1560_v36, %v1564_v40  ;;  %v1570_v59 = vrot.slane %v5230_v48, 1  ;;  %v5242_v60 = vpack.c.bf16 %v216_v43, %v215_v35  ;;  %v5245_v62 = vpack.c.bf16 %v218_v50, %v217_v49  ;;  %4313 = vmatpush3.bf16.msra.mxu1 %v4985_v45  ;;  %v221_v43 = vld [vmem:[%s5084_s9 + $0xc0] sm:$0xff]  ;;  %v222_v45 = vld [vmem:[%s5084_s9 + $0xc8] sm:$0xff]  ;;  %v224_v49 = vld [vmem:[%s5084_s9 + $0xd8] sm:$0xff] }
  0x2a   : > { %4456 = vmatprep.mubr.msk.bf16.mxu0 %vm447_vm2, %v1565_v52  ;;  %4489 = vmatpush3.bf16.msra.mxu0 %v4981_v22  ;;  %v326_v0 = vsel %vm274_vm0, %v321_v47, %v325_v41  ;;  %v334_v7 = vsel %vm274_vm0, %v329_v53, %v333_v54  ;;  %v1569_v11 = vsel %vm1542_vm1, %v1564_v40, %v1568_v58  ;;  %v341_v32 = vrot.slane %v5217_v42, 1  ;;  %v223_v47 = vld [vmem:[%s5084_s9 + $0xd0] sm:$0xff] }
  0x2b   : > { %4490 = vmatprep.subr.bf16.mxu0 %v4983_v44  ;;  %v1572_v1 = vor.u32 %v1571_v55, %v1570_v59  ;;  %v5254_v2 = vshll.u32 %v5242_v60, 16  ;;  %v5257_v3 = vshrl.u32 %v5242_v60, 16  ;;  %v5264_v8 = vshll.u32 %v5245_v62, 16  ;;  %4314 = vmatprep.subr.bf16.mxu1 %v4987_v6  ;;  %v231_v53 = vld [vmem:[%s5084_s9 + $0x110] sm:$0xff] }
  0x2c   : > { %v5267_v10 = vshrl.u32 %v5245_v62, 16  ;;  %v5272_v27 = vpack.c.bf16 %v220_v61, %v219_v56  ;;  %v337_v36 = vor.u32 %v5196_v20, %v333_v54  ;;  %v345_v37 = vor.u32 %v5230_v48, %v341_v32  ;;  %v232_v54 = vld [vmem:[%s5084_s9 + $0x118] sm:$0xff] }
  0x2d   : > { %v1574_v22 = vrot.slane %v5257_v3, 1  ;;  %v1575_v24 = vrot.slane %v5254_v2, 2  ;;  %v1573_v29 = vsel %vm1542_vm1, %v1568_v58, %v1572_v1  ;;  %v1579_v35 = vrot.slane %v5264_v8, 2  ;;  %4315 = vmatpush3.bf16.msra.mxu1 %v4987_v6 }
  0x2e   : > { %4491 = vmatpush3.bf16.msra.mxu0 %v4983_v44  ;;  %v1578_v34 = vrot.slane %v5267_v10, 1  ;;  %v349_v38 = vrot.slane %v5254_v2, 1  ;;  %4352 = vmatprep.subr.bf16.mxu1 %v5277_v28  ;;  %v5293_v40 = vshll.u32 %v5272_v27, 16  ;;  %v5296_v41 = vshrl.u32 %v5272_v27, 16 }
  0x2f   : > { %4281 = vmatmul.mubr.msk.bf16.gmra.mrb[8].mxu1 %vm447_vm2, %v326_v0  ;;  %4528 = vmatprep.subr.bf16.mxu0 %v5250_v63  ;;  %v1576_v39 = vor.u32 %v1575_v24, %v1574_v22  ;;  %v342_v46 = vsel %vm274_vm0, %v337_v36, %v341_v32  ;;  %v357_v52 = vrot.slane %v5264_v8, 1  ;;  %v5312_v61 = vpack.c.bf16 %v222_v45, %v221_v43 }
  0x30   : > { %4284 = vmatprep.mubr.msk.bf16.mxu1 %vm447_vm2, %v334_v7  ;;  %v1580_v44 = vor.u32 %v1579_v35, %v1578_v34  ;;  %v350_v50 = vsel %vm274_vm0, %v345_v37, %v349_v38  ;;  %v1582_v56 = vrot.slane %v5296_v41, 1  ;;  %v1583_v58 = vrot.slane %v5293_v40, 2  ;;  %v225_v37 = vld [vmem:[%s5084_s9 + $0xe0] sm:$0xff] }
  0x31   : > { %4457 = vmatmul.mubr.msk.bf16.gmra.mrb[8].mxu0 %vm447_vm2, %v1569_v11  ;;  %v1577_v55 = vsel %vm1542_vm1, %v1572_v1, %v1576_v39  ;;  %v353_v0 = vor.u32 %v5257_v3, %v349_v38  ;;  %v361_v6 = vor.u32 %v5267_v10, %v357_v52  ;;  %v365_v1 = vrot.slane %v5293_v40, 1  ;;  %v226_v38 = vld [vmem:[%s5084_s9 + $0xe8] sm:$0xff] }
  0x32   : > { %4460 = vmatprep.mubr.msk.bf16.mxu0 %vm447_vm2, %v1573_v29  ;;  %v1581_v59 = vsel %vm1542_vm1, %v1576_v39, %v1580_v44  ;;  %v5319_v7 = vpack.c.bf16 %v224_v49, %v223_v47  ;;  %v5321_v11 = vpack.c.bf16 %v232_v54, %v231_v53  ;;  %v5324_v22 = vor.u32 %v1583_v58, %v1582_v56  ;;  %v233_v29 = vld [vmem:[%s5084_s9 + $0x120] sm:$0xff] }
  0x33   : > { %v1929_v24 = vrot.slane %v5097_v15, 2  ;;  %v1930_v32 = vrot.slane %v5099_v16, 2  ;;  %v5330_v34 = vshll.u32 %v5312_v61, 16  ;;  %v358_v35 = vsel %vm274_vm0, %v353_v0, %v357_v52  ;;  %v228_v52 = vld [vmem:[%s5084_s9 + $0xf8] sm:$0xff] }
  0x34   : > { %6658 = vst [vmem:[#allocation2_spill] sm:$0xff] %v5324_v22  ;;  %v366_v36 = vsel %vm274_vm0, %v361_v6, %v365_v1  ;;  %v5337_v39 = vshll.u32 %v5321_v11, 16  ;;  %v5340_v43 = vshrl.u32 %v5312_v61, 16  ;;  %v5343_v45 = vshll.u32 %v5319_v7, 16 }
  0x35   : > { %6659 = vst [vmem:[#allocation3_spill] sm:$0xff] %v5330_v34  ;;  %v5346_v47 = vpack.c.bf16 %v233_v29, %v233_v29  ;;  %v5349_v49 = vshrl.u32 %v5321_v11, 16  ;;  %v1931_v54 = vsel %vm1928_vm3, %v1929_v24, %v1930_v32  ;;  %v5358_v56 = vpack.c.bf16 %v226_v38, %v225_v37 }
  0x36   : > { %6660 = vst [vmem:[#allocation4_spill] sm:$0xff] %v5340_v43  ;;  %6661 = vst [vmem:[#allocation5_spill] sm:$0xff] %v5343_v45  ;;  %v6627_v53 = vrot.slane %v5337_v39, 1  ;;  %v381_v6 = vrot.slane %v5343_v45, 1 }
  0x37   : > { %4285 = vmatmul.mubr.msk.bf16.gmra.mrb[12].mxu1 %vm447_vm2, %v342_v46  ;;  %v227_v46 = vld [vmem:[%s5084_s9 + $0xf0] sm:$0xff]  ;;  %6662 = vst [vmem:[#allocation6_spill] sm:$0xff] %v5346_v47  ;;  %6663 = vst [vmem:[#allocation7_spill] sm:$0xff] %v5349_v49  ;;  %v419_v58 = vshll.u32 %v5346_v47, 16  ;;  %v5375_v37 = vshll.u32 %v5358_v56, 16 }
  0x38   : > { %4288 = vmatprep.mubr.msk.bf16.mxu1 %vm447_vm2, %v350_v50  ;;  %v1585_v50 = vsel %vm1542_vm1, %v1580_v44, %v5324_v22  ;;  %v417_v44 = vor.u32 %v5349_v49, %v6627_v53  ;;  %v5369_v24 = vpack.c.bf16 %v228_v52, %v227_v46  ;;  %v5382_v53 = vshrl.u32 %v5319_v7, 16  ;;  %v229_v46 = vld [vmem:[%s5084_s9 + $0x100] sm:$0xff]  ;;  %v230_v52 = vld [vmem:[%s5084_s9 + $0x108] sm:$0xff] }
  0x39   : > { %4461 = vmatmul.mubr.msk.bf16.gmra.mrb[12].mxu0 %vm447_vm2, %v1577_v55  ;;  %v373_v55 = vrot.slane %v5330_v34, 1  ;;  %6664 = vst [vmem:[#allocation8_spill] sm:$0xff] %v5375_v37 }
  0x3a   : > { %4464 = vmatprep.mubr.msk.bf16.mxu0 %vm447_vm2, %v1581_v59  ;;  %v369_v59 = vor.u32 %v5296_v41, %v365_v1  ;;  %v1934_v1 = vrot.slane %v5129_v33, 2  ;;  %6665 = vst [vmem:[#allocation9_spill] sm:$0xff] %v5382_v53  ;;  %v5391_v22 = vshll.u32 %v5369_v24, 16 }
  0x3b   : > { %v377_v0 = vor.u32 %v5340_v43, %v373_v55 }
  0x3c   : > { %6667 = vst [vmem:[#allocation11_spill] sm:$0xff] %v5391_v22 }
  0x3f   : > { %4289 = vmatmul.mubr.msk.bf16.gmra.mrb[16].mxu1 %vm447_vm2, %v358_v35  ;;  %v421_v35 = vrot.slane %v419_v58, 1  ;;  %v382_v58 = vsel %vm274_vm0, %v377_v0, %v381_v6  ;;  %v5402_v0 = vpack.c.bf16 %v230_v52, %v229_v46  ;;  %v1936_v46 = vrot.slane %v5167_v4, 2  ;;  %v5421_v52 = vld [vmem:[%s5084_s9 + $0x130] sm:$0xff] }
  0x40   : > { %4292 = vmatprep.mubr.msk.bf16.mxu1 %vm447_vm2, %v366_v36  ;;  %v1932_v36 = vrot.slane %v5105_v21, 2 }
  0x41   : > { %4465 = vmatmul.mubr.msk.bf16.gmra.mrb[16].mxu0 %vm447_vm2, %v1585_v50  ;;  %v5378_v38 = vsel %vm274_vm0, %v417_v44, %v421_v35  ;;  %v374_v50 = vsel %vm274_vm0, %v369_v59, %v373_v55  ;;  %v234_v44 = vld [vmem:[%s5084_s9 + $0x128] sm:$0xff]  ;;  %v389_v59 = vrot.slane %v5375_v37, 1  ;;  %v236_v37 = vld [vmem:[%s5084_s9 + $0x138] sm:$0xff]  ;;  %v5446_v47 = vsel %vm1928_vm3, %v1934_v1, %v1936_v46 }
  0x42   : > { %4492 = vmatprep.mubr.msk.bf16.mxu0 %vm447_vm2, %v1931_v54  ;;  %v5388_v54 = vshrl.u32 %v5358_v56, 16  ;;  %v5394_v49 = vsel %vm1928_vm3, %v1930_v32, %v1932_v36  ;;  %v5399_v55 = vsel %vm1928_vm3, %v1932_v36, %v1934_v1  ;;  %v4986_v35 = vld [vmem:[%s6623_s1 + $0xc8] sm:$0xff]   ;;  %v385_v32 = vor.u32 %v5382_v53, %v381_v6 }
  0x43   : > { %v397_v36 = vrot.slane %v5391_v22, 1  ;;  %v5413_v45 = vpack.c.bf16 %v234_v44, %v233_v29  ;;  %v1938_v6 = vrot.slane %v5169_v5, 2  ;;  %v4988_v29 = vld [vmem:[%s6623_s1 + $0xd0] sm:$0xff]   ;;  %v5431_v44 = vpack.c.bf16 %v236_v37, %v5421_v52 }
  0x44   : > { %6666 = vst [vmem:[#allocation10_spill] sm:$0xff] %v5388_v54  ;;  %v5435_v22 = vshrl.u32 %v5369_v24, 16  ;;  %v5439_v53 = vshrl.u32 %v5402_v0, 16 }
  0x45   : > { %6668 = vst [vmem:[#allocation12_spill] sm:$0xff] %v5413_v45  ;;  %6670 = vst [vmem:[#allocation14_spill] sm:$0xff] %v5431_v44  ;;  %v5442_v34 = vrot.slane %v5413_v45, 2  ;;  %v6648_v43 = vrot.slane %v5431_v44, 2  ;;  %v5450_v37 = vsel %vm1928_vm3, %v1936_v46, %v1938_v6  ;;  %v2527_v46 = vrot.slane %v5114_v26, 2 }
  0x46   : > { %6671 = vst [vmem:[#allocation15_spill] sm:$0xff] %v5435_v22  ;;  %6672 = vst [vmem:[#allocation16_spill] sm:$0xff] %v5439_v53  ;;  %v401_v1 = vor.u32 %v5435_v22, %v397_v36  ;;  %v2534_v45 = vrot.slane %v5150_v57, 2  ;;  %v1944_v57 = vrot.slane %v5242_v60, 2 }
  0x47   : > { %4293 = vmatmul.mubr.msk.bf16.gmra.mrb[20].mxu1 %vm447_vm2, %v374_v50  ;;  %v393_v50 = vor.u32 %v5388_v54, %v389_v59  ;;  %6673 = vst [vmem:[#allocation17_spill] sm:$0xff] %v5450_v37 }
  0x48   : > { %4296 = vmatprep.mubr.msk.bf16.mxu1 %vm447_vm2, %v382_v58  ;;  %v5425_v58 = vshll.u32 %v5402_v0, 16 }
  0x49   : > { %4493 = vmatmul.mubr.msk.bf16.vlgmr.msra.gmra.mrb[0].mxu0 %vm447_vm2, %v5394_v49  ;;  %v398_v54 = vsel %vm274_vm0, %v393_v50, %v397_v36  ;;  %v5460_v50 = vsel %vm1928_vm3, %v5442_v34, %v6648_v43  ;;  %v2530_v43 = vrot.slane %v5124_v31, 2  ;;  %v1942_v36 = vrot.slane %v5201_v23, 2 }
  0x4a   : > { %4529 = vmatpush3.bf16.msra.mxu0 %v5250_v63  ;;  %4496 = vmatprep.mubr.msk.bf16.mxu0 %vm447_vm2, %v5399_v55  ;;  %6669 = vst [vmem:[#allocation13_spill] sm:$0xff] %v5425_v58  ;;  %v390_v63 = vsel %vm274_vm0, %v385_v32, %v389_v59  ;;  %v405_v59 = vrot.slane %v5425_v58, 1  ;;  %v4990_v32 = vld [vmem:[%s6623_s1 + $0xd8] sm:$0xff]   ;;  %6674 = vst [vmem:[#allocation18_spill] sm:$0xff] %v5460_v50  ;;  %v1940_v58 = vrot.slane %v5175_v9, 2  ;;  %v6675_v31 = vrot.slane %v5337_v39, 1 }
  0x4b   : > { %4530 = vmatprep.subr.bf16.mxu0 %v4986_v35 }
  0x4c   : > { %v406_v26 = vsel %vm274_vm0, %v401_v1, %v405_v59  ;;  %v5487_v44 = vsel %vm1928_vm3, %v1938_v6, %v1940_v58  ;;  %v2539_v6 = vrot.slane %v5181_v13, 3  ;;  %v5512_v1 = vsel %vm1928_vm3, %v1942_v36, %v1944_v57 }
  0x4e   : > { %4531 = vmatpush3.bf16.msra.mxu0 %v4986_v35  ;;  %v409_v35 = vor.u32 %v5439_v53, %v405_v59  ;;  %v5478_v53 = vld [vmem:[%s6623_s1 + $0xe0] sm:$0xff]  }
  0x4f   : > { %4297 = vmatmul.mubr.msk.bf16.gmra.mrb[24].mxu1 %vm447_vm2, %v390_v63  ;;  %4532 = vmatprep.subr.bf16.mxu0 %v4988_v29  ;;  %v2528_v63 = vrot.slane %v5111_v25, 3 }
  0x50   : > { %4300 = vmatprep.mubr.msk.bf16.mxu1 %vm447_vm2, %v398_v54  ;;  %v2531_v54 = vrot.slane %v5121_v30, 3  ;;  %v414_v30 = vsel %vm274_vm0, %v409_v35, %v6675_v31  ;;  %v2554_v31 = vrot.slane %v5257_v3, 2  ;;  %v4995_v3 = vld [vmem:[%s6623_s1 + $0x58] sm:$0xff]  }
  0x51   : > { %4497 = vmatmul.mubr.msk.bf16.gmra.mrb[4].mxu0 %vm447_vm2, %v5446_v47  ;;  %v2529_v25 = vor.u32 %v2528_v63, %v2527_v46  ;;  %v1950_v46 = vrot.slane %v5312_v61, 2 }
  0x52   : > { %4500 = vmatprep.mubr.msk.bf16.mxu0 %vm447_vm2, %v5450_v37  ;;  %4533 = vmatpush3.bf16.msra.mxu0 %v4988_v29  ;;  %v2532_v22 = vor.u32 %v2531_v54, %v2530_v43  ;;  %v2535_v29 = vrot.slane %v5142_v51, 3  ;;  %v5494_v43 = vsel %vm1928_vm3, %v1940_v58, %v1942_v36  ;;  %v1946_v58 = vrot.slane %v5245_v62, 2 }
  0x53   : > { %4534 = vmatprep.subr.bf16.mxu0 %v4990_v32  ;;  %v2550_v54 = vrot.slane %v5230_v48, 2  ;;  %v2551_v36 = vrot.slane %v5217_v42, 3  ;;  %v4993_v48 = vld [vmem:[%s6623_s1 + $0x50] sm:$0xff]  }
  0x54   : > { %v5490_v50 = vsel %vm2526_vm4, %v2529_v25, %v2532_v22  ;;  %v2536_v37 = vor.u32 %v2535_v29, %v2534_v45  ;;  %v2538_v45 = vrot.slane %v5184_v14, 2  ;;  %v5520_v14 = vsel %vm1928_vm3, %v1944_v57, %v1946_v58  ;;  %v4991_v25 = vld [vmem:[%s6623_s1 + $0x48] sm:$0xff]  }
  0x55   : > { %v1954_v57 = vrot.slane %v5358_v56, 2 }
  0x56   : > { %4535 = vmatpush3.bf16.msra.mxu0 %v4990_v32  ;;  %v5499_v51 = vsel %vm2526_vm4, %v2532_v22, %v2536_v37  ;;  %v2540_v59 = vor.u32 %v2539_v6, %v2538_v45  ;;  %v2542_v32 = vrot.slane %v5190_v18, 2  ;;  %v2543_v22 = vrot.slane %v5187_v17, 3 }
  0x57   : > { %4301 = vmatmul.mubr.msk.bf16.gmra.mrb[28].mxu1 %vm447_vm2, %v406_v26  ;;  %4572 = vmatprep.subr.bf16.mxu0 %v5478_v53  ;;  %v2546_v18 = vrot.slane %v5196_v20, 2  ;;  %v2552_v26 = vor.u32 %v2551_v36, %v2550_v54  ;;  %v2558_v6 = vrot.slane %v5267_v10, 2  ;;  %v5594_v10 = vld [vmem:[%s6623_s1 + $0x60] sm:$0xff]   ;;  %v1960_v54 = vrot.slane %v5321_v11, 2 }
  0x58   : > { %4304 = vmatprep.mubr.msk.bf16.mxu1 %vm447_vm2, %v414_v30  ;;  %v5515_v35 = vsel %vm2526_vm4, %v2536_v37, %v2540_v59  ;;  %v2544_v13 = vor.u32 %v2543_v22, %v2542_v32  ;;  %v2547_v37 = vrot.slane %v5193_v19, 3  ;;  %v2555_v30 = vrot.slane %v5254_v2, 3 }
  0x59   : > { %4501 = vmatmul.mubr.msk.bf16.gmra.mrb[8].mxu0 %vm447_vm2, %v5487_v44 }
  0x5a   : > { %4504 = vmatprep.mubr.msk.bf16.mxu0 %vm447_vm2, %v5494_v43  ;;  %v5527_v17 = vsel %vm2526_vm4, %v2540_v59, %v2544_v13  ;;  %v2548_v63 = vor.u32 %v2547_v37, %v2546_v18  ;;  %v2556_v45 = vor.u32 %v2555_v30, %v2554_v31  ;;  %v2563_v18 = vrot.slane %v5293_v40, 3  ;;  %v4994_v31 = vld [vmem:[%s6623_s1 + $0xe8] sm:$0xff]  }
  0x5b   : > { %v1956_v37 = vrot.slane %v5369_v24, 2 }
  0x5c   : > { %v5541_v20 = vsel %vm2526_vm4, %v2544_v13, %v2548_v63  ;;  %v5555_v42 = vsel %vm2526_vm4, %v2548_v63, %v2552_v26  ;;  %v5574_v2 = vsel %vm2526_vm4, %v2552_v26, %v2556_v45  ;;  %v2562_v13 = vrot.slane %v5296_v41, 2 }
  0x5d   : > { %v5610_v41 = vsel %vm1928_vm3, %v1954_v57, %v1956_v37  ;;  %v5635_v26 = vsel %vm1928_vm3, %v1960_v54, %v5442_v34 }
  0x5f   : > { %4305 = vmatmul.mubr.msk.bf16.gmra.mrb[32].mxu1 %vm447_vm2, %v5378_v38  ;;  %v1948_v38 = vrot.slane %v5272_v27, 2 }
  0x60   : > { %4316 = vmatprep.mubr.msk.bf16.mxu1 %vm447_vm2, %v5093_v12 }
  0x61   : > { %4505 = vmatmul.mubr.msk.bf16.gmra.mrb[12].mxu0 %vm447_vm2, %v5512_v1  ;;  %v5544_v19 = vsel %vm1928_vm3, %v1946_v58, %v1948_v38  ;;  %v5549_v29 = vsel %vm1928_vm3, %v1948_v38, %v1950_v46  ;;  %v2559_v58 = vrot.slane %v5264_v8, 3  ;;  %v1958_v38 = vrot.slane %v5402_v0, 2 }
  0x62   : > { %4508 = vmatprep.mubr.msk.bf16.mxu0 %vm447_vm2, %v5520_v14 }
  0x63   : > { %v2560_v32 = vor.u32 %v2559_v58, %v2558_v6  ;;  %v5615_v40 = vsel %vm1928_vm3, %v1956_v37, %v1958_v38  ;;  %v5625_v36 = vsel %vm1928_vm3, %v1958_v38, %v1960_v54  ;;  %v3241_v6 = vld [vmem:[%s6624_s2] sm:$0xff]  ;;  %v5018_v58 = vmov 0   ;;  %v3246_v37 = vld [vmem:[%s6624_s2 + $0x28] sm:$0xff] }
  0x64   : > { %4969 = vset.pattern.permute.xlu1 %v5018_v58  ;;  %4968 = vset.pattern.permute.xlu0 %v5018_v58  ;;  %v3245_v38 = vld [vmem:[%s6624_s2 + $0x20] sm:$0xff] }
  0x65   : > { %v5587_v8 = vsel %vm2526_vm4, %v2556_v45, %v2560_v32  ;;  %v3243_v45 = vld [vmem:[%s6624_s2 + $0x10] sm:$0xff]  ;;  %3279 = vperm.xlu0 %4968, %v3241_v6  }
  0x66   : > { %3289 = vperm.xlu1 %4969, %v3243_v45   ;;  %v3253_v45 = vld [vmem:[%s6624_s2 + $0x60] sm:$0xff] }
  0x67   : > { %4317 = vmatmul.mubr.msk.bf16.vlgmr.msra.gmra.mrb[0].mxu1 %vm447_vm2, %v5097_v15 }
  0x68   : > { %4320 = vmatprep.mubr.msk.bf16.mxu1 %vm447_vm2, %v5099_v16  ;;  %4353 = vmatpush3.bf16.msra.mxu1 %v5277_v28  ;;  %v1952_v28 = vrot.slane %v5319_v7, 2 }
  0x69   : > { %4509 = vmatmul.mubr.msk.bf16.gmra.mrb[16].mxu0 %vm447_vm2, %v5544_v19  ;;  %4354 = vmatprep.subr.bf16.mxu1 %v4991_v25 }
  0x6a   : > { %4512 = vmatprep.mubr.msk.bf16.mxu0 %vm447_vm2, %v5549_v29  ;;  %v5577_v59 = vsel %vm1928_vm3, %v1950_v46, %v1952_v28  ;;  %v5582_v22 = vsel %vm1928_vm3, %v1952_v28, %v1954_v57  ;;  %v5602_v46 = vor.u32 %v2563_v18, %v2562_v13  ;;  %v948_v28 = vrot.slane %v5099_v16, 1  ;;  %v5001_v57 = vld [vmem:[%s6623_s1 + $0x70] sm:$0xff]  }
  0x6b   : > { %v956_v13 = vrot.slane %v5169_v5, 1  ;;  %v958_v18 = vrot.slane %v5175_v9, 1 }
  0x6c   : > { %4355 = vmatpush3.bf16.msra.mxu1 %v4991_v25  ;;  %v5607_v63 = vsel %vm2526_vm4, %v2560_v32, %v5602_v46  ;;  %v5629_v25 = vpack.c.bf16 %v5421_v52, %v5421_v52 }
  0x6d   : > { %4356 = vmatprep.subr.bf16.mxu1 %v4993_v48 }
  0x6f   : > { %4321 = vmatmul.mubr.msk.bf16.gmra.mrb[4].mxu1 %vm447_vm2, %v5105_v21 }
  0x70   : > { %4324 = vmatprep.mubr.msk.bf16.mxu1 %vm447_vm2, %v5129_v33  ;;  %4357 = vmatpush3.bf16.msra.mxu1 %v4993_v48  ;;  %v1964_v48 = vrot.slane %v5629_v25, 2 }
  0x71   : > { %4513 = vmatmul.mubr.msk.bf16.gmra.mrb[20].mxu0 %vm447_vm2, %v5577_v59  ;;  %4358 = vmatprep.subr.bf16.mxu1 %v4995_v3 }
  0x72   : > { %4516 = vmatprep.mubr.msk.bf16.mxu0 %vm447_vm2, %v5582_v22  ;;  %v1965_v52 = vsel %vm1928_vm3, %v5442_v34, %v1964_v48  ;;  %v4996_v34 = vld [vmem:[%s6623_s1 + $0xf0] sm:$0xff]   ;;  %v5772_v48 = vsel %vm944_vm5, %v956_v13, %v958_v18 }
  0x74   : > { %4359 = vmatpush3.bf16.msra.mxu1 %v4995_v3  ;;  %v3244_v3 = vld [vmem:[%s6624_s2 + $0x18] sm:$0xff] }
  0x75   : > { %4396 = vmatprep.subr.bf16.mxu1 %v5594_v10  ;;  %3294 = vperm.xlu1 %4969, %v3244_v3   ;;  %v6678_v3 = vld [vmem:[#allocation14_spill] sm:$0xff] }
  0x77   : > { %4325 = vmatmul.mubr.msk.bf16.gmra.mrb[8].mxu1 %vm447_vm2, %v5167_v4 }
  0x78   : > { %4328 = vmatprep.mubr.msk.bf16.mxu1 %vm447_vm2, %v5169_v5 }
  0x79   : > { %4517 = vmatmul.mubr.msk.bf16.gmra.mrb[24].mxu0 %vm447_vm2, %v5610_v41  ;;  %3304 = vperm.xlu1 %4969, %v3246_v37  }
  0x7a   : > { %4520 = vmatprep.mubr.msk.bf16.mxu0 %vm447_vm2, %v5615_v40 }
  0x7f   : > { %4329 = vmatmul.mubr.msk.bf16.gmra.mrb[12].mxu1 %vm447_vm2, %v5175_v9 }
  0x80   : > { %4332 = vmatprep.mubr.msk.bf16.mxu1 %vm447_vm2, %v5201_v23 }
  0x81   : > { %4521 = vmatmul.mubr.msk.bf16.gmra.mrb[28].mxu0 %vm447_vm2, %v5625_v36 }
  0x82   : > { %4524 = vmatprep.mubr.msk.bf16.mxu0 %vm447_vm2, %v5635_v26 }
  0x87   : > { %4333 = vmatmul.mubr.msk.bf16.gmra.mrb[16].mxu1 %vm447_vm2, %v5242_v60 }
  0x88   : > { %4336 = vmatprep.mubr.msk.bf16.mxu1 %vm447_vm2, %v5245_v62 }
  0x89   : > { %4525 = vmatmul.mubr.msk.bf16.gmra.mrb[32].mxu0 %vm447_vm2, %v1965_v52  ;;  %v3247_v52 = vld [vmem:[%s6624_s2 + $0x30] sm:$0xff] }
  0x8a   : > { %4536 = vmatprep.mubr.msk.bf16.mxu0 %vm447_vm2, %v5394_v49  ;;  %v4998_v49 = vld [vmem:[%s6623_s1 + $0xf8] sm:$0xff]  }
  0x8f   : > { %4337 = vmatmul.mubr.msk.bf16.gmra.mrb[20].mxu1 %vm447_vm2, %v5272_v27 }
  0x90   : > { %4340 = vmatprep.mubr.msk.bf16.mxu1 %vm447_vm2, %v5312_v61 }
  0x91   : > { %4537 = vmatmul.mubr.msk.bf16.vlgmr.msra.gmra.mrb[0].mxu0 %vm447_vm2, %v5399_v55  ;;  %v945_v55 = vrot.slane %v5093_v12, 1  ;;  %v950_v12 = vrot.slane %v5105_v21, 1 }
  0x92   : > { %4573 = vmatpush3.bf16.msra.mxu0 %v5478_v53  ;;  %4540 = vmatprep.mubr.msk.bf16.mxu0 %vm447_vm2, %v5446_v47  ;;  %v6676_v53 = vld [vmem:[#allocation17_spill] sm:$0xff]  ;;  %v5682_v47 = vld [vmem:[%s6623_s1 + $0x100] sm:$0xff]  }
  0x93   : > { %4574 = vmatprep.subr.bf16.mxu0 %v4994_v31 }
  0x96   : > { %4575 = vmatpush3.bf16.msra.mxu0 %v4994_v31  ;;  %v960_v31 = vrot.slane %v5201_v23, 1 }
  0x97   : > { %4341 = vmatmul.mubr.msk.bf16.gmra.mrb[24].mxu1 %vm447_vm2, %v5319_v7  ;;  %4576 = vmatprep.subr.bf16.mxu0 %v4996_v34 }
  0x98   : > { %4344 = vmatprep.mubr.msk.bf16.mxu1 %vm447_vm2, %v5358_v56 }
  0x99   : > { %4541 = vmatmul.mubr.msk.bf16.gmra.mrb[4].mxu0 %vm447_vm2, %v6676_v53  ;;  %v237_v53 = vld [vmem:[%s5084_s9 + $0x140] sm:$0xff] }
  0x9a   : > { %4544 = vmatprep.mubr.msk.bf16.mxu0 %vm447_vm2, %v5487_v44  ;;  %4577 = vmatpush3.bf16.msra.mxu0 %v4996_v34  ;;  %v946_v44 = vrot.slane %v5097_v15, 1  ;;  %v962_v34 = vrot.slane %v5242_v60, 1 }
  0x9b   : > { %4578 = vmatprep.subr.bf16.mxu0 %v4998_v49 }
  0x9c   : > { %v947_v30 = vsel %vm944_vm5, %v945_v55, %v946_v44  ;;  %v5706_v15 = vsel %vm944_vm5, %v946_v44, %v948_v28  ;;  %v3249_v55 = vld [vmem:[%s6624_s2 + $0x40] sm:$0xff]  ;;  %v5801_v44 = vsel %vm944_vm5, %v958_v18, %v960_v31 }
  0x9e   : > { %4579 = vmatpush3.bf16.msra.mxu0 %v4998_v49  ;;  %v3250_v49 = vld [vmem:[%s6624_s2 + $0x48] sm:$0xff] }
  0x9f   : > { %4345 = vmatmul.mubr.msk.bf16.gmra.mrb[28].mxu1 %vm447_vm2, %v5369_v24  ;;  %4616 = vmatprep.subr.bf16.mxu0 %v5682_v47 }
  0xa0   : > { %4348 = vmatprep.mubr.msk.bf16.mxu1 %vm447_vm2, %v5402_v0 }
  0xa1   : > { %4545 = vmatmul.mubr.msk.bf16.gmra.mrb[8].mxu0 %vm447_vm2, %v5494_v43  ;;  %v5709_v43 = vsel %vm944_vm5, %v948_v28, %v950_v12  ;;  %v5809_v28 = vpack.c.bf16 %v237_v53, %v237_v53  ;;  %v3257_v53 = vld [vmem:[%s6624_s2 + $0x80] sm:$0xff] }
  0xa2   : > { %4548 = vmatprep.mubr.msk.bf16.mxu0 %vm447_vm2, %v5512_v1  ;;  %v4999_v1 = vld [vmem:[%s6623_s1 + $0x68] sm:$0xff]  }
  0xa7   : > { %4349 = vmatmul.mubr.msk.bf16.gmra.mrb[32].mxu1 %vm447_vm2, %v5321_v11 }
  0xa8   : > { %4360 = vmatprep.mubr.msk.bf16.mxu1 %vm447_vm2, %v947_v30  ;;  %v5807_v30 = vsel %vm944_vm5, %v960_v31, %v962_v34  ;;  %v3258_v31 = vld [vmem:[%s6624_s2 + $0x88] sm:$0xff] }
  0xa9   : > { %4549 = vmatmul.mubr.msk.bf16.gmra.mrb[12].mxu0 %vm447_vm2, %v5520_v14  ;;  %v952_v14 = vrot.slane %v5129_v33, 1 }
  0xaa   : > { %4552 = vmatprep.mubr.msk.bf16.mxu0 %vm447_vm2, %v5544_v19  ;;  %v954_v19 = vrot.slane %v5167_v4, 1 }
  0xac   : > { %v5741_v32 = vsel %vm944_vm5, %v952_v14, %v954_v19  ;;  %v5766_v54 = vsel %vm944_vm5, %v954_v19, %v956_v13  ;;  %v6677_v19 = vld [vmem:[#allocation18_spill] sm:$0xff]  ;;  %v6680_v13 = vld [vmem:[#allocation12_spill] sm:$0xff] }
  0xad   : > { %v1611_v18 = vshrl.u32 %v6680_v13, 16  ;;  %v1614_v37 = vshll.u32 %v6680_v13, 16 }
  0xaf   : > { %4361 = vmatmul.mubr.msk.bf16.vlgmr.msra.gmra.mrb[0].mxu1 %vm447_vm2, %v5706_v15 }
  0xb0   : > { %4364 = vmatprep.mubr.msk.bf16.mxu1 %vm447_vm2, %v5709_v43  ;;  %4397 = vmatpush3.bf16.msra.mxu1 %v5594_v10  ;;  %v3242_v10 = vld [vmem:[%s6624_s2 + $0x8] sm:$0xff] }
  0xb1   : > { %4553 = vmatmul.mubr.msk.bf16.gmra.mrb[16].mxu0 %vm447_vm2, %v5549_v29  ;;  %4398 = vmatprep.subr.bf16.mxu1 %v4999_v1  ;;  %v5735_v29 = vsel %vm944_vm5, %v950_v12, %v952_v14  ;;  %v964_v12 = vrot.slane %v5245_v62, 1  ;;  %v3254_v14 = vld [vmem:[%s6624_s2 + $0x68] sm:$0xff] }
  0xb2   : > { %4556 = vmatprep.mubr.msk.bf16.mxu0 %vm447_vm2, %v5577_v59  ;;  %v5003_v59 = vld [vmem:[%s6623_s1 + $0x78] sm:$0xff]   ;;  %3284 = vperm.xlu0 %4968, %v3242_v10  }
  0xb3   : > { %v5832_v6 = vsel %vm944_vm5, %v962_v34, %v964_v12  ;;  %v1613_v34 = vrot.slane %v1611_v18, 1 }
  0xb4   : > { %4399 = vmatpush3.bf16.msra.mxu1 %v4999_v1  ;;  %v966_v1 = vrot.slane %v5272_v27, 1 }
  0xb5   : > { %4400 = vmatprep.subr.bf16.mxu1 %v5001_v57 }
  0xb6   : > { %3299 = vperm.xlu0 %4968, %v3245_v38   ;;  %v5838_v58 = vsel %vm944_vm5, %v964_v12, %v966_v1  ;;  %v3255_v38 = vld [vmem:[%s6624_s2 + $0x70] sm:$0xff] }
  0xb7   : > { %4365 = vmatmul.mubr.msk.bf16.gmra.mrb[4].mxu1 %vm447_vm2, %v5735_v29 }
  0xb8   : > { %4368 = vmatprep.mubr.msk.bf16.mxu1 %vm447_vm2, %v5741_v32  ;;  %4401 = vmatpush3.bf16.msra.mxu1 %v5001_v57  ;;  %v2272_v57 = vrot.slane %v5809_v28, 2 }
  0xb9   : > { %4557 = vmatmul.mubr.msk.bf16.gmra.mrb[20].mxu0 %vm447_vm2, %v5582_v22  ;;  %4402 = vmatprep.subr.bf16.mxu1 %v5003_v59  ;;  %v3248_v22 = vld [vmem:[%s6624_s2 + $0x38] sm:$0xff] }
  0xba   : > { %4560 = vmatprep.mubr.msk.bf16.mxu0 %vm447_vm2, %v5610_v41  ;;  %v5777_v41 = vld [vmem:[%s6623_s1 + $0x80] sm:$0xff]   ;;  %3314 = vperm.xlu1 %4969, %v3248_v22   ;;  %v968_v22 = vrot.slane %v5312_v61, 1 }
  0xbb   : > { %3309 = vperm.xlu0 %4968, %v3247_v52   ;;  %v970_v52 = vrot.slane %v5319_v7, 1 }
  0xbc   : > { %4403 = vmatpush3.bf16.msra.mxu1 %v5003_v59  ;;  %v6679_v59 = vrot.slane %v6678_v3, 2 }
  0xbd   : > { %4660 = vmatprep.subr.bf16.mxu1 %v5777_v41  ;;  %v5876_v12 = vsel %vm944_vm5, %v968_v22, %v970_v52 }
  0xbe   : > { %3324 = vperm.xlu1 %4969, %v3250_v49   ;;  %v2273_v10 = vsel %vm1928_vm3, %v6679_v59, %v2272_v57  ;;  %v1616_v49 = vrot.slane %v1614_v37, 2  ;;  %v3262_v57 = vld [vmem:[%s6624_s2 + $0xa8] sm:$0xff]  ;;  %v5005_v59 = vld [vmem:[%s6623_s1 + $0x118] sm:$0xff]  }
  0xbf   : > { %4369 = vmatmul.mubr.msk.bf16.gmra.mrb[8].mxu1 %vm447_vm2, %v5766_v54  ;;  %3319 = vperm.xlu0 %4968, %v3249_v55  }
  0xc0   : > { %4372 = vmatprep.mubr.msk.bf16.mxu1 %vm447_vm2, %v5772_v48  ;;  %v5867_v55 = vor.u32 %v1616_v49, %v1613_v34  ;;  %v3265_v34 = vld [vmem:[%s6624_s2 + $0xc0] sm:$0xff] }
  0xc1   : > { %4561 = vmatmul.mubr.msk.bf16.gmra.mrb[24].mxu0 %vm447_vm2, %v5615_v40  ;;  %v3252_v40 = vld [vmem:[%s6624_s2 + $0x58] sm:$0xff]  ;;  %v6681_v49 = vld [vmem:[#allocation6_spill] sm:$0xff] }
  0xc2   : > { %4564 = vmatprep.mubr.msk.bf16.mxu0 %vm447_vm2, %v5625_v36  ;;  %3334 = vperm.xlu1 %4969, %v3252_v40   ;;  %v3251_v36 = vld [vmem:[%s6624_s2 + $0x50] sm:$0xff]  ;;  %v5870_v40 = vsel %vm944_vm5, %v966_v1, %v968_v22  ;;  %v972_v1 = vrot.slane %v5358_v56, 1 }
  0xc3   : > { %3329 = vperm.xlu0 %4968, %v3251_v36   ;;  %v3260_v36 = vld [vmem:[%s6624_s2 + $0x98] sm:$0xff]  ;;  %v3263_v22 = vld [vmem:[%s6624_s2 + $0xb0] sm:$0xff] }
  0xc6   : > { %3344 = vperm.xlu1 %4969, %v3254_v14   ;;  %v3259_v14 = vld [vmem:[%s6624_s2 + $0x90] sm:$0xff] }
  0xc7   : > { %4373 = vmatmul.mubr.msk.bf16.gmra.mrb[12].mxu1 %vm447_vm2, %v5801_v44  ;;  %3339 = vperm.xlu0 %4968, %v3253_v45   ;;  %v5004_v45 = vld [vmem:[%s6623_s1 + $0x110] sm:$0xff]  }
  0xc8   : > { %4376 = vmatprep.mubr.msk.bf16.mxu1 %vm447_vm2, %v5807_v30 }
  0xc9   : > { %4565 = vmatmul.mubr.msk.bf16.gmra.mrb[28].mxu0 %vm447_vm2, %v5635_v26  ;;  %v3256_v26 = vld [vmem:[%s6624_s2 + $0x78] sm:$0xff] }
  0xca   : > { %4568 = vmatprep.mubr.msk.bf16.mxu0 %vm447_vm2, %v6677_v19  ;;  %3354 = vperm.xlu1 %4969, %v3256_v26   ;;  %v974_v19 = vrot.slane %v5369_v24, 1  ;;  %v5902_v26 = vsel %vm944_vm5, %v970_v52, %v972_v1  ;;  %v3266_v52 = vld [vmem:[%s6624_s2 + $0xc8] sm:$0xff] }
  0xcb   : > { %3349 = vperm.xlu0 %4968, %v3255_v38   ;;  %v5924_v38 = vrot.slane %v5321_v11, 1 }
  0xce   : > { %3364 = vperm.xlu1 %4969, %v3258_v31  }
  0xcf   : > { %4377 = vmatmul.mubr.msk.bf16.gmra.mrb[16].mxu1 %vm447_vm2, %v5832_v6  ;;  %3359 = vperm.xlu0 %4968, %v3257_v53   ;;  %v980_v53 = vrot.slane %v6681_v49, 1 }
  0xd0   : > { %4380 = vmatprep.mubr.msk.bf16.mxu1 %vm447_vm2, %v5838_v58 }
  0xd1   : > { %4569 = vmatmul.mubr.msk.bf16.gmra.mrb[32].mxu0 %vm447_vm2, %v2273_v10  ;;  %v976_v10 = vrot.slane %v5402_v0, 1 }
  0xd2   : > { %4580 = vmatprep.mubr.msk.bf16.mxu0 %vm447_vm2, %v5490_v50  ;;  %v5002_v50 = vld [vmem:[%s6623_s1 + $0x108] sm:$0xff]   ;;  %3374 = vperm.xlu1 %4969, %v3260_v36   ;;  %v3267_v36 = vld [vmem:[%s6624_s2 + $0xd0] sm:$0xff] }
  0xd3   : > { %3369 = vperm.xlu0 %4968, %v3259_v14   ;;  %v5935_v31 = vsel %vm944_vm5, %v974_v19, %v976_v10  ;;  %v6682_v14 = vld [vmem:[#allocation4_spill] sm:$0xff] }
  0xd6   : > { %3384 = vperm.xlu1 %4969, %v3262_v57   ;;  %v6683_v57 = vld [vmem:[#allocation3_spill] sm:$0xff] }
  0xd7   : > { %4381 = vmatmul.mubr.msk.bf16.gmra.mrb[20].mxu1 %vm447_vm2, %v5870_v40 }
  0xd8   : > { %4384 = vmatprep.mubr.msk.bf16.mxu1 %vm447_vm2, %v5876_v12 }
  0xd9   : > { %4581 = vmatmul.mubr.msk.bf16.vlgmr.msra.gmra.mrb[0].mxu0 %vm447_vm2, %v5499_v51  ;;  %v5905_v51 = vsel %vm944_vm5, %v972_v1, %v974_v19  ;;  %v981_v1 = vsel %vm944_vm5, %v5924_v38, %v980_v53  ;;  %v2566_v19 = vrot.slane %v6682_v14, 2  ;;  %v6687_v53 = vld [vmem:[#allocation8_spill] sm:$0xff] }
  0xda   : > { %4617 = vmatpush3.bf16.msra.mxu0 %v5682_v47  ;;  %4584 = vmatprep.mubr.msk.bf16.mxu0 %vm447_vm2, %v5515_v35  ;;  %v3261_v47 = vld [vmem:[%s6624_s2 + $0xa0] sm:$0xff]  ;;  %v3264_v35 = vld [vmem:[%s6624_s2 + $0xb8] sm:$0xff] }
  0xdb   : > { %4618 = vmatprep.subr.bf16.mxu0 %v5002_v50  ;;  %3379 = vperm.xlu0 %4968, %v3261_v47   ;;  %v6684_v47 = vld [vmem:[#allocation9_spill] sm:$0xff] }
  0xdc   : > { %3394 = vperm.xlu1 %4969, %v3264_v35   ;;  %v2570_v35 = vrot.slane %v6684_v47, 2 }
  0xde   : > { %4619 = vmatpush3.bf16.msra.mxu0 %v5002_v50  ;;  %v3270_v50 = vld [vmem:[%s6624_s2 + $0xe8] sm:$0xff] }
  0xdf   : > { %4385 = vmatmul.mubr.msk.bf16.gmra.mrb[24].mxu1 %vm447_vm2, %v5902_v26  ;;  %4620 = vmatprep.subr.bf16.mxu0 %v5004_v45 }
  0xe0   : > { %4388 = vmatprep.mubr.msk.bf16.mxu1 %vm447_vm2, %v5905_v51  ;;  %3389 = vperm.xlu0 %4968, %v3263_v22   ;;  %v3271_v22 = vld [vmem:[%s6624_s2 + $0xf0] sm:$0xff] }
  0xe1   : > { %4585 = vmatmul.mubr.msk.bf16.gmra.mrb[4].mxu0 %vm447_vm2, %v5527_v17  ;;  %v5939_v17 = vsel %vm944_vm5, %v976_v10, %v5924_v38  ;;  %3404 = vperm.xlu1 %4969, %v3266_v52  }
  0xe2   : > { %4588 = vmatprep.mubr.msk.bf16.mxu0 %vm447_vm2, %v5541_v20  ;;  %4621 = vmatpush3.bf16.msra.mxu0 %v5004_v45  ;;  %v3268_v20 = vld [vmem:[%s6624_s2 + $0xd8] sm:$0xff]  ;;  %v2567_v45 = vrot.slane %v6683_v57, 3 }
  0xe3   : > { %4622 = vmatprep.subr.bf16.mxu0 %v5005_v59 }
  0xe4   : > { %3399 = vperm.xlu0 %4968, %v3265_v34   ;;  %v2568_v52 = vor.u32 %v2567_v45, %v2566_v19  ;;  %v3274_v34 = vld [vmem:[%s6624_s2 + $0x108] sm:$0xff]  ;;  %v3273_v45 = vld [vmem:[%s6624_s2 + $0x100] sm:$0xff] }
  0xe5   : > { %3414 = vperm.xlu1 %4969, %v3268_v20  }
  0xe6   : > { %4623 = vmatpush3.bf16.msra.mxu0 %v5005_v59  ;;  %v6685_v59 = vld [vmem:[#allocation5_spill] sm:$0xff] }
  0xe7   : > { %4389 = vmatmul.mubr.msk.bf16.gmra.mrb[28].mxu1 %vm447_vm2, %v5935_v31  ;;  %v2571_v10 = vrot.slane %v6685_v59, 3 }
  0xe8   : > { %4392 = vmatprep.mubr.msk.bf16.mxu1 %vm447_vm2, %v5939_v17  ;;  %3409 = vperm.xlu0 %4968, %v3267_v36   ;;  %v2575_v36 = vrot.slane %v6687_v53, 3 }
  0xe9   : > { %4589 = vmatmul.mubr.msk.bf16.gmra.mrb[8].mxu0 %vm447_vm2, %v5555_v42  ;;  %3424 = vperm.xlu1 %4969, %v3270_v50   ;;  %v3269_v42 = vld [vmem:[%s6624_s2 + $0xe0] sm:$0xff]  ;;  %v2572_v20 = vor.u32 %v2571_v10, %v2570_v35  ;;  %v6688_v50 = vld [vmem:[#allocation15_spill] sm:$0xff] }
  0xea   : > { %4592 = vmatprep.mubr.msk.bf16.mxu0 %vm447_vm2, %v5574_v2  ;;  %v3272_v2 = vld [vmem:[%s6624_s2 + $0xf8] sm:$0xff] }
  0xec   : > { %3419 = vperm.xlu0 %4968, %v3269_v42   ;;  %v6689_v42 = vld [vmem:[#allocation11_spill] sm:$0xff] }
  0xed   : > { %3434 = vperm.xlu1 %4969, %v3272_v2   ;;  %v2579_v19 = vrot.slane %v6689_v42, 3 }
  0xef   : > { %4393 = vmatmul.mubr.msk.bf16.gmra.mrb[32].mxu1 %vm447_vm2, %v981_v1  ;;  %v2578_v1 = vrot.slane %v6688_v50, 2 }
  0xf0   : > { %4404 = vmatprep.mubr.msk.bf16.mxu1 %vm447_vm2, %v5706_v15  ;;  %3429 = vperm.xlu0 %4968, %v3271_v22   ;;  %v2569_v15 = vsel %vm2526_vm4, %v5602_v46, %v2568_v52  ;;  %v3276_v46 = vld [vmem:[%s6624_s2 + $0x118] sm:$0xff]  ;;  %v6690_v22 = vld [vmem:[#allocation16_spill] sm:$0xff] }
  0xf1   : > { %4593 = vmatmul.mubr.msk.bf16.gmra.mrb[12].mxu0 %vm447_vm2, %v5587_v8  ;;  %3444 = vperm.xlu1 %4969, %v3274_v34   ;;  %v6686_v8 = vld [vmem:[#allocation10_spill] sm:$0xff]  ;;  %v2580_v35 = vor.u32 %v2579_v19, %v2578_v1  ;;  %v6691_v34 = vld [vmem:[#allocation13_spill] sm:$0xff]  ;;  %v2587_v1 = vrot.slane %v5337_v39, 3 }
  0xf2   : > { %4596 = vmatprep.mubr.msk.bf16.mxu0 %vm447_vm2, %v5607_v63  ;;  %v2574_v49 = vrot.slane %v6686_v8, 2  ;;  %v2573_v63 = vsel %vm2526_vm4, %v2568_v52, %v2572_v20  ;;  %v2582_v52 = vrot.slane %v6690_v22, 2 }
  0xf4   : > { %v2576_v2 = vor.u32 %v2575_v36, %v2574_v49  ;;  %3439 = vperm.xlu0 %4968, %v3273_v45   ;;  %v6692_v36 = vld [vmem:[#allocation7_spill] sm:$0xff]  ;;  %v2595_v45 = vshrl.u32 %v6678_v3, 16 }
  0xf5   : > { %3454 = vperm.xlu1 %4969, %v3276_v46   ;;  %v2598_v46 = vshll.u32 %v6678_v3, 16 }
  0xf6   : > { %v2577_v10 = vsel %vm2526_vm4, %v2572_v20, %v2576_v2  ;;  %v2581_v49 = vsel %vm2526_vm4, %v2576_v2, %v2580_v35  ;;  %v5009_v20 = vld [vmem:[%s6623_s1 + $0x98] sm:$0xff]   ;;  %v2591_v2 = vrot.slane %v1614_v37, 3 }
  0xf7   : > { %4405 = vmatmul.mubr.msk.bf16.vlgmr.msra.gmra.mrb[0].mxu1 %vm447_vm2, %v5709_v43  ;;  %v5007_v43 = vld [vmem:[%s6623_s1 + $0x88] sm:$0xff]  }
  0xf8   : > { %4408 = vmatprep.mubr.msk.bf16.mxu1 %vm447_vm2, %v5735_v29  ;;  %4664 = vmatpush3.bf16.msra.mxu1 %v5777_v41  ;;  %v3275_v29 = vld [vmem:[%s6624_s2 + $0x110] sm:$0xff] }
  0xf9   : > { %4597 = vmatmul.mubr.msk.bf16.gmra.mrb[16].mxu0 %vm447_vm2, %v2569_v15  ;;  %4661 = vmatprep.subr.bf16.mxu1 %v5007_v43  ;;  %v5008_v41 = vld [vmem:[%s6623_s1 + $0x90] sm:$0xff]   ;;  %v2583_v15 = vrot.slane %v6691_v34, 3 }
  0xfa   : > { %4600 = vmatprep.mubr.msk.bf16.mxu0 %vm447_vm2, %v2573_v63  ;;  %3449 = vperm.xlu0 %4968, %v3275_v29   ;;  %v2586_v63 = vrot.slane %v6692_v36, 2 }
  0xfc   : > { %4665 = vmatpush3.bf16.msra.mxu1 %v5007_v43  ;;  %v2588_v19 = vor.u32 %v2587_v1, %v2586_v63  ;;  %v2913_v1 = vrot.slane %v5099_v16, 3  ;;  %v2918_v16 = vrot.slane %v5167_v4, 3 }
  0xfd   : > { %4662 = vmatprep.subr.bf16.mxu1 %v5008_v41 }
  0xff   : > { %4409 = vmatmul.mubr.msk.bf16.gmra.mrb[4].mxu1 %vm447_vm2, %v5741_v32  ;;  %v2584_v32 = vor.u32 %v2583_v15, %v2582_v52  ;;  %v2607_v52 = vshll.u32 %v5809_v28, 16 }
 0x100   : > { %4412 = vmatprep.mubr.msk.bf16.mxu1 %vm447_vm2, %v5766_v54  ;;  %4666 = vmatpush3.bf16.msra.mxu1 %v5008_v41  ;;  %v2590_v54 = vrot.slane %v1611_v18, 2  ;;  %v2597_v41 = vrot.slane %v2595_v45, 2  ;;  %v2604_v18 = vshrl.u32 %v5809_v28, 16  ;;  %v1587_v45 = vrot.slane %v6683_v57, 2 }
 0x101   : > { %4601 = vmatmul.mubr.msk.bf16.gmra.mrb[20].mxu0 %vm447_vm2, %v2577_v10  ;;  %4663 = vmatprep.subr.bf16.mxu1 %v5009_v20  ;;  %v2585_v43 = vsel %vm2526_vm4, %v2580_v35, %v2584_v32  ;;  %v2589_v29 = vsel %vm2526_vm4, %v2584_v32, %v2588_v19  ;;  %v2600_v10 = vrot.slane %v2598_v46, 3 }
 0x102   : > { %4604 = vmatprep.mubr.msk.bf16.mxu0 %vm447_vm2, %v2581_v49  ;;  %v2592_v35 = vor.u32 %v2591_v2, %v2590_v54  ;;  %v2609_v49 = vrot.slane %v2607_v52, 3  ;;  %v6693_v54 = vld [vmem:[#allocation2_spill] sm:$0xff] }
 0x103   : > { %v2601_v37 = vor.u32 %v2600_v10, %v2597_v41  ;;  %v1595_v41 = vrot.slane %v6687_v53, 2 }
 0x104   : > { %4667 = vmatpush3.bf16.msra.mxu1 %v5009_v20  ;;  %v2593_v15 = vsel %vm2526_vm4, %v2588_v19, %v2592_v35  ;;  %v2914_v20 = vrot.slane %v5105_v21, 3 }
 0x105   : > { %v2602_v63 = vsel %vm2526_vm4, %v2592_v35, %v2601_v37  ;;  %v1598_v35 = vrot.slane %v6688_v50, 1 }
 0x107   : > { %4413 = vmatmul.mubr.msk.bf16.gmra.mrb[8].mxu1 %vm447_vm2, %v5772_v48  ;;  %v2606_v48 = vrot.slane %v2604_v18, 2  ;;  %v1599_v18 = vrot.slane %v6689_v42, 2  ;;  %v2936_v42 = vrot.slane %v5358_v56, 3  ;;  %v1620_v56 = vshrl.u32 %v5629_v25, 16 }
 0x108   : > { %4416 = vmatprep.mubr.msk.bf16.mxu1 %vm447_vm2, %v5801_v44 }
 0x109   : > { %4605 = vmatmul.mubr.msk.bf16.gmra.mrb[24].mxu0 %vm447_vm2, %v2585_v43  ;;  %v2610_v44 = vor.u32 %v2609_v49, %v2606_v48  ;;  %v1590_v43 = vrot.slane %v6684_v47, 1  ;;  %v1606_v49 = vrot.slane %v6692_v36, 1  ;;  %v2942_v36 = vrot.slane %v5321_v11, 3 }
 0x10a   : > { %4608 = vmatprep.mubr.msk.bf16.mxu0 %vm447_vm2, %v2589_v29  ;;  %v1594_v29 = vrot.slane %v6686_v8, 1  ;;  %v2934_v8 = vrot.slane %v5319_v7, 3  ;;  %v1600_v7 = vor.u32 %v1599_v18, %v1598_v35  ;;  %v2944_v11 = vrot.slane %v6680_v13, 3 }
 0x10b   : > { %v2611_v32 = vsel %vm2526_vm4, %v2601_v37, %v2610_v44  ;;  %v1602_v37 = vrot.slane %v6690_v22, 1  ;;  %v2938_v22 = vrot.slane %v5369_v24, 3  ;;  %v1623_v24 = vshll.u32 %v5629_v25, 16 }
 0x10c   : > { %v1596_v47 = vor.u32 %v1595_v41, %v1594_v29 }
 0x10f   : > { %4417 = vmatmul.mubr.msk.bf16.gmra.mrb[12].mxu1 %vm447_vm2, %v5807_v30  ;;  %v2915_v30 = vsel %vm2912_vm6, %v2913_v1, %v2914_v20  ;;  %v2937_v1 = vsel %vm2912_vm6, %v2934_v8, %v2936_v42 }
 0x110   : > { %4420 = vmatprep.mubr.msk.bf16.mxu1 %vm447_vm2, %v5832_v6  ;;  %v2916_v6 = vrot.slane %v5129_v33, 3  ;;  %v2922_v33 = vrot.slane %v5175_v9, 3  ;;  %v2926_v9 = vrot.slane %v5242_v60, 3 }
 0x111   : > { %4609 = vmatmul.mubr.msk.bf16.gmra.mrb[28].mxu0 %vm447_vm2, %v2593_v15  ;;  %v1603_v15 = vrot.slane %v6691_v34, 2  ;;  %v1601_v34 = vsel %vm1542_vm1, %v1596_v47, %v1600_v7 }
 0x112   : > { %4612 = vmatprep.mubr.msk.bf16.mxu0 %vm447_vm2, %v2602_v63  ;;  %v2917_v21 = vsel %vm2912_vm6, %v2914_v20, %v2916_v6  ;;  %v1607_v63 = vrot.slane %v5337_v39, 2  ;;  %v2939_v20 = vsel %vm2912_vm6, %v2936_v42, %v2938_v22  ;;  %v2940_v39 = vrot.slane %v5402_v0, 3 }
 0x113   : > { %v1604_v50 = vor.u32 %v1603_v15, %v1602_v37  ;;  %v2946_v0 = vrot.slane %v6678_v3, 3  ;;  %v3290_v3 = vpop.permute.xlu1 %3289 }
 0x115   : > { %v1605_v44 = vsel %vm1542_vm1, %v1600_v7, %v1604_v50 }
 0x117   : > { %4421 = vmatmul.mubr.msk.bf16.gmra.mrb[16].mxu1 %vm447_vm2, %v5838_v58  ;;  %v2919_v58 = vsel %vm2912_vm6, %v2916_v6, %v2918_v16  ;;  %v1622_v6 = vrot.slane %v1620_v56, 1 }
 0x118   : > { %4424 = vmatprep.mubr.msk.bf16.mxu1 %vm447_vm2, %v5870_v40  ;;  %v2920_v40 = vrot.slane %v5169_v5, 3  ;;  %v2924_v5 = vrot.slane %v5201_v23, 3  ;;  %v1288_v23 = vrot.slane %v5629_v25, 1  ;;  %v2943_v25 = vsel %vm2912_vm6, %v2940_v39, %v2942_v36 }
 0x119   : > { %4613 = vmatmul.mubr.msk.bf16.gmra.mrb[32].mxu0 %vm447_vm2, %v2611_v32  ;;  %v1608_v32 = vor.u32 %v1607_v63, %v1606_v49 }
 0x11a   : > { %4624 = vmatprep.mubr.msk.bf16.mxu0 %vm447_vm2, %v2915_v30  ;;  %v2921_v4 = vsel %vm2912_vm6, %v2918_v16, %v2920_v40  ;;  %v2925_v46 = vsel %vm2912_vm6, %v2922_v33, %v2924_v5  ;;  %v1625_v16 = vrot.slane %v1623_v24, 2 }
 0x11b   : > { %v1609_v30 = vsel %vm1542_vm1, %v1604_v50, %v1608_v32 }
 0x11f   : > { %4425 = vmatmul.mubr.msk.bf16.gmra.mrb[20].mxu1 %vm447_vm2, %v5876_v12  ;;  %v2923_v12 = vsel %vm2912_vm6, %v2920_v40, %v2922_v33  ;;  %v1626_v40 = vor.u32 %v1625_v16, %v1622_v6 }
 0x120   : > { %4428 = vmatprep.mubr.msk.bf16.mxu1 %vm447_vm2, %v5902_v26  ;;  %v1286_v26 = vrot.slane %v6680_v13, 1 }
 0x121   : > { %4625 = vmatmul.mubr.msk.bf16.vlgmr.msra.gmra.mrb[0].mxu0 %vm447_vm2, %v2917_v21  ;;  %v1618_v21 = vsel %vm1542_vm1, %v1608_v32, %v5867_v55  ;;  %v1627_v33 = vsel %vm1542_vm1, %v5867_v55, %v1626_v40 }
 0x122   : > { %4628 = vmatprep.mubr.msk.bf16.mxu0 %vm447_vm2, %v2919_v58  ;;  %v1287_v19 = vsel %vm944_vm5, %v5924_v38, %v1286_v26  ;;  %v2928_v38 = vrot.slane %v5245_v62, 3  ;;  %v1289_v57 = vsel %vm944_vm5, %v1286_v26, %v1288_v23  ;;  %v2941_v58 = vsel %vm2912_vm6, %v2938_v22, %v2940_v39 }
 0x123   : > { %v2948_v26 = vrot.slane %v5809_v28, 3 }
 0x124   : > { %v2929_v10 = vsel %vm2912_vm6, %v2926_v9, %v2928_v38 }
 0x127   : > { %4429 = vmatmul.mubr.msk.bf16.gmra.mrb[24].mxu1 %vm447_vm2, %v5905_v51  ;;  %v1586_v51 = vrot.slane %v6682_v14, 1  ;;  %v2930_v14 = vrot.slane %v5272_v27, 3 }
 0x128   : > { %4432 = vmatprep.mubr.msk.bf16.mxu1 %vm447_vm2, %v5935_v31  ;;  %v2927_v31 = vsel %vm2912_vm6, %v2924_v5, %v2926_v9  ;;  %v2949_v5 = vsel %vm2912_vm6, %v2946_v0, %v2948_v26  ;;  %v3280_v9 = vpop.permute.xlu0 %3279 }
 0x129   : > { %4629 = vmatmul.mubr.msk.bf16.gmra.mrb[4].mxu0 %vm447_vm2, %v2921_v4  ;;  %v1588_v60 = vor.u32 %v1587_v45, %v1586_v51  ;;  %v2931_v62 = vsel %vm2912_vm6, %v2928_v38, %v2930_v14  ;;  %v2945_v4 = vsel %vm2912_vm6, %v2942_v36, %v2944_v11  ;;  %v3295_v45 = vpop.permute.xlu1 %3294 }
 0x12a   : > { %4632 = vmatprep.mubr.msk.bf16.mxu0 %vm447_vm2, %v2923_v12  ;;  %v2947_v12 = vsel %vm2912_vm6, %v2944_v11, %v2946_v0 }
 0x12b   : > { %v1589_v2 = vsel %vm1542_vm1, %v6693_v54, %v1588_v60 }
 0x12f   : > { %4433 = vmatmul.mubr.msk.bf16.gmra.mrb[28].mxu1 %vm447_vm2, %v5939_v17  ;;  %v1591_v17 = vrot.slane %v6685_v59, 2  ;;  %v2932_v59 = vrot.slane %v5312_v61, 3 }
 0x130   : > { %4436 = vmatprep.mubr.msk.bf16.mxu1 %vm447_vm2, %v1287_v19 }
 0x131   : > { %4633 = vmatmul.mubr.msk.bf16.gmra.mrb[8].mxu0 %vm447_vm2, %v2925_v46  ;;  %v1592_v27 = vor.u32 %v1591_v17, %v1590_v43  ;;  %v2933_v48 = vsel %vm2912_vm6, %v2930_v14, %v2932_v59  ;;  %v2935_v61 = vsel %vm2912_vm6, %v2932_v59, %v2934_v8  ;;  %v3285_v46 = vpop.permute.xlu0 %3284  ;;  %v3305_v14 = vpop.permute.xlu1 %3304 }
 0x132   : > { %4636 = vmatprep.mubr.msk.bf16.mxu0 %vm447_vm2, %v2927_v31 }
 0x133   : > { %v1593_v53 = vsel %vm1542_vm1, %v1588_v60, %v1592_v27  ;;  %v1597_v52 = vsel %vm1542_vm1, %v1592_v27, %v1596_v47 }
 0x137   : > { %4437 = vmatmul.mubr.msk.bf16.gmra.mrb[32].mxu1 %vm447_vm2, %v1289_v57  ;;  %v3300_v57 = vpop.permute.xlu0 %3299 }
 0x138   : > { %4468 = vmatprep.mubr.msk.bf16.mxu1 %vm447_vm2, %v1589_v2 }
 0x139   : > { %4637 = vmatmul.mubr.msk.bf16.gmra.mrb[12].mxu0 %vm447_vm2, %v2929_v10  ;;  %v3315_v17 = vpop.permute.xlu1 %3314 }
 0x13a   : > { %4640 = vmatprep.mubr.msk.bf16.mxu0 %vm447_vm2, %v2931_v62 }
 0x13b   : > { %v3310_v2 = vpop.permute.xlu0 %3309 }
 0x13d   : > { %v6172_v41 = vpop.permute.xlu1 %3324 }
 0x13f   : > { %4469 = vmatmul.mubr.msk.bf16.vlgmr.msra.gmra.mrb[20].mxu1 %vm447_vm2, %v1593_v53  ;;  %v6176_v62 = vpop.permute.xlu0 %3319 }
 0x140   : > { %4472 = vmatprep.mubr.msk.bf16.mxu1 %vm447_vm2, %v1597_v52 }
 0x141   : > { %4641 = vmatmul.mubr.msk.bf16.gmra.mrb[16].mxu0 %vm447_vm2, %v2933_v48  ;;  %v3335_v8 = vpop.permute.xlu1 %3334 }
 0x142   : > { %4644 = vmatprep.mubr.msk.bf16.mxu0 %vm447_vm2, %v2935_v61 }
 0x143   : > { %v3330_v53 = vpop.permute.xlu0 %3329 }
 0x145   : > { %v6192_v15 = vpop.permute.xlu1 %3344 }
 0x147   : > { %4473 = vmatmul.mubr.msk.bf16.gmra.mrb[24].mxu1 %vm447_vm2, %v1601_v34  ;;  %v6194_v48 = vpop.permute.xlu0 %3339 }
 0x148   : > { %4476 = vmatprep.mubr.msk.bf16.mxu1 %vm447_vm2, %v1605_v44 }
 0x149   : > { %4645 = vmatmul.mubr.msk.bf16.gmra.mrb[20].mxu0 %vm447_vm2, %v2937_v1  ;;  %v6197_v61 = vpop.permute.xlu1 %3354 }
 0x14a   : > { %4648 = vmatprep.mubr.msk.bf16.mxu0 %vm447_vm2, %v2939_v20 }
 0x14b   : > { %v6199_v50 = vpop.permute.xlu0 %3349 }
 0x14d   : > { %v6215_v24 = vpop.permute.xlu1 %3364 }
 0x14f   : > { %4477 = vmatmul.mubr.msk.bf16.gmra.mrb[28].mxu1 %vm447_vm2, %v1609_v30  ;;  %v6222_v36 = vpop.permute.xlu0 %3359 }
 0x150   : > { %4480 = vmatprep.mubr.msk.bf16.mxu1 %vm447_vm2, %v1618_v21 }
 0x151   : > { %4649 = vmatmul.mubr.msk.bf16.gmra.mrb[24].mxu0 %vm447_vm2, %v2941_v58  ;;  %v6232_v0 = vpop.permute.xlu1 %3374 }
 0x152   : > { %4652 = vmatprep.mubr.msk.bf16.mxu0 %vm447_vm2, %v2943_v25 }
 0x157   : > { %4481 = vmatmul.mubr.msk.bf16.gmra.mrb[32].mxu1 %vm447_vm2, %v1627_v33 }
 0x159   : > { %4653 = vmatmul.mubr.msk.bf16.gmra.mrb[28].mxu0 %vm447_vm2, %v2945_v4 }
 0x15a   : > { %4656 = vmatprep.mubr.msk.bf16.mxu0 %vm447_vm2, %v2947_v12  ;;  %v3370_v12 = vpop.permute.xlu0 %3369 }
 0x161   : > { %4657 = vmatmul.mubr.msk.bf16.gmra.mrb[32].mxu0 %vm447_vm2, %v2949_v5 }
 0x1ca   : > { %v4406_v13 = vpop.f32.mrb[0].mxu1 }
 0x1cb   : > { %v1354_v55 = vpop.f32.mrb[1].mxu1 }
 0x1cc   : > { %v4407_v19 = vpop.f32.mrb[2].mxu1 }
 0x1cd   : > { %v1357_v51 = vpop.f32.mrb[3].mxu1 }
 0x1d2   : > { %v4410_v31 = vpop.f32.mrb[4].mxu1 }
 0x1d3   : > { %v1370_v23 = vpop.f32.mrb[5].mxu1 }
 0x1d4   : > { %v4411_v60 = vpop.f32.mrb[6].mxu1 }
 0x1d5   : > { %v1373_v38 = vpop.f32.mrb[7].mxu1 }
 0x1da   : > { %v4414_v43 = vpop.f32.mrb[8].mxu1 }
 0x1db   : > { %v6166_v28 = vpop.f32.mrb[9].mxu1 }
 0x1dc   : > { %v6168_v54 = vpop.f32.mrb[10].mxu1 }
 0x1dd   : > { %v6170_v29 = vpop.f32.mrb[11].mxu1 }
 0x1e2   : > { %v6174_v10 = vpop.f32.mrb[12].mxu1 }
 0x1e3   : > { %v6178_v27 = vpop.f32.mrb[13].mxu1 }
 0x1e4   : > { %v6180_v47 = vpop.f32.mrb[14].mxu1 }
 0x1e5   : > { %v6182_v59 = vpop.f32.mrb[15].mxu1 }
 0x1ea   : > { %v6184_v35 = vpop.f32.mrb[16].mxu1 }
 0x1eb   : > { %v6186_v18 = vpop.f32.mrb[17].mxu1 }
 0x1ec   : > { %v6188_v52 = vpop.f32.mrb[18].mxu1 }
 0x1ed   : > { %v6190_v37 = vpop.f32.mrb[19].mxu1 }
 0x1f4   : > { %v4626_v7 = vpop.f32.mrb[0].mxu0 }
 0x1f5   : > { %v4668_v42 = vadd.f32 %v4626_v7, %v4406_v13  ;;  %v3062_v22 = vpop.f32.mrb[1].mxu0 }
 0x1f6   : > { %v4669_v34 = vadd.f32 %v3062_v22, %v1354_v55  ;;  %v4627_v49 = vpop.f32.mrb[2].mxu0  ;;  %v6252_v55 = vpop.permute.xlu1 %3384 }
 0x1f7   : > { %v6206_v63 = vmul.f32 %v4668_v42, %v3290_v3  ;;  %v4670_v44 = vadd.f32 %v4627_v49, %v4407_v19  ;;  %v3065_v1 = vpop.f32.mrb[3].mxu0 }
 0x1f8   : > { %v6208_v20 = vmul.f32 %v4669_v34, %v3280_v9  ;;  %v4671_v32 = vadd.f32 %v3065_v1, %v1357_v51 }
 0x1f9   : > { %3496 = vst.msk [vmem:[%s6204_s18 + $0x10] sm:$0xff] %vm3493_vm7, %v6206_v63  ;;  %v6213_v56 = vmul.f32 %v4670_v44, %v3295_v45  ;;  %v6255_v45 = vpop.permute.xlu0 %3379 }
 0x1fa   : > { %3494 = vst.msk [vmem:[%s6204_s18] sm:$0xff] %vm3493_vm7, %v6208_v20  ;;  %v6220_v39 = vmul.f32 %v4671_v32, %v3285_v46 }
 0x1fb   : > { %3497 = vst.msk [vmem:[%s6204_s18 + $0x18] sm:$0xff] %vm3493_vm7, %v6213_v56 }
 0x1fc   : > { %3495 = vst.msk [vmem:[%s6204_s18 + $0x8] sm:$0xff] %vm3493_vm7, %v6220_v39  ;;  %v4630_v30 = vpop.f32.mrb[4].mxu0 }
 0x1fd   : > { %v4672_v6 = vadd.f32 %v4630_v30, %v4410_v31  ;;  %v3078_v16 = vpop.f32.mrb[5].mxu0 }
 0x1fe   : > { %v4673_v21 = vadd.f32 %v3078_v16, %v1370_v23  ;;  %v4631_v58 = vpop.f32.mrb[6].mxu0 }
 0x1ff   : > { %v6230_v25 = vmul.f32 %v4672_v6, %v3310_v2  ;;  %v4674_v40 = vadd.f32 %v4631_v58, %v4411_v60  ;;  %v3081_v11 = vpop.f32.mrb[7].mxu0 }
 0x200   : > { %v6234_v33 = vmul.f32 %v4673_v21, %v3300_v57  ;;  %v4675_v4 = vadd.f32 %v3081_v11, %v1373_v38 }
 0x201   : > { %3500 = vst.msk [vmem:[%s6204_s18 + $0x30] sm:$0xff] %vm3493_vm7, %v6230_v25  ;;  %v6239_v26 = vmul.f32 %v4674_v40, %v3315_v17  ;;  %v3390_v17 = vpop.permute.xlu0 %3389 }
 0x202   : > { %3498 = vst.msk [vmem:[%s6204_s18 + $0x20] sm:$0xff] %vm3493_vm7, %v6234_v33  ;;  %v6244_v5 = vmul.f32 %v4675_v4, %v3305_v14 }
 0x203   : > { %3501 = vst.msk [vmem:[%s6204_s18 + $0x38] sm:$0xff] %vm3493_vm7, %v6239_v26 }
 0x204   : > { %3499 = vst.msk [vmem:[%s6204_s18 + $0x28] sm:$0xff] %vm3493_vm7, %v6244_v5  ;;  %v4634_v3 = vpop.f32.mrb[8].mxu0 }
 0x205   : > { %v4676_v13 = vadd.f32 %v4634_v3, %v4414_v43  ;;  %v3094_v9 = vpop.f32.mrb[9].mxu0  ;;  %v3395_v43 = vpop.permute.xlu1 %3394 }
 0x206   : > { %v4677_v19 = vadd.f32 %v3094_v9, %v6166_v28  ;;  %v4635_v51 = vpop.f32.mrb[10].mxu0  ;;  %v3400_v22 = vpop.permute.xlu0 %3399 }
 0x207   : > { %v6257_v46 = vmul.f32 %v4676_v13, %v3330_v53  ;;  %v4678_v31 = vadd.f32 %v4635_v51, %v6168_v54  ;;  %v3097_v23 = vpop.f32.mrb[11].mxu0 }
 0x208   : > { %v6261_v60 = vmul.f32 %v4677_v19, %v6176_v62  ;;  %v4679_v38 = vadd.f32 %v3097_v23, %v6170_v29 }
 0x209   : > { %3504 = vst.msk [vmem:[%s6204_s18 + $0x50] sm:$0xff] %vm3493_vm7, %v6257_v46  ;;  %v6267_v14 = vmul.f32 %v4678_v31, %v3335_v8 }
 0x20a   : > { %3502 = vst.msk [vmem:[%s6204_s18 + $0x40] sm:$0xff] %vm3493_vm7, %v6261_v60  ;;  %v6273_v57 = vmul.f32 %v4679_v38, %v6172_v41  ;;  %v3410_v40 = vpop.permute.xlu0 %3409 }
 0x20b   : > { %3505 = vst.msk [vmem:[%s6204_s18 + $0x58] sm:$0xff] %vm3493_vm7, %v6267_v14 }
 0x20c   : > { %3503 = vst.msk [vmem:[%s6204_s18 + $0x48] sm:$0xff] %vm3493_vm7, %v6273_v57  ;;  %v4638_v28 = vpop.f32.mrb[12].mxu0 }
 0x20d   : > { %v4680_v54 = vadd.f32 %v4638_v28, %v6174_v10  ;;  %v3110_v2 = vpop.f32.mrb[13].mxu0 }
 0x20e   : > { %v4681_v29 = vadd.f32 %v3110_v2, %v6178_v27  ;;  %v4639_v62 = vpop.f32.mrb[14].mxu0  ;;  %v6297_v27 = vpop.permute.xlu1 %3404 }
 0x20f   : > { %v6284_v41 = vmul.f32 %v4680_v54, %v6199_v50  ;;  %v4682_v8 = vadd.f32 %v4639_v62, %v6180_v47  ;;  %v3113_v53 = vpop.f32.mrb[15].mxu0  ;;  %v3420_v54 = vpop.permute.xlu0 %3419 }
 0x210   : > { %v6288_v7 = vmul.f32 %v4681_v29, %v6194_v48  ;;  %v4683_v42 = vadd.f32 %v3113_v53, %v6182_v59 }
 0x211   : > { %3508 = vst.msk [vmem:[%s6204_s18 + $0x70] sm:$0xff] %vm3493_vm7, %v6284_v41  ;;  %v6295_v10 = vmul.f32 %v4682_v8, %v6197_v61 }
 0x212   : > { %3506 = vst.msk [vmem:[%s6204_s18 + $0x60] sm:$0xff] %vm3493_vm7, %v6288_v7  ;;  %v6303_v50 = vmul.f32 %v4683_v42, %v6192_v15  ;;  %v4470_v47 = vpop.f32.mrb[20].mxu1  ;;  %v3415_v58 = vpop.permute.xlu1 %3414 }
 0x213   : > { %3509 = vst.msk [vmem:[%s6204_s18 + $0x78] sm:$0xff] %vm3493_vm7, %v6295_v10  ;;  %v1820_v59 = vpop.f32.mrb[21].mxu1 }
 0x214   : > { %3507 = vst.msk [vmem:[%s6204_s18 + $0x68] sm:$0xff] %vm3493_vm7, %v6303_v50  ;;  %v4642_v48 = vpop.f32.mrb[16].mxu0  ;;  %v4471_v61 = vpop.f32.mrb[22].mxu1 }
 0x215   : > { %v4684_v34 = vadd.f32 %v4642_v48, %v6184_v35  ;;  %v3126_v49 = vpop.f32.mrb[17].mxu0  ;;  %v1823_v44 = vpop.f32.mrb[23].mxu1 }
 0x216   : > { %v4685_v15 = vadd.f32 %v3126_v49, %v6186_v18  ;;  %v4643_v1 = vpop.f32.mrb[18].mxu0  ;;  %v3425_v38 = vpop.permute.xlu1 %3424 }
 0x217   : > { %v6313_v32 = vmul.f32 %v4684_v34, %v3370_v12  ;;  %v4686_v30 = vadd.f32 %v4643_v1, %v6188_v52  ;;  %v3129_v6 = vpop.f32.mrb[19].mxu0  ;;  %v3430_v49 = vpop.permute.xlu0 %3429 }
 0x218   : > { %v6317_v16 = vmul.f32 %v4685_v15, %v6222_v36  ;;  %v4687_v21 = vadd.f32 %v3129_v6, %v6190_v37 }
 0x219   : > { %3512 = vst.msk [vmem:[%s6204_s18 + $0x90] sm:$0xff] %vm3493_vm7, %v6313_v32  ;;  %v6324_v35 = vmul.f32 %v4686_v30, %v6232_v0 }
 0x21a   : > { %3510 = vst.msk [vmem:[%s6204_s18 + $0x80] sm:$0xff] %vm3493_vm7, %v6317_v16  ;;  %v6330_v18 = vmul.f32 %v4687_v21, %v6215_v24  ;;  %v4474_v52 = vpop.f32.mrb[24].mxu1  ;;  %v3435_v1 = vpop.permute.xlu1 %3434 }
 0x21b   : > { %3513 = vst.msk [vmem:[%s6204_s18 + $0x98] sm:$0xff] %vm3493_vm7, %v6324_v35  ;;  %v1836_v37 = vpop.f32.mrb[25].mxu1 }
 0x21c   : > { %3511 = vst.msk [vmem:[%s6204_s18 + $0x88] sm:$0xff] %vm3493_vm7, %v6330_v18  ;;  %v4646_v36 = vpop.f32.mrb[20].mxu0  ;;  %v4475_v11 = vpop.f32.mrb[26].mxu1 }
 0x21d   : > { %v4688_v0 = vadd.f32 %v4646_v36, %v4470_v47  ;;  %v3142_v4 = vpop.f32.mrb[21].mxu0  ;;  %v1839_v12 = vpop.f32.mrb[27].mxu1 }
 0x21e   : > { %v4689_v3 = vadd.f32 %v3142_v4, %v1820_v59  ;;  %v4647_v24 = vpop.f32.mrb[22].mxu0 }
 0x21f   : > { %v6338_v13 = vmul.f32 %v4688_v0, %v3390_v17  ;;  %v4690_v9 = vadd.f32 %v4647_v24, %v4471_v61  ;;  %v3145_v19 = vpop.f32.mrb[23].mxu0  ;;  %v3440_v0 = vpop.permute.xlu0 %3439 }
 0x220   : > { %v6341_v51 = vmul.f32 %v4689_v3, %v6255_v45  ;;  %v4691_v31 = vadd.f32 %v3145_v19, %v1823_v44  ;;  %v3445_v24 = vpop.permute.xlu1 %3444 }
 0x221   : > { %3516 = vst.msk [vmem:[%s6204_s18 + $0xb0] sm:$0xff] %vm3493_vm7, %v6338_v13  ;;  %v6346_v23 = vmul.f32 %v4690_v9, %v3395_v43 }
 0x222   : > { %3514 = vst.msk [vmem:[%s6204_s18 + $0xa0] sm:$0xff] %vm3493_vm7, %v6341_v51  ;;  %v6352_v28 = vmul.f32 %v4691_v31, %v6252_v55  ;;  %v4478_v17 = vpop.f32.mrb[28].mxu1 }
 0x223   : > { %3517 = vst.msk [vmem:[%s6204_s18 + $0xb8] sm:$0xff] %vm3493_vm7, %v6346_v23  ;;  %v1852_v45 = vpop.f32.mrb[29].mxu1 }
 0x224   : > { %3515 = vst.msk [vmem:[%s6204_s18 + $0xa8] sm:$0xff] %vm3493_vm7, %v6352_v28  ;;  %v4650_v43 = vpop.f32.mrb[24].mxu0  ;;  %v4479_v2 = vpop.f32.mrb[30].mxu1 }
 0x225   : > { %v4692_v29 = vadd.f32 %v4650_v43, %v4474_v52  ;;  %v3158_v62 = vpop.f32.mrb[25].mxu0  ;;  %v1855_v8 = vpop.f32.mrb[31].mxu1 }
 0x226   : > { %v4693_v53 = vadd.f32 %v3158_v62, %v1836_v37  ;;  %v4651_v55 = vpop.f32.mrb[26].mxu0  ;;  %v3455_v62 = vpop.permute.xlu1 %3454 }
 0x227   : > { %v6360_v42 = vmul.f32 %v4692_v29, %v3410_v40  ;;  %v4694_v47 = vadd.f32 %v4651_v55, %v4475_v11  ;;  %v3161_v59 = vpop.f32.mrb[27].mxu0 }
 0x228   : > { %v6362_v48 = vmul.f32 %v4693_v53, %v3400_v22  ;;  %v4695_v61 = vadd.f32 %v3161_v59, %v1839_v12  ;;  %v5019_v59 = vmov (!%p4063_p4), 0.0  }
 0x229   : > { %3520 = vst.msk [vmem:[%s6204_s18 + $0xd0] sm:$0xff] %vm3493_vm7, %v6360_v42  ;;  %v6367_v34 = vmul.f32 %v4694_v47, %v3415_v58 }
 0x22a   : > { %3518 = vst.msk [vmem:[%s6204_s18 + $0xc0] sm:$0xff] %vm3493_vm7, %v6362_v48  ;;  %v6373_v44 = vmul.f32 %v4695_v61, %v6297_v27  ;;  %v4482_v15 = vpop.f32.mrb[32].mxu1 }
 0x22b   : > { %3521 = vst.msk [vmem:[%s6204_s18 + $0xd8] sm:$0xff] %vm3493_vm7, %v6367_v34  ;;  %v1868_v22 = vpop.f32.mrb[33].mxu1 }
 0x22c   : > { %3519 = vst.msk [vmem:[%s6204_s18 + $0xc8] sm:$0xff] %vm3493_vm7, %v6373_v44  ;;  %v4654_v30 = vpop.f32.mrb[28].mxu0  ;;  %v4483_v6 = vpop.f32.mrb[34].mxu1 }
 0x22d   : > { %v4696_v21 = vadd.f32 %v4654_v30, %v4478_v17  ;;  %v3174_v58 = vpop.f32.mrb[29].mxu0  ;;  %v1871_v52 = vpop.f32.mrb[35].mxu1  ;;  %3535 = vst.msk [vmem:[%s6626_s4] sm:$0x3] (!%p4063_p4), %vm3534_vm8, %v5019_v59 }
 0x22e   : > { %v4697_v27 = vadd.f32 %v3174_v58, %v1852_v45  ;;  %v4655_v40 = vpop.f32.mrb[30].mxu0 }
 0x22f   : > { %v6381_v37 = vmul.f32 %v4696_v21, %v3430_v49  ;;  %v4698_v36 = vadd.f32 %v4655_v40, %v4479_v2  ;;  %v3177_v11 = vpop.f32.mrb[31].mxu0 }
 0x230   : > { %v6383_v4 = vmul.f32 %v4697_v27, %v3420_v54  ;;  %v4699_v12 = vadd.f32 %v3177_v11, %v1855_v8  ;;  %v3450_v54 = vpop.permute.xlu0 %3449 }
 0x231   : > { %3524 = vst.msk [vmem:[%s6204_s18 + $0xf0] sm:$0xff] %vm3493_vm7, %v6381_v37  ;;  %v6388_v3 = vmul.f32 %v4698_v36, %v3435_v1 }
 0x232   : > { %3522 = vst.msk [vmem:[%s6204_s18 + $0xe0] sm:$0xff] %vm3493_vm7, %v6383_v4  ;;  %v6393_v9 = vmul.f32 %v4699_v12, %v3425_v38 }
 0x233   : > { %3525 = vst.msk [vmem:[%s6204_s18 + $0xf8] sm:$0xff] %vm3493_vm7, %v6388_v3 }
 0x234   : > { %3523 = vst.msk [vmem:[%s6204_s18 + $0xe8] sm:$0xff] %vm3493_vm7, %v6393_v9  ;;  %v4658_v19 = vpop.f32.mrb[32].mxu0 }
 0x235   : > { %v4700_v31 = vadd.f32 %v4658_v19, %v4482_v15  ;;  %v3190_v17 = vpop.f32.mrb[33].mxu0 }
 0x236   : > { %v4701_v45 = vadd.f32 %v3190_v17, %v1868_v22  ;;  %v4659_v43 = vpop.f32.mrb[34].mxu0  ;;  %3533 = sbr.rel (%p4063_p4) target bundleno = 573 (0x23d), region = 36 }
 0x237   : > { %v6401_v2 = vmul.f32 %v4700_v31, %v3450_v54  ;;  %v4702_v29 = vadd.f32 %v4659_v43, %v4483_v6  ;;  %v3193_v38 = vpop.f32.mrb[35].mxu0 }
 0x238   : > { %v6403_v8 = vmul.f32 %v4701_v45, %v3440_v0  ;;  %v4703_v53 = vadd.f32 %v3193_v38, %v1871_v52 }
 0x239   : > { %3528 = vst.msk [vmem:[%s6204_s18 + $0x110] sm:$0xff] %vm3493_vm7, %v6401_v2  ;;  %v6408_v55 = vmul.f32 %v4702_v29, %v3455_v62 }
 0x23a   : > { %3526 = vst.msk [vmem:[%s6204_s18 + $0x100] sm:$0xff] %vm3493_vm7, %v6403_v8  ;;  %v6413_v47 = vmul.f32 %v4703_v53, %v3445_v24 }
 0x23b   : > { %3529 = vst.msk [vmem:[%s6204_s18 + $0x118] sm:$0xff] %vm3493_vm7, %v6408_v55 }
 0x23c   : > { %3527 = vst.msk [vmem:[%s6204_s18 + $0x108] sm:$0xff] %vm3493_vm7, %v6413_v47 }
 0x23d PF: > { %v3537_v61 = vsel %vm3493_vm7, %v6208_v20, 0.0  ;;  %v3538_v49 = vsel %vm3493_vm7, %v6220_v39, 0.0  ;;  %v3540_v15 = vsel %vm3493_vm7, %v6206_v63, 0.0  ;;  %v3542_v22 = vsel %vm3493_vm7, %v6213_v56, 0.0 }
 0x23e   : > { %v3539_v1 = vadd.f32 %v3538_v49, %v3537_v61  ;;  %v3544_v6 = vsel %vm3493_vm7, %v6234_v33, 0.0  ;;  %v3546_v58 = vsel %vm3493_vm7, %v6244_v5, 0.0  ;;  %v3548_v27 = vsel %vm3493_vm7, %v6230_v25, 0.0 }
 0x23f   : > { %v3550_v36 = vsel %vm3493_vm7, %v6239_v26, 0.0  ;;  %v3552_v0 = vsel %vm3493_vm7, %v6261_v60, 0.0  ;;  %v3554_v24 = vsel %vm3493_vm7, %v6273_v57, 0.0  ;;  %v3556_v31 = vsel %vm3493_vm7, %v6257_v46, 0.0 }
 0x240   : > { %v3541_v30 = vadd.f32 %v3540_v15, %v3539_v1  ;;  %v3618_v17 = vmul.f32 %v6208_v20, %v6208_v20  ;;  %v3619_v45 = vmul.f32 %v6220_v39, %v6220_v39  ;;  %v3620_v43 = vmul.f32 %v6206_v63, %v6206_v63 }
 0x241   : > { %v3558_v29 = vsel %vm3493_vm7, %v6267_v14, 0.0  ;;  %v3621_v62 = vmul.f32 %v6213_v56, %v6213_v56  ;;  %v3560_v53 = vsel %vm3493_vm7, %v6288_v7, 0.0  ;;  %v3622_v61 = vmul.f32 %v6234_v33, %v6234_v33 }
 0x242   : > { %v3543_v21 = vadd.f32 %v3542_v22, %v3541_v30  ;;  %v3654_v59 = vsel %vm3493_vm7, %v3618_v17, 0.0  ;;  %v3655_v39 = vsel %vm3493_vm7, %v3619_v45, 0.0  ;;  %v3657_v63 = vsel %vm3493_vm7, %v3620_v43, 0.0 }
 0x243   : > { %v3562_v49 = vsel %vm3493_vm7, %v6303_v50, 0.0  ;;  %v3656_v15 = vadd.f32 %v3655_v39, %v3654_v59  ;;  %v3623_v56 = vmul.f32 %v6244_v5, %v6244_v5  ;;  %v3659_v22 = vsel %vm3493_vm7, %v3621_v62, 0.0 }
 0x244   : > { %v3545_v52 = vadd.f32 %v3544_v6, %v3543_v21  ;;  %v3564_v30 = vsel %vm3493_vm7, %v6284_v41, 0.0  ;;  %v3624_v33 = vmul.f32 %v6230_v25, %v6230_v25  ;;  %v3625_v5 = vmul.f32 %v6239_v26, %v6239_v26 }
 0x245   : > { %v3658_v6 = vadd.f32 %v3657_v63, %v3656_v15  ;;  %v3626_v25 = vmul.f32 %v6261_v60, %v6261_v60  ;;  %v3627_v26 = vmul.f32 %v6273_v57, %v6273_v57  ;;  %v3572_v45 = vsel %vm3493_vm7, %v6313_v32, 0.0 }
 0x246   : > { %v3547_v40 = vadd.f32 %v3546_v58, %v3545_v52  ;;  %v3661_v58 = vsel %vm3493_vm7, %v3622_v61, 0.0  ;;  %v3566_v52 = vsel %vm3493_vm7, %v6295_v10, 0.0  ;;  %v3628_v60 = vmul.f32 %v6257_v46, %v6257_v46 }
 0x247   : > { %v3574_v62 = vsel %vm3493_vm7, %v6324_v35, 0.0  ;;  %v3629_v57 = vmul.f32 %v6267_v14, %v6267_v14  ;;  %v3576_v61 = vsel %vm3493_vm7, %v6341_v51, 0.0  ;;  %v3630_v46 = vmul.f32 %v6288_v7, %v6288_v7 }
 0x248   : > { %v3549_v11 = vadd.f32 %v3548_v27, %v3547_v40  ;;  %v3660_v27 = vadd.f32 %v3659_v22, %v3658_v6  ;;  %v3578_v15 = vsel %vm3493_vm7, %v6352_v28, 0.0  ;;  %v3631_v14 = vmul.f32 %v6303_v50, %v6303_v50 }
 0x249   : > { %v3675_v22 = vsel %vm3493_vm7, %v3629_v57, 0.0  ;;  %v3632_v7 = vmul.f32 %v6284_v41, %v6284_v41  ;;  %v3633_v50 = vmul.f32 %v6295_v10, %v6295_v10  ;;  %v3634_v41 = vmul.f32 %v6317_v16, %v6317_v16 }
 0x24a   : > { %v3551_v12 = vadd.f32 %v3550_v36, %v3549_v11  ;;  %v3663_v36 = vsel %vm3493_vm7, %v3623_v56, 0.0  ;;  %v3568_v11 = vsel %vm3493_vm7, %v6317_v16, 0.0  ;;  %v3635_v10 = vmul.f32 %v6330_v18, %v6330_v18 }
 0x24b   : > { %v3636_v16 = vmul.f32 %v6313_v32, %v6313_v32  ;;  %v3638_v32 = vmul.f32 %v6341_v51, %v6341_v51  ;;  %v3594_v57 = vsel %vm3493_vm7, %v6393_v9, 0.0  ;;  %v3640_v51 = vmul.f32 %v6338_v13, %v6338_v13 }
 0x24c   : > { %v3553_v19 = vadd.f32 %v3552_v0, %v3551_v12  ;;  %v3662_v0 = vadd.f32 %v3661_v58, %v3660_v27  ;;  %v3582_v58 = vsel %vm3493_vm7, %v6346_v23, 0.0  ;;  %vm3615_vm9 = vcmask 253952  }
 0x24e   : > { %v3555_v54 = vadd.f32 %v3554_v24, %v3553_v19  ;;  %v3665_v24 = vsel %vm3493_vm7, %v3624_v33, 0.0  ;;  %v3570_v19 = vsel %vm3493_vm7, %v6330_v18, 0.0  ;;  %v3677_v33 = vsel %vm3493_vm7, %v3630_v46, 0.0 }
 0x24f   : > { %v3637_v18 = vmul.f32 %v6324_v35, %v6324_v35  ;;  %v3639_v35 = vmul.f32 %v6352_v28, %v6352_v28  ;;  %v3641_v28 = vmul.f32 %v6346_v23, %v6346_v23  ;;  %v3643_v23 = vmul.f32 %v6373_v44, %v6373_v44 }
 0x250   : > { %v3557_v38 = vadd.f32 %v3556_v31, %v3555_v54  ;;  %v3664_v31 = vadd.f32 %v3663_v36, %v3662_v0  ;;  %v3667_v54 = vsel %vm3493_vm7, %v3625_v5, 0.0  ;;  %v3584_v5 = vsel %vm3493_vm7, %v6362_v48, 0.0 }
 0x251   : > { %v3681_v0 = vsel %vm3493_vm7, %v3632_v7, 0.0  ;;  %v3697_v7 = vsel %vm3493_vm7, %v3640_v51, 0.0 }
 0x252   : > { %v3559_v20 = vadd.f32 %v3558_v29, %v3557_v38  ;;  %v3666_v43 = vadd.f32 %v3665_v24, %v3664_v31  ;;  %v3669_v38 = vsel %vm3493_vm7, %v3626_v25, 0.0  ;;  %v3588_v31 = vsel %vm3493_vm7, %v6360_v42, 0.0 }
 0x254   : > { %v3561_v1 = vadd.f32 %v3560_v53, %v3559_v20  ;;  %v3668_v53 = vadd.f32 %v3667_v54, %v3666_v43  ;;  %v3671_v20 = vsel %vm3493_vm7, %v3627_v26, 0.0  ;;  %v3685_v54 = vsel %vm3493_vm7, %v3634_v41, 0.0 }
 0x256   : > { %v3563_v21 = vadd.f32 %v3562_v49, %v3561_v1  ;;  %v3670_v39 = vadd.f32 %v3669_v38, %v3668_v53  ;;  %v3673_v49 = vsel %vm3493_vm7, %v3628_v60, 0.0  ;;  %v3687_v60 = vsel %vm3493_vm7, %v3635_v10, 0.0 }
 0x257   : > { %v3592_v38 = vsel %vm3493_vm7, %v6383_v4, 0.0  ;;  %v3646_v10 = vmul.f32 %v6383_v4, %v6383_v4  ;;  %v3649_v4 = vmul.f32 %v6388_v3, %v6388_v3 }
 0x258   : > { %v3565_v40 = vadd.f32 %v3564_v30, %v3563_v21  ;;  %v3672_v1 = vadd.f32 %v3671_v20, %v3670_v39  ;;  %v3580_v30 = vsel %vm3493_vm7, %v6338_v13, 0.0  ;;  %v3691_v39 = vsel %vm3493_vm7, %v3637_v18, 0.0 }
 0x259   : > { %v3642_v13 = vmul.f32 %v6362_v48, %v6362_v48  ;;  %v3644_v48 = vmul.f32 %v6360_v42, %v6360_v42 }
 0x25a   : > { %v3567_v12 = vadd.f32 %v3566_v52, %v3565_v40  ;;  %v3674_v6 = vadd.f32 %v3673_v49, %v3672_v1  ;;  %v3679_v40 = vsel %vm3493_vm7, %v3631_v14, 0.0  ;;  %v3598_v1 = vsel %vm3493_vm7, %v6388_v3, 0.0  ;;  %v3536_v3 = vld [vmem:[%s6626_s4] sm:$0x1] }
 0x25c   : > { %v3569_v17 = vadd.f32 %v3568_v11, %v3567_v12  ;;  %v3676_v52 = vadd.f32 %v3675_v22, %v3674_v6  ;;  %v3586_v12 = vsel %vm3493_vm7, %v6373_v44, 0.0  ;;  %v3695_v22 = vsel %vm3493_vm7, %v3639_v35, 0.0 }
 0x25d   : > { %v3645_v44 = vmul.f32 %v6367_v34, %v6367_v34 }
 0x25e   : > { %v3571_v29 = vadd.f32 %v3570_v19, %v3569_v17  ;;  %v3678_v36 = vadd.f32 %v3677_v33, %v3676_v52  ;;  %v3683_v19 = vsel %vm3493_vm7, %v3633_v50, 0.0  ;;  %v3602_v33 = vsel %vm3493_vm7, %v6413_v47, 0.0 }
 0x25f   : > { %v3604_v50 = vsel %vm3493_vm7, %v6401_v2, 0.0 }
 0x260   : > { %v3573_v59 = vadd.f32 %v3572_v45, %v3571_v29  ;;  %v3680_v25 = vadd.f32 %v3679_v40, %v3678_v36  ;;  %v3590_v45 = vsel %vm3493_vm7, %v6367_v34, 0.0  ;;  %v3701_v36 = vsel %vm3493_vm7, %v3642_v13, 0.0 }
 0x261   : > { %v3648_v34 = vmul.f32 %v6381_v37, %v6381_v37 }
 0x262   : > { %v3575_v63 = vadd.f32 %v3574_v62, %v3573_v59  ;;  %v3682_v17 = vadd.f32 %v3681_v0, %v3680_v25  ;;  %v3689_v59 = vsel %vm3493_vm7, %v3636_v16, 0.0 }
 0x264   : > { %v3577_v56 = vadd.f32 %v3576_v61, %v3575_v63  ;;  %v3684_v43 = vadd.f32 %v3683_v19, %v3682_v17  ;;  %v3596_v63 = vsel %vm3493_vm7, %v6381_v37, 0.0  ;;  %v3705_v19 = vsel %vm3493_vm7, %v3644_v48, 0.0 }
 0x265   : > { %v3647_v17 = vmul.f32 %v6393_v9, %v6393_v9  ;;  %v3650_v9 = vmul.f32 %v6403_v8, %v6403_v8  ;;  %v3651_v37 = vmul.f32 %v6413_v47, %v6413_v47 }
 0x266   : > { %v3579_v21 = vadd.f32 %v3578_v15, %v3577_v56  ;;  %v3686_v62 = vadd.f32 %v3685_v54, %v3684_v43  ;;  %v3693_v15 = vsel %vm3493_vm7, %v3638_v32, 0.0 }
 0x267   : > { %v3711_v18 = vsel %vm3493_vm7, %v3647_v17, 0.0  ;;  %v3719_v47 = vsel %vm3493_vm7, %v3651_v37, 0.0 }
 0x268   : > { %v3581_v27 = vadd.f32 %v3580_v30, %v3579_v21  ;;  %v3688_v20 = vadd.f32 %v3687_v60, %v3686_v62  ;;  %v3600_v30 = vsel %vm3493_vm7, %v6403_v8, 0.0  ;;  %v3713_v62 = vsel %vm3493_vm7, %v3648_v34, 0.0 }
 0x269   : > { %v3717_v8 = vsel %vm3493_vm7, %v3650_v9, 0.0 }
 0x26a   : > { %v3583_v11 = vadd.f32 %v3582_v58, %v3581_v27  ;;  %v3690_v46 = vadd.f32 %v3689_v59, %v3688_v20  ;;  %v3699_v27 = vsel %vm3493_vm7, %v3641_v28, 0.0  ;;  %v3715_v59 = vsel %vm3493_vm7, %v3649_v4, 0.0 }
 0x26c   : > { %v3585_v24 = vadd.f32 %v3584_v5, %v3583_v11  ;;  %v3692_v56 = vadd.f32 %v3691_v39, %v3690_v46  ;;  %v3606_v11 = vsel %vm3493_vm7, %v6408_v55, 0.0 }
 0x26e   : > { %v3587_v26 = vadd.f32 %v3586_v12, %v3585_v24  ;;  %v3694_v6 = vadd.f32 %v3693_v15, %v3692_v56  ;;  %v3703_v12 = vsel %vm3493_vm7, %v3643_v23, 0.0 }
 0x270   : > { %v3589_v29 = vadd.f32 %v3588_v31, %v3587_v26  ;;  %v3696_v58 = vadd.f32 %v3695_v22, %v3694_v6  ;;  %v3707_v26 = vsel %vm3493_vm7, %v3645_v44, 0.0 }
 0x272   : > { %v3591_v53 = vadd.f32 %v3590_v45, %v3589_v29  ;;  %v3698_v40 = vadd.f32 %v3697_v7, %v3696_v58  ;;  %v3709_v45 = vsel %vm3493_vm7, %v3646_v10, 0.0 }
 0x274   : > { %v3593_v61 = vadd.f32 %v3592_v38, %v3591_v53  ;;  %v3700_v41 = vadd.f32 %v3699_v27, %v3698_v40 }
 0x276   : > { %v3595_v49 = vadd.f32 %v3594_v57, %v3593_v61  ;;  %v3702_v25 = vadd.f32 %v3701_v36, %v3700_v41  ;;  %v3652_v61 = vmul.f32 %v6401_v2, %v6401_v2 }
 0x278   : > { %v3597_v14 = vadd.f32 %v3596_v63, %v3595_v49  ;;  %v3704_v42 = vadd.f32 %v3703_v12, %v3702_v25  ;;  %v3653_v63 = vmul.f32 %v6408_v55, %v6408_v55  ;;  %v3721_v49 = vsel %vm3493_vm7, %v3652_v61, 0.0 }
 0x27a   : > { %v3599_v21 = vadd.f32 %v3598_v1, %v3597_v14  ;;  %v3706_v16 = vadd.f32 %v3705_v19, %v3704_v42  ;;  %v3723_v2 = vsel %vm3493_vm7, %v3653_v63, 0.0 }
 0x27c   : > { %v3601_v52 = vadd.f32 %v3600_v30, %v3599_v21  ;;  %v3708_v43 = vadd.f32 %v3707_v26, %v3706_v16  ;;  %v3617_v30 = vld [vmem:[%s6626_s4 + $0x1] sm:$0x1] }
 0x27e   : > { %v3603_v5 = vadd.f32 %v3602_v33, %v3601_v52  ;;  %v3710_v60 = vadd.f32 %v3709_v45, %v3708_v43 }
 0x280   : > { %v3605_v0 = vadd.f32 %v3604_v50, %v3603_v5  ;;  %v3712_v53 = vadd.f32 %v3711_v18, %v3710_v60 }
 0x282   : > { %v3607_v24 = vadd.f32 %v3606_v11, %v3605_v0  ;;  %v3714_v57 = vadd.f32 %v3713_v62, %v3712_v53 }
 0x284   : > { %v3608_v31 = vrot.slane %v3607_v24, 4  ;;  %v3716_v35 = vadd.f32 %v3715_v59, %v3714_v57 }
 0x286   : > { %v3609_v54 = vadd.f32 %v3608_v31, %v3607_v24  ;;  %v3718_v46 = vadd.f32 %v3717_v8, %v3716_v35 }
 0x288   : > { %v3610_v29 = vrot.slane %v3609_v54, 2  ;;  %v3720_v51 = vadd.f32 %v3719_v47, %v3718_v46 }
 0x28a   : > { %v3611_v38 = vadd.f32 %v3610_v29, %v3609_v54  ;;  %v3722_v15 = vadd.f32 %v3721_v49, %v3720_v51 }
 0x28c   : > { %v3612_v32 = vrot.slane %v3611_v38, 1  ;;  %v3724_v1 = vadd.f32 %v3723_v2, %v3722_v15 }
 0x28e   : > { %v3613_v20 = vadd.f32 %v3612_v32, %v3611_v38  ;;  %v3725_v56 = vrot.slane %v3724_v1, 4 }
 0x290   : > { %v3614_v39 = vadd.f32 %v3613_v20, %v3536_v3  ;;  %v3726_v14 = vadd.f32 %v3725_v56, %v3724_v1 }
 0x292   : > { %3616 = vst.msk [vmem:[%s6626_s4] sm:$0x1] %vm3615_vm9, %v3614_v39  ;;  %v3727_v28 = vrot.slane %v3726_v14, 2 }
 0x294   : > { %v3728_v22 = vadd.f32 %v3727_v28, %v3726_v14 }
 0x296   : > { %v3729_v55 = vrot.slane %v3728_v22, 1 }
 0x298   : > { %v3730_v6 = vadd.f32 %v3729_v55, %v3728_v22 }
 0x29a   : > { %v3731_v21 = vadd.f32 %v3730_v6, %v3617_v30 }
 0x29c   : > { %3732 = vst.msk [vmem:[%s6626_s4 + $0x1] sm:$0x1] %vm3615_vm9, %v3731_v21 }
 0x29d PF: > { %s15_s15 = sadd.s32 1, %s5016_s15  }
 0x29e   : > { %p12_p5 = scmp.ge.s32.totalorder %s15_s15, 4  }
 0x2a0   :  { %14 = sbr.rel (!%p12_p5) target bundleno = 1 (0x1), region = 82 }

// kernel: tile.43
= control target key start
LH: loop header
LB: loop body
LE: loop exit
PB: predicated region body
PF: predicated region fallthrough
CT: control target
= control target key end

     0   :  { %s10_s10 = smov 3  ;;  %vm12_vm0 = vcmask 523264   ;;  %s29_s11 = smov 64   ;;  %vm19_vm1 = vcmask 1048064   ;;  %s49_s0 = inlined_call_operand.vmem [shape: f32[2,2,64], index: 0, kind: input, shape index: {}]   ;;  %s50_s1 = inlined_call_operand.vmem [shape: f32[2,128], index: 1, kind: output, shape index: {}]  }
   0x1   :  { %v27_v0 = vld [vmem:[%s49_s0 + $0x2] sm:$0x3]  ;;  %v8_v1 = vld [vmem:[%s49_s0] sm:$0x3]  ;;  %s15_s0 = smov 3 }
   0x2   :  { %7 = vst [vmem:[#allocation1 + $0x8] sm:$0x3] %v27_v0  ;;  %9 = vst [vmem:[#allocation1] sm:$0x3] %v8_v1 }
   0x9   :  { %v16_v2 = vld [vmem:[#allocation1 + $0x1] ss:$8 sm:%s15_s0]   ;;  %v11_v3 = vld [vmem:[#allocation1] ss:$8 sm:%s10_s10]  }
   0xa   :  { %17 = vrot.lane.b32.xlu0 %v16_v2, %s29_s11  ;;  %13 = vst.msk [vmem:[#allocation0] sm:$0x3] %vm12_vm0, %v11_v3  }
  0x7c   :  { %v18_v4 = vpop.permute.xlu0 %17  }
  0x7d   :  { %20 = vst.msk [vmem:[#allocation0] sm:$0x3] %vm19_vm1, %v18_v4  }
  0x84   :  { %v24_v5 = vld [vmem:[#allocation0] sm:$0x3] }
  0x85   :  { %26 = vst [vmem:[%s50_s1] sm:$0x3] %v24_v5 }

// kernel: skip_connection_forward.7
= control target key start
LH: loop header
LB: loop body
LE: loop exit
PB: predicated region body
PF: predicated region fallthrough
CT: control target
= control target key end

     0   :  { %v62_v0 = vlaneseq  ;;  %s917_s1 = inlined_call_operand.vmem [shape: f32[2,128], index: 1, kind: input, shape index: {}]   ;;  %s918_s0 = inlined_call_operand.vmem [shape: f32[256,128], index: 0, kind: input, shape index: {}]   ;;  %s919_s2 = inlined_call_operand.vmem [shape: f32[1,128], index: 2, kind: input, shape index: {}]   ;;  %s920_s3 = inlined_call_operand.vmem [shape: f32[1,128], index: 3, kind: input, shape index: {}]   ;;  %s921_s4 = inlined_call_operand.vmem [shape: f32[256,128], index: 4, kind: input, shape index: {}]   ;;  %s922_s5 = inlined_call_operand.vmem [shape: f32[256,128], index: 5, kind: output, shape index: {}]  }
   0x1   :  { %v20_v1 = vld [vmem:[%s917_s1] sm:$0x1]  ;;  %v22_v2 = vld [vmem:[%s917_s1 + $0x1] sm:$0x1]  ;;  %v361_v12 = vld [vmem:[%s918_s0 + $0x8] sm:$0xff] }
   0x2   :  { %v21_v3 = vmul.f32 0.001953125, %v20_v1  ;;  %v23_v4 = vmul.f32 0.001953125, %v22_v2  ;;  %v346_v6 = vshrl.u32 %v62_v0, 7  ;;  %v352_v10 = vld [vmem:[%s918_s0] sm:$0xff]  ;;  %v366_v13 = vld [vmem:[%s918_s0 + $0x10] sm:$0xff]  ;;  %v371_v14 = vld [vmem:[%s918_s0 + $0x18] sm:$0xff] }
   0x3   :  { %v376_v15 = vld [vmem:[%s918_s0 + $0x20] sm:$0xff]  ;;  %v381_v16 = vld [vmem:[%s918_s0 + $0x28] sm:$0xff]  ;;  %v386_v17 = vld [vmem:[%s918_s0 + $0x30] sm:$0xff] }
   0x4   :  { %v24_v5 = vmul.f32 %v21_v3, %v21_v3  ;;  %v64_v9 = vsub.s32 0, %v346_v6  ;;  %v391_v18 = vld [vmem:[%s918_s0 + $0x38] sm:$0xff]  ;;  %v396_v19 = vld [vmem:[%s918_s0 + $0x40] sm:$0xff]  ;;  %v401_v20 = vld [vmem:[%s918_s0 + $0x48] sm:$0xff] }
   0x5   :  { %v406_v21 = vld [vmem:[%s918_s0 + $0x50] sm:$0xff]  ;;  %v411_v22 = vld [vmem:[%s918_s0 + $0x58] sm:$0xff]  ;;  %v416_v23 = vld [vmem:[%s918_s0 + $0x60] sm:$0xff] }
   0x6   :  { %v25_v7 = vsub.f32 %v23_v4, %v24_v5  ;;  %v356_v11 = vrot.slane %v21_v3, %v64_v9  ;;  %v26_v24 = vld [vmem:[%s919_s2] sm:$0x1]  ;;  %v428_v27 = vld [vmem:[%s918_s0 + $0x68] sm:$0xff]  ;;  %v433_v28 = vld [vmem:[%s918_s0 + $0x70] sm:$0xff] }
   0x7   :  { %v438_v29 = vld [vmem:[%s918_s0 + $0x78] sm:$0xff]  ;;  %v451_v34 = vld [vmem:[%s918_s0 + $0x80] sm:$0xff]  ;;  %v456_v35 = vld [vmem:[%s918_s0 + $0x88] sm:$0xff] }
   0x8   :  { %v27_v8 = vadd.f32 1e-05, %v25_v7  ;;  %v66_v25 = vsub.f32 %v352_v10, %v356_v11  ;;  %v67_v26 = vsub.f32 %v361_v12, %v356_v11  ;;  %v68_v30 = vsub.f32 %v366_v13, %v356_v11  ;;  %v461_v36 = vld [vmem:[%s918_s0 + $0x90] sm:$0xff]  ;;  %v474_v41 = vld [vmem:[%s918_s0 + $0x98] sm:$0xff]  ;;  %v479_v42 = vld [vmem:[%s918_s0 + $0xa0] sm:$0xff] }
   0x9   :  { %v69_v31 = vsub.f32 %v371_v14, %v356_v11  ;;  %v70_v32 = vsub.f32 %v376_v15, %v356_v11  ;;  %v71_v33 = vsub.f32 %v381_v16, %v356_v11  ;;  %v72_v37 = vsub.f32 %v386_v17, %v356_v11  ;;  %v484_v43 = vld [vmem:[%s918_s0 + $0xa8] sm:$0xff]  ;;  %v497_v48 = vld [vmem:[%s918_s0 + $0xb0] sm:$0xff]  ;;  %v502_v49 = vld [vmem:[%s918_s0 + $0xb8] sm:$0xff] }
   0xa   :  { %308 = vrsqrt.f32 %v27_v8  ;;  %v73_v38 = vsub.f32 %v391_v18, %v356_v11  ;;  %v74_v39 = vsub.f32 %v396_v19, %v356_v11  ;;  %v75_v40 = vsub.f32 %v401_v20, %v356_v11  ;;  %v507_v50 = vld [vmem:[%s918_s0 + $0xc0] sm:$0xff]  ;;  %v520_v56 = vld [vmem:[%s918_s0 + $0xc8] sm:$0xff]  ;;  %v525_v57 = vld [vmem:[%s918_s0 + $0xd0] sm:$0xff] }
   0xb   :  { %v76_v44 = vsub.f32 %v406_v21, %v356_v11  ;;  %v530_v58 = vld [vmem:[%s918_s0 + $0xd8] sm:$0xff]  ;;  %v541_v63 = vld [vmem:[%s918_s0 + $0xe0] sm:$0xff]  ;;  %v554_v4 = vld [vmem:[%s918_s0 + $0xe8] sm:$0xff] }
   0xc   :  { %v559_v5 = vld [vmem:[%s918_s0 + $0xf0] sm:$0xff]  ;;  %v574_v13 = vld [vmem:[%s918_s0 + $0xf8] sm:$0xff]  ;;  %v579_v6 = vld [vmem:[%s920_s3] ss:$0 sm:$0xff] }
   0xd   :  { %v175_v18 = vld [vmem:[%s921_s4] sm:$0xff]  ;;  %v177_v16 = vld [vmem:[%s921_s4 + $0x10] sm:$0xff]  ;;  %v186_v21 = vld [vmem:[%s921_s4 + $0x58] sm:$0xff] }
   0xe   :  { %v185_v20 = vld [vmem:[%s921_s4 + $0x50] sm:$0xff] }
  0x14   :  { %v309_v51 = vpop.eup %308 }
  0x15   :  { %v29_v59 = vmul.f32 %v309_v51, %v26_v24  ;;  %v176_v51 = vld [vmem:[%s921_s4 + $0x8] sm:$0xff] }
  0x17   :  { %v563_v7 = vrot.slane %v29_v59, %v64_v9 }
  0x19   :  { %v104_v17 = vmul.f32 %v563_v7, %v66_v25  ;;  %v105_v24 = vmul.f32 %v563_v7, %v67_v26  ;;  %v106_v59 = vmul.f32 %v563_v7, %v68_v30  ;;  %v107_v14 = vmul.f32 %v563_v7, %v69_v31  ;;  %v178_v25 = vld [vmem:[%s921_s4 + $0x18] sm:$0xff]  ;;  %v179_v26 = vld [vmem:[%s921_s4 + $0x20] sm:$0xff] }
  0x1a   :  { %v108_v15 = vmul.f32 %v563_v7, %v70_v32  ;;  %v109_v9 = vmul.f32 %v563_v7, %v71_v33  ;;  %v110_v30 = vmul.f32 %v563_v7, %v72_v37  ;;  %v111_v31 = vmul.f32 %v563_v7, %v73_v38  ;;  %v180_v32 = vld [vmem:[%s921_s4 + $0x28] sm:$0xff]  ;;  %v181_v33 = vld [vmem:[%s921_s4 + $0x30] sm:$0xff]  ;;  %v182_v37 = vld [vmem:[%s921_s4 + $0x38] sm:$0xff] }
  0x1b   :  { %v143_v12 = vadd.f32 %v579_v6, %v104_v17  ;;  %v144_v10 = vadd.f32 %v579_v6, %v105_v24  ;;  %v145_v8 = vadd.f32 %v579_v6, %v106_v59  ;;  %v146_v3 = vadd.f32 %v579_v6, %v107_v14 }
  0x1c   :  { %v147_v38 = vadd.f32 %v579_v6, %v108_v15  ;;  %v148_v17 = vadd.f32 %v579_v6, %v109_v9  ;;  %v149_v24 = vadd.f32 %v579_v6, %v110_v30  ;;  %v150_v14 = vadd.f32 %v579_v6, %v111_v31 }
  0x1d   :  { %v207_v59 = vadd.f32 %v175_v18, %v143_v12  ;;  %v208_v2 = vadd.f32 %v176_v51, %v144_v10  ;;  %v209_v1 = vadd.f32 %v177_v16, %v145_v8  ;;  %v210_v0 = vadd.f32 %v178_v25, %v146_v3  ;;  %v188_v3 = vld [vmem:[%s921_s4 + $0x68] sm:$0xff] }
  0x1e   :  { %v211_v62 = vadd.f32 %v179_v26, %v147_v38  ;;  %v212_v61 = vadd.f32 %v180_v32, %v148_v17  ;;  %v213_v60 = vadd.f32 %v181_v33, %v149_v24  ;;  %v214_v55 = vadd.f32 %v182_v37, %v150_v14 }
  0x1f   :  { %v239_v54 = vmax.f32 %v207_v59, 0.0  ;;  %v240_v53 = vmax.f32 %v208_v2, 0.0  ;;  %v241_v52 = vmax.f32 %v209_v1, 0.0  ;;  %v242_v47 = vmax.f32 %v210_v0, 0.0 }
  0x20   :  { %v243_v46 = vmax.f32 %v211_v62, 0.0  ;;  %v244_v15 = vmax.f32 %v212_v61, 0.0  ;;  %v245_v45 = vmax.f32 %v213_v60, 0.0  ;;  %v246_v9 = vmax.f32 %v214_v55, 0.0 }
  0x21   :  { %271 = vst [vmem:[%s922_s5] sm:$0xff] %v239_v54  ;;  %272 = vst [vmem:[%s922_s5 + $0x8] sm:$0xff] %v240_v53  ;;  %v112_v55 = vmul.f32 %v563_v7, %v74_v39  ;;  %v183_v54 = vld [vmem:[%s921_s4 + $0x40] sm:$0xff]  ;;  %v113_v53 = vmul.f32 %v563_v7, %v75_v40  ;;  %v114_v19 = vmul.f32 %v563_v7, %v76_v44 }
  0x22   :  { %273 = vst [vmem:[%s922_s5 + $0x10] sm:$0xff] %v241_v52  ;;  %274 = vst [vmem:[%s922_s5 + $0x18] sm:$0xff] %v242_v47  ;;  %v184_v52 = vld [vmem:[%s921_s4 + $0x48] sm:$0xff]  ;;  %v923_v39 = vsub.f32 %v411_v22, %v356_v11  ;;  %v924_v22 = vsub.f32 %v416_v23, %v356_v11  ;;  %v187_v44 = vld [vmem:[%s921_s4 + $0x60] sm:$0xff]  ;;  %v926_v60 = vsub.f32 %v433_v28, %v356_v11 }
  0x23   :  { %275 = vst [vmem:[%s922_s5 + $0x20] sm:$0xff] %v243_v46  ;;  %276 = vst [vmem:[%s922_s5 + $0x28] sm:$0xff] %v244_v15  ;;  %v927_v62 = vsub.f32 %v438_v29, %v356_v11  ;;  %v151_v0 = vadd.f32 %v579_v6, %v112_v55  ;;  %v152_v1 = vadd.f32 %v579_v6, %v113_v53  ;;  %v189_v28 = vld [vmem:[%s921_s4 + $0x70] sm:$0xff]  ;;  %v190_v29 = vld [vmem:[%s921_s4 + $0x78] sm:$0xff] }
  0x24   :  { %v115_v47 = vmul.f32 %v563_v7, %v923_v39  ;;  %277 = vst [vmem:[%s922_s5 + $0x30] sm:$0xff] %v245_v45  ;;  %278 = vst [vmem:[%s922_s5 + $0x38] sm:$0xff] %v246_v9  ;;  %v116_v40 = vmul.f32 %v563_v7, %v924_v22  ;;  %v925_v45 = vsub.f32 %v428_v27, %v356_v11  ;;  %v191_v53 = vld [vmem:[%s921_s4 + $0x80] sm:$0xff]  ;;  %v192_v39 = vld [vmem:[%s921_s4 + $0x88] sm:$0xff] }
  0x25   :  { %v118_v61 = vmul.f32 %v563_v7, %v926_v60  ;;  %v119_v23 = vmul.f32 %v563_v7, %v927_v62  ;;  %v153_v2 = vadd.f32 %v579_v6, %v114_v19  ;;  %v215_v18 = vadd.f32 %v183_v54, %v151_v0 }
  0x26   :  { %v117_v46 = vmul.f32 %v563_v7, %v925_v45  ;;  %v154_v27 = vadd.f32 %v579_v6, %v115_v47  ;;  %v155_v8 = vadd.f32 %v579_v6, %v116_v40  ;;  %v216_v51 = vadd.f32 %v184_v52, %v152_v1  ;;  %v195_v40 = vld [vmem:[%s921_s4 + $0xa0] sm:$0xff]  ;;  %v196_v1 = vld [vmem:[%s921_s4 + $0xa8] sm:$0xff] }
  0x27   :  { %v157_v12 = vadd.f32 %v579_v6, %v118_v61  ;;  %v158_v16 = vadd.f32 %v579_v6, %v119_v23  ;;  %v217_v25 = vadd.f32 %v185_v20, %v153_v2  ;;  %v247_v37 = vmax.f32 %v215_v18, 0.0 }
  0x28   :  { %v156_v10 = vadd.f32 %v579_v6, %v117_v46  ;;  %v218_v26 = vadd.f32 %v186_v21, %v154_v27  ;;  %v219_v30 = vadd.f32 %v187_v44, %v155_v8  ;;  %v248_v38 = vmax.f32 %v216_v51, 0.0 }
  0x29   :  { %v221_v32 = vadd.f32 %v189_v28, %v157_v12  ;;  %v222_v33 = vadd.f32 %v190_v29, %v158_v16  ;;  %v249_v17 = vmax.f32 %v217_v25, 0.0  ;;  %279 = vst [vmem:[%s922_s5 + $0x40] sm:$0xff] %v247_v37  ;;  %v928_v55 = vsub.f32 %v451_v34, %v356_v11 }
  0x2a   :  { %v220_v31 = vadd.f32 %v188_v3, %v156_v10  ;;  %v250_v24 = vmax.f32 %v218_v26, 0.0  ;;  %v251_v14 = vmax.f32 %v219_v30, 0.0  ;;  %280 = vst [vmem:[%s922_s5 + $0x48] sm:$0xff] %v248_v38  ;;  %v929_v52 = vsub.f32 %v456_v35, %v356_v11  ;;  %v193_v35 = vld [vmem:[%s921_s4 + $0x90] sm:$0xff] }
  0x2b   :  { %v253_v15 = vmax.f32 %v221_v32, 0.0  ;;  %v254_v9 = vmax.f32 %v222_v33, 0.0  ;;  %281 = vst [vmem:[%s922_s5 + $0x50] sm:$0xff] %v249_v17  ;;  %v120_v54 = vmul.f32 %v563_v7, %v928_v55  ;;  %v930_v47 = vsub.f32 %v461_v36, %v356_v11  ;;  %v194_v36 = vld [vmem:[%s921_s4 + $0x98] sm:$0xff]  ;;  %v200_v55 = vld [vmem:[%s921_s4 + $0xc8] sm:$0xff] }
  0x2c   :  { %v252_v59 = vmax.f32 %v220_v31, 0.0  ;;  %282 = vst [vmem:[%s922_s5 + $0x58] sm:$0xff] %v250_v24  ;;  %v121_v19 = vmul.f32 %v563_v7, %v929_v52  ;;  %v931_v20 = vsub.f32 %v474_v41, %v356_v11  ;;  %283 = vst [vmem:[%s922_s5 + $0x60] sm:$0xff] %v251_v14  ;;  %v932_v41 = vsub.f32 %v479_v42, %v356_v11 }
  0x2d   :  { %v122_v34 = vmul.f32 %v563_v7, %v930_v47  ;;  %285 = vst [vmem:[%s922_s5 + $0x70] sm:$0xff] %v253_v15  ;;  %286 = vst [vmem:[%s922_s5 + $0x78] sm:$0xff] %v254_v9  ;;  %v933_v44 = vsub.f32 %v484_v43, %v356_v11  ;;  %v934_v46 = vsub.f32 %v497_v48, %v356_v11  ;;  %v197_v48 = vld [vmem:[%s921_s4 + $0xb0] sm:$0xff] }
  0x2e   :  { %v123_v21 = vmul.f32 %v563_v7, %v931_v20  ;;  %284 = vst [vmem:[%s922_s5 + $0x68] sm:$0xff] %v252_v59  ;;  %v124_v22 = vmul.f32 %v563_v7, %v932_v41  ;;  %v935_v61 = vsub.f32 %v502_v49, %v356_v11  ;;  %v159_v62 = vadd.f32 %v579_v6, %v120_v54  ;;  %v198_v49 = vld [vmem:[%s921_s4 + $0xb8] sm:$0xff]  ;;  %v199_v59 = vld [vmem:[%s921_s4 + $0xc0] sm:$0xff] }
  0x2f   :  { %v125_v45 = vmul.f32 %v563_v7, %v933_v44  ;;  %v126_v60 = vmul.f32 %v563_v7, %v934_v46  ;;  %v160_v23 = vadd.f32 %v579_v6, %v121_v19  ;;  %v161_v0 = vadd.f32 %v579_v6, %v122_v34 }
  0x30   :  { %v127_v42 = vmul.f32 %v563_v7, %v935_v61  ;;  %v162_v43 = vadd.f32 %v579_v6, %v123_v21  ;;  %v163_v2 = vadd.f32 %v579_v6, %v124_v22  ;;  %v223_v29 = vadd.f32 %v191_v53, %v159_v62 }
  0x31   :  { %v164_v27 = vadd.f32 %v579_v6, %v125_v45  ;;  %v165_v3 = vadd.f32 %v579_v6, %v126_v60  ;;  %v224_v8 = vadd.f32 %v192_v39, %v160_v23  ;;  %v225_v10 = vadd.f32 %v193_v35, %v161_v0  ;;  %v203_v39 = vld [vmem:[%s921_s4 + $0xe0] sm:$0xff] }
  0x32   :  { %v166_v28 = vadd.f32 %v579_v6, %v127_v42  ;;  %v226_v12 = vadd.f32 %v194_v36, %v162_v43  ;;  %v227_v16 = vadd.f32 %v195_v40, %v163_v2  ;;  %v255_v26 = vmax.f32 %v223_v29, 0.0  ;;  %v204_v40 = vld [vmem:[%s921_s4 + $0xe8] sm:$0xff] }
  0x33   :  { %v228_v18 = vadd.f32 %v196_v1, %v164_v27  ;;  %v229_v51 = vadd.f32 %v197_v48, %v165_v3  ;;  %v256_v30 = vmax.f32 %v224_v8, 0.0  ;;  %v257_v31 = vmax.f32 %v225_v10, 0.0 }
  0x34   :  { %v230_v25 = vadd.f32 %v198_v49, %v166_v28  ;;  %v258_v32 = vmax.f32 %v226_v12, 0.0  ;;  %v259_v33 = vmax.f32 %v227_v16, 0.0  ;;  %287 = vst [vmem:[%s922_s5 + $0x80] sm:$0xff] %v255_v26  ;;  %v936_v24 = vsub.f32 %v507_v50, %v356_v11 }
  0x35   :  { %v260_v37 = vmax.f32 %v228_v18, 0.0  ;;  %v261_v38 = vmax.f32 %v229_v51, 0.0  ;;  %288 = vst [vmem:[%s922_s5 + $0x88] sm:$0xff] %v256_v30  ;;  %289 = vst [vmem:[%s922_s5 + $0x90] sm:$0xff] %v257_v31  ;;  %v937_v15 = vsub.f32 %v520_v56, %v356_v11  ;;  %v938_v54 = vsub.f32 %v525_v57, %v356_v11  ;;  %v201_v56 = vld [vmem:[%s921_s4 + $0xd0] sm:$0xff]  ;;  %v202_v57 = vld [vmem:[%s921_s4 + $0xd8] sm:$0xff] }
  0x36   :  { %v262_v17 = vmax.f32 %v230_v25, 0.0  ;;  %290 = vst [vmem:[%s922_s5 + $0x98] sm:$0xff] %v258_v32  ;;  %v128_v14 = vmul.f32 %v563_v7, %v936_v24  ;;  %v939_v53 = vsub.f32 %v530_v58, %v356_v11  ;;  %291 = vst [vmem:[%s922_s5 + $0xa0] sm:$0xff] %v259_v33  ;;  %v940_v58 = vsub.f32 %v541_v63, %v356_v11 }
  0x37   :  { %v129_v9 = vmul.f32 %v563_v7, %v937_v15  ;;  %v130_v50 = vmul.f32 %v563_v7, %v938_v54  ;;  %292 = vst [vmem:[%s922_s5 + $0xa8] sm:$0xff] %v260_v37  ;;  %293 = vst [vmem:[%s922_s5 + $0xb0] sm:$0xff] %v261_v38  ;;  %v941_v47 = vsub.f32 %v554_v4, %v356_v11 }
  0x38   :  { %v131_v52 = vmul.f32 %v563_v7, %v939_v53  ;;  %294 = vst [vmem:[%s922_s5 + $0xb8] sm:$0xff] %v262_v17  ;;  %v132_v19 = vmul.f32 %v563_v7, %v940_v58  ;;  %v942_v20 = vsub.f32 %v559_v5, %v356_v11  ;;  %v943_v35 = vsub.f32 %v574_v13, %v356_v11  ;;  %v205_v5 = vld [vmem:[%s921_s4 + $0xf0] sm:$0xff]  ;;  %v206_v11 = vld [vmem:[%s921_s4 + $0xf8] sm:$0xff] }
  0x39   :  { %v133_v34 = vmul.f32 %v563_v7, %v941_v47  ;;  %v167_v36 = vadd.f32 %v579_v6, %v128_v14  ;;  %v168_v41 = vadd.f32 %v579_v6, %v129_v9  ;;  %v169_v22 = vadd.f32 %v579_v6, %v130_v50 }
  0x3a   :  { %v134_v21 = vmul.f32 %v563_v7, %v942_v20  ;;  %v135_v63 = vmul.f32 %v563_v7, %v943_v35  ;;  %v170_v4 = vadd.f32 %v579_v6, %v131_v52  ;;  %v171_v7 = vadd.f32 %v579_v6, %v132_v19 }
  0x3b   :  { %v172_v13 = vadd.f32 %v579_v6, %v133_v34  ;;  %v231_v46 = vadd.f32 %v199_v59, %v167_v36  ;;  %v232_v60 = vadd.f32 %v200_v55, %v168_v41  ;;  %v233_v61 = vadd.f32 %v201_v56, %v169_v22 }
  0x3c   :  { %v173_v44 = vadd.f32 %v579_v6, %v134_v21  ;;  %v174_v45 = vadd.f32 %v579_v6, %v135_v63  ;;  %v234_v42 = vadd.f32 %v202_v57, %v170_v4  ;;  %v235_v62 = vadd.f32 %v203_v39, %v171_v7 }
  0x3d   :  { %v236_v23 = vadd.f32 %v204_v40, %v172_v13  ;;  %v263_v1 = vmax.f32 %v231_v46, 0.0  ;;  %v264_v48 = vmax.f32 %v232_v60, 0.0  ;;  %v265_v49 = vmax.f32 %v233_v61, 0.0 }
  0x3e   :  { %v237_v0 = vadd.f32 %v205_v5, %v173_v44  ;;  %v238_v43 = vadd.f32 %v206_v11, %v174_v45  ;;  %v266_v2 = vmax.f32 %v234_v42, 0.0  ;;  %v267_v27 = vmax.f32 %v235_v62, 0.0 }
  0x3f   :  { %v268_v3 = vmax.f32 %v236_v23, 0.0  ;;  %295 = vst [vmem:[%s922_s5 + $0xc0] sm:$0xff] %v263_v1  ;;  %296 = vst [vmem:[%s922_s5 + $0xc8] sm:$0xff] %v264_v48 }
  0x40   :  { %v269_v28 = vmax.f32 %v237_v0, 0.0  ;;  %v270_v29 = vmax.f32 %v238_v43, 0.0  ;;  %297 = vst [vmem:[%s922_s5 + $0xd0] sm:$0xff] %v265_v49  ;;  %298 = vst [vmem:[%s922_s5 + $0xd8] sm:$0xff] %v266_v2 }
  0x41   :  { %299 = vst [vmem:[%s922_s5 + $0xe0] sm:$0xff] %v267_v27  ;;  %300 = vst [vmem:[%s922_s5 + $0xe8] sm:$0xff] %v268_v3 }
  0x42   :  { %301 = vst [vmem:[%s922_s5 + $0xf0] sm:$0xff] %v269_v28  ;;  %302 = vst [vmem:[%s922_s5 + $0xf8] sm:$0xff] %v270_v29 }

// kernel: skip_connection_forward.6
= control target key start
LH: loop header
LB: loop body
LE: loop exit
PB: predicated region body
PF: predicated region fallthrough
CT: control target
= control target key end

     0   :  { %s4773_s15 = smov 0   ;;  %s6299_s0 = inlined_call_operand.vmem [shape: f32[2,342,32], index: 0, kind: input, shape index: {}]   ;;  %s6300_s1 = inlined_call_operand.vmem [shape: bf16[3,3,32,64], index: 1, kind: input, shape index: {}]   ;;  %s6301_s2 = inlined_call_operand.vmem [shape: f32[288,1], index: 2, kind: input, shape index: {}]   ;;  %s6302_s3 = inlined_call_operand.vmem [shape: f32[2,288,64], index: 3, kind: output, shape index: {0}]   ;;  %s6303_s4 = inlined_call_operand.vmem [shape: f32[2,64], index: 4, kind: output, shape index: {1}]  }
   0x1 LB: > { %s4779_s16 = sadd.s32 4294967295, %s4744_s15   ;;  %p3654_p0 = scmp.ge.s32.totalorder %s4744_s15, 1  ;;  %s4744_s15 = sphi %s4773_s15, %s15_s15  }
   0x2   : > { %p160_p1 = scmp.lt.s32.totalorder %s4744_s15, 3 }
   0x4   : > { %p161_p2 = pnand %p3654_p0, %p160_p1 }
   0x6   : > { %164 = sbr.rel (%p161_p2) target bundleno = 669 (0x29d), region = 32 }
   0xd   : > { %v4786_v0 = vld [vmem:[%s6300_s1 + $0x40] sm:$0xff]   ;;  %p186_p3 = scmp.lt.s32.totalorder %s4779_s16, 1  ;;  %v4719_v1 = vld [vmem:[%s6300_s1 + $0x10] sm:$0xff]   ;;  %v4720_v2 = vld [vmem:[%s6300_s1 + $0x48] sm:$0xff]   ;;  %vm266_vm0 = vsmask.f32 7424 }
   0xe   : > { %6336 = vst [vmem:[#allocation2_spill] sm:$0xff] %v4786_v0  ;;  %4212 = vmatprep.subr.bf16.mxu0 %v4786_v0  ;;  %4052 = vmatprep.subr.bf16.mxu1 %v4719_v1  ;;  %v4721_v3 = vld [vmem:[%s6300_s1 + $0x18] sm:$0xff]   ;;  %v4807_v4 = vld [vmem:[%s6300_s1 + $0x50] sm:$0xff]   ;;  %v4817_v5 = vld [vmem:[%s6300_s1] sm:$0xff]   ;;  %vm427_vm1 = vcmask 261120   ;;  %vm1844_vm3 = vcmask 1045504  }
   0xf   : > { %s4797_s23 = scalar_select %p186_p3, %s4779_s16, 1  ;;  %4213 = vmatpush3.bf16.msra.mxu0 %v4786_v0  ;;  %4053 = vmatpush3.bf16.msra.mxu1 %v4719_v1  ;;  %vm1474_vm2 = vsmask.f32 6400  ;;  %v4724_v60 = vld [vmem:[%s6300_s1 + $0x58] sm:$0xff]   ;;  %v4726_v61 = vld [vmem:[%s6300_s1 + $0x8] sm:$0xff]   ;;  %vm908_vm5 = vcmask 1046528  }
  0x10   : > { %4214 = vmatprep.subr.bf16.mxu0 %v4720_v2  ;;  %4054 = vmatprep.subr.bf16.mxu1 %v4721_v3  ;;  %vm2410_vm4 = vsmask.f32 5376  ;;  %vm2780_vm6 = vcmask 1044480   ;;  %vm3349_vm7 = vcmask 523264   ;;  %p3869_p4 = scmp.ne.s32.totalorder %s4779_s16, 0 }
  0x11   : > { %s4704_s26 = smul.u32 344, %s4797_s23  ;;  %vm3390_vm8 = vcmask (!%p3869_p4), 517120  }
  0x12   : > { %s4705_s19 = smul.u32 288, %s4797_s23 }
  0x13   : > { %s4812_s5 = scalar_lea.vmem %s6299_s0, %s4704_s26  ;;  %4215 = vmatpush3.bf16.msra.mxu0 %v4720_v2  ;;  %4055 = vmatpush3.bf16.msra.mxu1 %v4721_v3 }
  0x14   : > { %v197_v6 = vld [vmem:[%s4812_s5] sm:$0xff]  ;;  %v198_v7 = vld [vmem:[%s4812_s5 + $0x8] sm:$0xff]  ;;  %v199_v8 = vld [vmem:[%s4812_s5 + $0x10] sm:$0xff]  ;;  %4252 = vmatprep.subr.bf16.mxu0 %v4807_v4  ;;  %4092 = vmatprep.subr.bf16.mxu1 %v4817_v5  ;;  %s5881_s22 = scalar_lea.vmem %s6302_s3, %s4705_s19 }
  0x15   : > { %v200_v9 = vld [vmem:[%s4812_s5 + $0x18] sm:$0xff]  ;;  %v4823_v10 = vpack.c.bf16 %v198_v7, %v197_v6  ;;  %v201_v11 = vld [vmem:[%s4812_s5 + $0x20] sm:$0xff]  ;;  %v202_v12 = vld [vmem:[%s4812_s5 + $0x28] sm:$0xff] }
  0x16   : > { %v4828_v13 = vpack.c.bf16 %v200_v9, %v199_v8  ;;  %v4830_v14 = vpack.c.bf16 %v202_v12, %v201_v11  ;;  %v203_v15 = vld [vmem:[%s4812_s5 + $0x30] sm:$0xff]  ;;  %v204_v16 = vld [vmem:[%s4812_s5 + $0x38] sm:$0xff]  ;;  %v205_v17 = vld [vmem:[%s4812_s5 + $0x40] sm:$0xff] }
  0x17   : > { %v268_v18 = vshrl.u32 %v4823_v10, 16  ;;  %v270_v19 = vshll.u32 %v4823_v10, 16  ;;  %v4838_v20 = vpack.c.bf16 %v204_v16, %v203_v15  ;;  %v206_v21 = vld [vmem:[%s4812_s5 + $0x48] sm:$0xff]  ;;  %v207_v42 = vld [vmem:[%s4812_s5 + $0x50] sm:$0xff]  ;;  %v208_v43 = vld [vmem:[%s4812_s5 + $0x58] sm:$0xff] }
  0x18   : > { %v275_v22 = vshll.u32 %v4828_v13, 16  ;;  %v279_v23 = vshrl.u32 %v4828_v13, 16  ;;  %v4844_v24 = vshll.u32 %v4830_v14, 16  ;;  %v4847_v25 = vshrl.u32 %v4830_v14, 16  ;;  %v209_v48 = vld [vmem:[%s4812_s5 + $0x60] sm:$0xff]  ;;  %v210_v49 = vld [vmem:[%s4812_s5 + $0x68] sm:$0xff] }
  0x19   : > { %v272_v26 = vrot.slane %v270_v19, 1  ;;  %v4850_v27 = vshll.u32 %v4838_v20, 16  ;;  %v4853_v28 = vshrl.u32 %v4838_v20, 16  ;;  %v4855_v29 = vpack.c.bf16 %v206_v21, %v205_v17  ;;  %v211_v54 = vld [vmem:[%s4812_s5 + $0x70] sm:$0xff]  ;;  %v212_v55 = vld [vmem:[%s4812_s5 + $0x78] sm:$0xff]  ;;  %v213_v3 = vld [vmem:[%s4812_s5 + $0x80] sm:$0xff] }
  0x1a   : > { %v277_v30 = vrot.slane %v275_v22, 1  ;;  %v1475_v31 = vrot.slane %v279_v23, 1  ;;  %v1476_v32 = vrot.slane %v275_v22, 2  ;;  %v1478_v33 = vrot.slane %v4847_v25, 1  ;;  %v214_v6 = vld [vmem:[%s4812_s5 + $0x88] sm:$0xff]  ;;  %v4931_v19 = vld [vmem:[%s6300_s1 + $0x60] sm:$0xff]  }
  0x1b   : > { %v273_v34 = vor.u32 %v272_v26, %v268_v18  ;;  %v1479_v35 = vrot.slane %v4844_v24, 2  ;;  %v285_v36 = vrot.slane %v4844_v24, 1  ;;  %v1482_v37 = vrot.slane %v4853_v28, 1 }
  0x1c   : > { %v281_v38 = vor.u32 %v279_v23, %v277_v30  ;;  %v1477_v39 = vor.u32 %v1476_v32, %v1475_v31  ;;  %v1483_v40 = vrot.slane %v4850_v27, 2  ;;  %v293_v41 = vrot.slane %v4850_v27, 1  ;;  %v215_v32 = vld [vmem:[%s4812_s5 + $0x90] sm:$0xff] }
  0x1d   : > { %v278_v44 = vsel %vm266_vm0, %v273_v34, %v277_v30  ;;  %v1480_v45 = vor.u32 %v1479_v35, %v1478_v33  ;;  %v289_v46 = vor.u32 %v4847_v25, %v285_v36  ;;  %v4868_v47 = vshll.u32 %v4855_v29, 16  ;;  %v216_v33 = vld [vmem:[%s4812_s5 + $0x98] sm:$0xff] }
  0x1e   : > { %4056 = vmatprep.mubr.msk.bf16.mxu1 %vm427_vm1, %v278_v44  ;;  %v286_v50 = vsel %vm266_vm0, %v281_v38, %v285_v36  ;;  %v1484_v51 = vor.u32 %v1483_v40, %v1482_v37  ;;  %v4875_v52 = vshrl.u32 %v4855_v29, 16  ;;  %v297_v53 = vor.u32 %v4853_v28, %v293_v41 }
  0x1f   : > { %v1481_v56 = vsel %vm1474_vm2, %v1477_v39, %v1480_v45  ;;  %4057 = vmatmul.mubr.msk.bf16.vlgmr.msra.gmra.mrb[0].mxu1 %vm427_vm1, %v286_v50  ;;  %v294_v57 = vsel %vm266_vm0, %v289_v46, %v293_v41  ;;  %v1487_v58 = vrot.slane %v4868_v47, 2  ;;  %v301_v59 = vrot.slane %v4868_v47, 1  ;;  %v217_v41 = vld [vmem:[%s4812_s5 + $0xa0] sm:$0xff]  ;;  %v218_v46 = vld [vmem:[%s4812_s5 + $0xa8] sm:$0xff] }
  0x20   : > { %4216 = vmatprep.mubr.msk.bf16.mxu0 %vm427_vm1, %v1481_v56  ;;  %v1485_v62 = vsel %vm1474_vm2, %v1480_v45, %v1484_v51  ;;  %4060 = vmatprep.mubr.msk.bf16.mxu1 %vm427_vm1, %v294_v57  ;;  %v1486_v63 = vrot.slane %v4875_v52, 1  ;;  %v4895_v1 = vpack.c.bf16 %v208_v43, %v207_v42  ;;  %v4897_v2 = vpack.c.bf16 %v210_v49, %v209_v48  ;;  %v4955_v42 = vld [vmem:[%s6300_s1 + $0x20] sm:$0xff]   ;;  %v219_v56 = vld [vmem:[%s4812_s5 + $0xb0] sm:$0xff] }
  0x21   : > { %4217 = vmatmul.mubr.msk.bf16.vlgmr.msra.gmra.mrb[0].mxu0 %vm427_vm1, %v1485_v62  ;;  %v302_v7 = vsel %vm266_vm0, %v297_v53, %v301_v59  ;;  %4093 = vmatpush3.bf16.msra.mxu1 %v4817_v5  ;;  %v305_v8 = vor.u32 %v4875_v52, %v301_v59  ;;  %v4905_v9 = vpack.c.bf16 %v212_v55, %v211_v54 }
  0x22   : > { %4253 = vmatpush3.bf16.msra.mxu0 %v4807_v4  ;;  %v1488_v11 = vor.u32 %v1487_v58, %v1486_v63  ;;  %v4909_v12 = vshll.u32 %v4895_v1, 16  ;;  %v4912_v15 = vshrl.u32 %v4895_v1, 16  ;;  %v4915_v16 = vshll.u32 %v4897_v2, 16  ;;  %4094 = vmatprep.subr.bf16.mxu1 %v4726_v61  ;;  %v220_v58 = vld [vmem:[%s4812_s5 + $0xb8] sm:$0xff] }
  0x23   : > { %v4918_v5 = vshrl.u32 %v4897_v2, 16  ;;  %v4921_v17 = vshll.u32 %v4905_v9, 16  ;;  %v4924_v4 = vshrl.u32 %v4905_v9, 16  ;;  %4254 = vmatprep.subr.bf16.mxu0 %v4724_v60  ;;  %v4926_v18 = vpack.c.bf16 %v214_v6, %v213_v3 }
  0x24   : > { %v1489_v21 = vsel %vm1474_vm2, %v1484_v51, %v1488_v11  ;;  %v1490_v22 = vrot.slane %v4912_v15, 1  ;;  %v1491_v23 = vrot.slane %v4909_v12, 2  ;;  %v309_v26 = vrot.slane %v4909_v12, 1 }
  0x25   : > { %4220 = vmatprep.mubr.msk.bf16.mxu0 %vm427_vm1, %v1489_v21  ;;  %v1494_v30 = vrot.slane %v4918_v5, 1  ;;  %v1495_v31 = vrot.slane %v4915_v16, 2  ;;  %4095 = vmatpush3.bf16.msra.mxu1 %v4726_v61  ;;  %v1498_v36 = vrot.slane %v4924_v4, 1  ;;  %v1499_v37 = vrot.slane %v4921_v17, 2 }
  0x26   : > { %v1492_v34 = vor.u32 %v1491_v23, %v1490_v22  ;;  %v310_v35 = vsel %vm266_vm0, %v305_v8, %v309_v26  ;;  %4255 = vmatpush3.bf16.msra.mxu0 %v4724_v60  ;;  %v317_v39 = vrot.slane %v4915_v16, 1  ;;  %v4948_v40 = vshll.u32 %v4926_v18, 16  ;;  %4132 = vmatprep.subr.bf16.mxu1 %v4955_v42 }
  0x27   : > { %4061 = vmatmul.mubr.msk.bf16.gmra.mrb[4].mxu1 %vm427_vm1, %v302_v7  ;;  %v1496_v38 = vor.u32 %v1495_v31, %v1494_v30  ;;  %4292 = vmatprep.subr.bf16.mxu0 %v4931_v19  ;;  %v313_v44 = vor.u32 %v4912_v15, %v309_v26  ;;  %v4961_v45 = vshrl.u32 %v4926_v18, 16  ;;  %v325_v50 = vrot.slane %v4921_v17, 1 }
  0x28   : > { %v1493_v43 = vsel %vm1474_vm2, %v1488_v11, %v1492_v34  ;;  %4064 = vmatprep.mubr.msk.bf16.mxu1 %vm427_vm1, %v310_v35  ;;  %v321_v49 = vor.u32 %v4918_v5, %v317_v39  ;;  %v1503_v51 = vrot.slane %v4948_v40, 2  ;;  %v1500_v53 = vor.u32 %v1499_v37, %v1498_v36 }
  0x29   : > { %4221 = vmatmul.mubr.msk.bf16.gmra.mrb[4].mxu0 %vm427_vm1, %v1493_v43  ;;  %v1497_v48 = vsel %vm1474_vm2, %v1492_v34, %v1496_v38  ;;  %v1502_v54 = vrot.slane %v4961_v45, 1  ;;  %v4972_v55 = vpack.c.bf16 %v216_v33, %v215_v32  ;;  %v4975_v57 = vpack.c.bf16 %v218_v46, %v217_v41  ;;  %v222_v41 = vld [vmem:[%s4812_s5 + $0xc8] sm:$0xff] }
  0x2a   : > { %4224 = vmatprep.mubr.msk.bf16.mxu0 %vm427_vm1, %v1497_v48  ;;  %v318_v59 = vsel %vm266_vm0, %v313_v44, %v317_v39  ;;  %v326_v63 = vsel %vm266_vm0, %v321_v49, %v325_v50  ;;  %v1501_v7 = vsel %vm1474_vm2, %v1496_v38, %v1500_v53  ;;  %v4995_v21 = vpack.c.bf16 %v220_v58, %v219_v56  ;;  %v221_v39 = vld [vmem:[%s4812_s5 + $0xc0] sm:$0xff]  ;;  %v223_v44 = vld [vmem:[%s4812_s5 + $0xd0] sm:$0xff] }
  0x2b   : > { %v1504_v60 = vor.u32 %v1503_v51, %v1502_v54  ;;  %v4980_v61 = vshll.u32 %v4972_v55, 16  ;;  %v4983_v62 = vshrl.u32 %v4972_v55, 16  ;;  %v4987_v3 = vshll.u32 %v4975_v57, 16  ;;  %v224_v51 = vld [vmem:[%s4812_s5 + $0xd8] sm:$0xff] }
  0x2c   : > { %v4990_v6 = vshrl.u32 %v4975_v57, 16  ;;  %v333_v23 = vrot.slane %v4948_v40, 1  ;;  %v329_v31 = vor.u32 %v4924_v4, %v325_v50  ;;  %v5009_v35 = vshll.u32 %v4995_v21, 16  ;;  %v232_v54 = vld [vmem:[%s4812_s5 + $0x118] sm:$0xff] }
  0x2d   : > { %v1506_v8 = vrot.slane %v4983_v62, 1  ;;  %v1507_v11 = vrot.slane %v4980_v61, 2  ;;  %v1505_v22 = vsel %vm1474_vm2, %v1500_v53, %v1504_v60  ;;  %v1511_v30 = vrot.slane %v4987_v3, 2  ;;  %v231_v53 = vld [vmem:[%s4812_s5 + $0x110] sm:$0xff] }
  0x2e   : > { %v1510_v26 = vrot.slane %v4990_v6, 1  ;;  %v337_v32 = vor.u32 %v4961_v45, %v333_v23  ;;  %v341_v33 = vrot.slane %v4980_v61, 1  ;;  %v5012_v36 = vshrl.u32 %v4995_v21, 16 }
  0x2f   : > { %4065 = vmatmul.mubr.msk.bf16.gmra.mrb[8].mxu1 %vm427_vm1, %v318_v59  ;;  %v1508_v34 = vor.u32 %v1507_v11, %v1506_v8  ;;  %v334_v38 = vsel %vm266_vm0, %v329_v31, %v333_v23  ;;  %v349_v48 = vrot.slane %v4987_v3, 1  ;;  %v1515_v50 = vrot.slane %v5009_v35, 2 }
  0x30   : > { %4068 = vmatprep.mubr.msk.bf16.mxu1 %vm427_vm1, %v326_v63  ;;  %v1512_v37 = vor.u32 %v1511_v30, %v1510_v26  ;;  %v342_v43 = vsel %vm266_vm0, %v337_v32, %v341_v33  ;;  %v1514_v49 = vrot.slane %v5012_v36, 1  ;;  %v5028_v58 = vpack.c.bf16 %v222_v41, %v221_v39 }
  0x31   : > { %4225 = vmatmul.mubr.msk.bf16.gmra.mrb[8].mxu0 %vm427_vm1, %v1501_v7  ;;  %v1509_v46 = vsel %vm1474_vm2, %v1504_v60, %v1508_v34  ;;  %v345_v59 = vor.u32 %v4983_v62, %v341_v33  ;;  %v353_v60 = vor.u32 %v4990_v6, %v349_v48  ;;  %v357_v63 = vrot.slane %v5009_v35, 1  ;;  %v225_v33 = vld [vmem:[%s4812_s5 + $0xe0] sm:$0xff] }
  0x32   : > { %4228 = vmatprep.mubr.msk.bf16.mxu0 %vm427_vm1, %v1505_v22  ;;  %v1513_v56 = vsel %vm1474_vm2, %v1508_v34, %v1512_v37  ;;  %v5035_v7 = vpack.c.bf16 %v224_v51, %v223_v44  ;;  %v5037_v8 = vpack.c.bf16 %v232_v54, %v231_v53  ;;  %v5040_v11 = vor.u32 %v1515_v50, %v1514_v49  ;;  %v233_v22 = vld [vmem:[%s4812_s5 + $0x120] sm:$0xff]  ;;  %v226_v34 = vld [vmem:[%s4812_s5 + $0xe8] sm:$0xff]  ;;  %v228_v49 = vld [vmem:[%s4812_s5 + $0xf8] sm:$0xff] }
  0x33   : > { %v1845_v23 = vrot.slane %v4828_v13, 2  ;;  %v1846_v26 = vrot.slane %v4830_v14, 2  ;;  %v5046_v30 = vshll.u32 %v5028_v58, 16  ;;  %v350_v31 = vsel %vm266_vm0, %v345_v59, %v349_v48  ;;  %v227_v48 = vld [vmem:[%s4812_s5 + $0xf0] sm:$0xff] }
  0x34   : > { %6337 = vst [vmem:[#allocation3_spill] sm:$0xff] %v5040_v11  ;;  %v358_v32 = vsel %vm266_vm0, %v353_v60, %v357_v63  ;;  %v5056_v39 = vshrl.u32 %v5028_v58, 16  ;;  %v5059_v41 = vshll.u32 %v5035_v7, 16  ;;  %v5064_v44 = vshrl.u32 %v5037_v8, 16 }
  0x35   : > { %6338 = vst [vmem:[#allocation4_spill] sm:$0xff] %v5046_v30  ;;  %v1847_v51 = vsel %vm1844_vm3, %v1845_v23, %v1846_v26  ;;  %v365_v53 = vrot.slane %v5046_v30, 1  ;;  %v5074_v54 = vpack.c.bf16 %v226_v34, %v225_v33 }
  0x36   : > { %6339 = vst [vmem:[#allocation5_spill] sm:$0xff] %v5056_v39  ;;  %6340 = vst [vmem:[#allocation6_spill] sm:$0xff] %v5059_v41  ;;  %v373_v23 = vrot.slane %v5059_v41, 1 }
  0x37   : > { %4069 = vmatmul.mubr.msk.bf16.gmra.mrb[12].mxu1 %vm427_vm1, %v334_v38  ;;  %v5053_v38 = vshll.u32 %v5037_v8, 16  ;;  %6342 = vst [vmem:[#allocation8_spill] sm:$0xff] %v5064_v44  ;;  %v369_v60 = vor.u32 %v5056_v39, %v365_v53  ;;  %v5091_v34 = vshll.u32 %v5074_v54, 16 }
  0x38   : > { %4072 = vmatprep.mubr.msk.bf16.mxu1 %vm427_vm1, %v342_v43  ;;  %v5061_v43 = vpack.c.bf16 %v233_v22, %v233_v22 }
  0x39   : > { %4229 = vmatmul.mubr.msk.bf16.gmra.mrb[12].mxu0 %vm427_vm1, %v1509_v46  ;;  %v1517_v46 = vsel %vm1474_vm2, %v1512_v37, %v5040_v11  ;;  %v6304_v50 = vrot.slane %v5053_v38, 1  ;;  %v361_v37 = vor.u32 %v5012_v36, %v357_v63  ;;  %v1850_v63 = vrot.slane %v4855_v29, 2  ;;  %6343 = vst [vmem:[#allocation9_spill] sm:$0xff] %v5091_v34 }
  0x3a   : > { %4232 = vmatprep.mubr.msk.bf16.mxu0 %vm427_vm1, %v1513_v56  ;;  %6341 = vst [vmem:[#allocation7_spill] sm:$0xff] %v5061_v43  ;;  %v411_v56 = vshll.u32 %v5061_v43, 16  ;;  %v5098_v11 = vshrl.u32 %v5035_v7, 16 }
  0x3b   : > { %v409_v59 = vor.u32 %v5064_v44, %v6304_v50 }
  0x3c   : > { %v413_v33 = vrot.slane %v411_v56, 1  ;;  %6344 = vst [vmem:[#allocation10_spill] sm:$0xff] %v5098_v11  ;;  %v374_v56 = vsel %vm266_vm0, %v369_v60, %v373_v23 }
  0x3e   : > { %v5094_v50 = vsel %vm266_vm0, %v409_v59, %v413_v33  ;;  %v234_v59 = vld [vmem:[%s4812_s5 + $0x128] sm:$0xff] }
  0x3f   : > { %4073 = vmatmul.mubr.msk.bf16.gmra.mrb[16].mxu1 %vm427_vm1, %v350_v31  ;;  %v5085_v31 = vpack.c.bf16 %v228_v49, %v227_v48  ;;  %v229_v48 = vld [vmem:[%s4812_s5 + $0x100] sm:$0xff]  ;;  %v230_v49 = vld [vmem:[%s4812_s5 + $0x108] sm:$0xff]  ;;  %v5129_v30 = vpack.c.bf16 %v234_v59, %v233_v22  ;;  %v5146_v22 = vld [vmem:[%s6300_s1 + $0x70] sm:$0xff]  }
  0x40   : > { %4076 = vmatprep.mubr.msk.bf16.mxu1 %vm427_vm1, %v358_v32  ;;  %v1848_v32 = vrot.slane %v4838_v20, 2  ;;  %v5118_v60 = vpack.c.bf16 %v230_v49, %v229_v48  ;;  %v4727_v33 = vld [vmem:[%s6300_s1 + $0x68] sm:$0xff]   ;;  %v1852_v48 = vrot.slane %v4895_v1, 2  ;;  %v5137_v49 = vld [vmem:[%s4812_s5 + $0x130] sm:$0xff] }
  0x41   : > { %4233 = vmatmul.mubr.msk.bf16.gmra.mrb[16].mxu0 %vm427_vm1, %v1517_v46  ;;  %v366_v46 = vsel %vm266_vm0, %v361_v37, %v365_v53  ;;  %v5107_v44 = vshll.u32 %v5085_v31, 16  ;;  %v381_v37 = vrot.slane %v5091_v34, 1  ;;  %6347 = vst [vmem:[#allocation13_spill] sm:$0xff] %v5129_v30  ;;  %v236_v34 = vld [vmem:[%s4812_s5 + $0x138] sm:$0xff]  ;;  %v5160_v39 = vrot.slane %v5129_v30, 2 }
  0x42   : > { %4256 = vmatprep.mubr.msk.bf16.mxu0 %vm427_vm1, %v1847_v51  ;;  %v5104_v51 = vshrl.u32 %v5074_v54, 16  ;;  %v5110_v41 = vsel %vm1844_vm3, %v1846_v26, %v1848_v32  ;;  %v5115_v53 = vsel %vm1844_vm3, %v1848_v32, %v1850_v63  ;;  %v377_v26 = vor.u32 %v5098_v11, %v373_v23 }
  0x43   : > { %6346 = vst [vmem:[#allocation12_spill] sm:$0xff] %v5107_v44  ;;  %v389_v32 = vrot.slane %v5107_v44, 1  ;;  %v1854_v23 = vrot.slane %v4897_v2, 2  ;;  %v5153_v44 = vshrl.u32 %v5085_v31, 16  ;;  %v5157_v11 = vshrl.u32 %v5118_v60, 16 }
  0x44   : > { %6345 = vst [vmem:[#allocation11_spill] sm:$0xff] %v5104_v51  ;;  %v382_v59 = vsel %vm266_vm0, %v377_v26, %v381_v37  ;;  %v5164_v0 = vsel %vm1844_vm3, %v1850_v63, %v1852_v48  ;;  %v6353_v30 = vrot.slane %v5053_v38, 1 }
  0x45   : > { %6350 = vst [vmem:[#allocation16_spill] sm:$0xff] %v5153_v44  ;;  %6351 = vst [vmem:[#allocation17_spill] sm:$0xff] %v5157_v11  ;;  %v393_v63 = vor.u32 %v5153_v44, %v389_v32 }
  0x47   : > { %4077 = vmatmul.mubr.msk.bf16.gmra.mrb[20].mxu1 %vm427_vm1, %v366_v46  ;;  %v385_v46 = vor.u32 %v5104_v51, %v381_v37 }
  0x48   : > { %4080 = vmatprep.mubr.msk.bf16.mxu1 %vm427_vm1, %v374_v56  ;;  %v5141_v56 = vshll.u32 %v5118_v60, 16 }
  0x49   : > { %4257 = vmatmul.mubr.msk.bf16.vlgmr.msra.gmra.mrb[0].mxu0 %vm427_vm1, %v5110_v41  ;;  %v390_v51 = vsel %vm266_vm0, %v385_v46, %v389_v32  ;;  %v2411_v46 = vrot.slane %v4847_v25, 2  ;;  %v1858_v32 = vrot.slane %v4926_v18, 2  ;;  %v2418_v25 = vrot.slane %v4875_v52, 2 }
  0x4a   : > { %4293 = vmatpush3.bf16.msra.mxu0 %v4931_v19  ;;  %4260 = vmatprep.mubr.msk.bf16.mxu0 %vm427_vm1, %v5115_v53  ;;  %6348 = vst [vmem:[#allocation14_spill] sm:$0xff] %v5141_v56  ;;  %v5149_v19 = vpack.c.bf16 %v236_v34, %v5137_v49  ;;  %v5168_v34 = vsel %vm1844_vm3, %v1852_v48, %v1854_v23  ;;  %v397_v37 = vrot.slane %v5141_v56, 1  ;;  %v2412_v48 = vrot.slane %v4844_v24, 3 }
  0x4b   : > { %4294 = vmatprep.subr.bf16.mxu0 %v4727_v33  ;;  %v2419_v24 = vrot.slane %v4868_v47, 3  ;;  %v1860_v52 = vrot.slane %v4972_v55, 2 }
  0x4c   : > { %6349 = vst [vmem:[#allocation15_spill] sm:$0xff] %v5149_v19  ;;  %v6324_v43 = vrot.slane %v5149_v19, 2  ;;  %v2413_v56 = vor.u32 %v2412_v48, %v2411_v46  ;;  %v398_v44 = vsel %vm266_vm0, %v393_v63, %v397_v37  ;;  %v1866_v46 = vrot.slane %v5028_v58, 2 }
  0x4e   : > { %4295 = vmatpush3.bf16.msra.mxu0 %v4727_v33  ;;  %v5176_v26 = vsel %vm1844_vm3, %v5160_v39, %v6324_v43  ;;  %v401_v33 = vor.u32 %v5157_v11, %v397_v37  ;;  %v2414_v43 = vrot.slane %v4853_v28, 2  ;;  %v2420_v28 = vor.u32 %v2419_v24, %v2418_v25 }
  0x4f   : > { %4081 = vmatmul.mubr.msk.bf16.gmra.mrb[24].mxu1 %vm427_vm1, %v382_v59  ;;  %4332 = vmatprep.subr.bf16.mxu0 %v5146_v22  ;;  %6352 = vst [vmem:[#allocation18_spill] sm:$0xff] %v5176_v26  ;;  %v1856_v59 = vrot.slane %v4905_v9, 2 }
  0x50   : > { %4084 = vmatprep.mubr.msk.bf16.mxu1 %vm427_vm1, %v390_v51  ;;  %v2415_v51 = vrot.slane %v4850_v27, 3  ;;  %v406_v19 = vsel %vm266_vm0, %v401_v33, %v6353_v30  ;;  %v2422_v30 = vrot.slane %v4912_v15, 2  ;;  %v2431_v33 = vrot.slane %v4921_v17, 3 }
  0x51   : > { %4261 = vmatmul.mubr.msk.bf16.gmra.mrb[4].mxu0 %vm427_vm1, %v5164_v0  ;;  %v5198_v26 = vsel %vm1844_vm3, %v1854_v23, %v1856_v59  ;;  %v5205_v37 = vsel %vm1844_vm3, %v1856_v59, %v1858_v32  ;;  %v2434_v59 = vrot.slane %v4961_v45, 2  ;;  %v5272_v45 = vld [vmem:[%s6300_s1 + $0x30] sm:$0xff]  }
  0x52   : > { %4264 = vmatprep.mubr.msk.bf16.mxu0 %vm427_vm1, %v5168_v34  ;;  %v2416_v11 = vor.u32 %v2415_v51, %v2414_v43  ;;  %v2423_v43 = vrot.slane %v4909_v12, 3  ;;  %v2435_v51 = vrot.slane %v4948_v40, 3 }
  0x54   : > { %v5201_v27 = vsel %vm2410_vm4, %v2413_v56, %v2416_v11  ;;  %v5209_v47 = vsel %vm2410_vm4, %v2416_v11, %v2420_v28  ;;  %v2424_v23 = vor.u32 %v2423_v43, %v2422_v30  ;;  %v2426_v56 = vrot.slane %v4918_v5, 2 }
  0x55   : > { %v2427_v11 = vrot.slane %v4915_v16, 3  ;;  %v2430_v5 = vrot.slane %v4924_v4, 2  ;;  %v2436_v25 = vor.u32 %v2435_v51, %v2434_v59  ;;  %v1870_v30 = vrot.slane %v5074_v54, 2 }
  0x56   : > { %v5225_v63 = vsel %vm2410_vm4, %v2420_v28, %v2424_v23  ;;  %v2438_v28 = vrot.slane %v4983_v62, 2  ;;  %v5333_v51 = vpack.c.bf16 %v5137_v49, %v5137_v49 }
  0x57   : > { %4085 = vmatmul.mubr.msk.bf16.gmra.mrb[28].mxu1 %vm427_vm1, %v398_v44  ;;  %v1862_v44 = vrot.slane %v4975_v57, 2  ;;  %v2428_v12 = vor.u32 %v2427_v11, %v2426_v56  ;;  %v2432_v48 = vor.u32 %v2431_v33, %v2430_v5  ;;  %v1872_v5 = vrot.slane %v5085_v31, 2 }
  0x58   : > { %4088 = vmatprep.mubr.msk.bf16.mxu1 %vm427_vm1, %v406_v19  ;;  %v5222_v19 = vsel %vm1844_vm3, %v1858_v32, %v1860_v52  ;;  %v4730_v32 = vld [vmem:[%s6300_s1 + $0x28] sm:$0xff]   ;;  %v1874_v33 = vrot.slane %v5118_v60, 2 }
  0x59   : > { %4265 = vmatmul.mubr.msk.bf16.gmra.mrb[8].mxu0 %vm427_vm1, %v5198_v26  ;;  %v5230_v15 = vsel %vm1844_vm3, %v1860_v52, %v1862_v44  ;;  %v5237_v16 = vsel %vm2410_vm4, %v2424_v23, %v2428_v12  ;;  %v5251_v4 = vsel %vm2410_vm4, %v2428_v12, %v2432_v48  ;;  %v5265_v40 = vsel %vm2410_vm4, %v2432_v48, %v2436_v25 }
  0x5a   : > { %4268 = vmatprep.mubr.msk.bf16.mxu0 %vm427_vm1, %v5205_v37  ;;  %v2439_v52 = vrot.slane %v4980_v61, 3  ;;  %v2443_v23 = vrot.slane %v4987_v3, 3  ;;  %v2447_v12 = vrot.slane %v5009_v35, 3  ;;  %v5314_v48 = vsel %vm1844_vm3, %v1870_v30, %v1872_v5 }
  0x5b   : > { %v5319_v35 = vsel %vm1844_vm3, %v1872_v5, %v1874_v33 }
  0x5c   : > { %v2440_v43 = vor.u32 %v2439_v52, %v2438_v28  ;;  %v4731_v28 = vld [vmem:[%s6300_s1 + $0x78] sm:$0xff]   ;;  %v3097_v52 = vld [vmem:[%s6301_s2] sm:$0xff] }
  0x5e   : > { %v5284_v56 = vsel %vm2410_vm4, %v2436_v25, %v2440_v43  ;;  %v1880_v25 = vrot.slane %v5333_v51, 2 }
  0x5f   : > { %4089 = vmatmul.mubr.msk.bf16.gmra.mrb[32].mxu1 %vm427_vm1, %v5094_v50  ;;  %v1864_v50 = vrot.slane %v4995_v21, 2 }
  0x60   : > { %4096 = vmatprep.mubr.msk.bf16.mxu1 %vm427_vm1, %v4823_v10  ;;  %v1881_v49 = vsel %vm1844_vm3, %v5160_v39, %v1880_v25  ;;  %v3105_v25 = vld [vmem:[%s6301_s2 + $0x40] sm:$0xff] }
  0x61   : > { %4269 = vmatmul.mubr.msk.bf16.gmra.mrb[12].mxu0 %vm427_vm1, %v5222_v19  ;;  %v5254_v17 = vsel %vm1844_vm3, %v1862_v44, %v1864_v50  ;;  %v5259_v24 = vsel %vm1844_vm3, %v1864_v50, %v1866_v46  ;;  %v2442_v44 = vrot.slane %v4990_v6, 2  ;;  %v2446_v6 = vrot.slane %v5012_v36, 2 }
  0x62   : > { %4272 = vmatprep.mubr.msk.bf16.mxu0 %vm427_vm1, %v5230_v15  ;;  %v1876_v36 = vrot.slane %v5037_v8, 2 }
  0x63   : > { %v2444_v62 = vor.u32 %v2443_v23, %v2442_v44  ;;  %v5307_v50 = vor.u32 %v2447_v12, %v2446_v6  ;;  %v920_v44 = vrot.slane %v4897_v2, 1  ;;  %v922_v23 = vrot.slane %v4905_v9, 1  ;;  %v3103_v12 = vld [vmem:[%s6301_s2 + $0x30] sm:$0xff] }
  0x64   : > { %v5329_v59 = vsel %vm1844_vm3, %v1874_v33, %v1876_v36  ;;  %v924_v33 = vrot.slane %v4926_v18, 1 }
  0x65   : > { %v5297_v3 = vsel %vm2410_vm4, %v2440_v43, %v2444_v62  ;;  %v6354_v43 = vld [vmem:[#allocation2_spill] sm:$0xff]  ;;  %v5468_v5 = vsel %vm908_vm5, %v920_v44, %v922_v23 }
  0x67   : > { %4097 = vmatmul.mubr.msk.bf16.vlgmr.msra.gmra.mrb[0].mxu1 %vm427_vm1, %v4828_v13 }
  0x68   : > { %4100 = vmatprep.mubr.msk.bf16.mxu1 %vm427_vm1, %v4830_v14  ;;  %4133 = vmatpush3.bf16.msra.mxu1 %v4955_v42  ;;  %v1868_v42 = vrot.slane %v5035_v7, 2 }
  0x69   : > { %4273 = vmatmul.mubr.msk.bf16.gmra.mrb[16].mxu0 %vm427_vm1, %v5254_v17  ;;  %4134 = vmatprep.subr.bf16.mxu1 %v4730_v32 }
  0x6a   : > { %4276 = vmatprep.mubr.msk.bf16.mxu0 %vm427_vm1, %v5259_v24  ;;  %v5287_v61 = vsel %vm1844_vm3, %v1866_v46, %v1868_v42  ;;  %v5292_v11 = vsel %vm1844_vm3, %v1868_v42, %v1870_v30  ;;  %v5311_v46 = vsel %vm2410_vm4, %v2444_v62, %v5307_v50  ;;  %v3098_v42 = vld [vmem:[%s6301_s2 + $0x8] sm:$0xff]  ;;  %v3101_v62 = vld [vmem:[%s6301_s2 + $0x20] sm:$0xff] }
  0x6c   : > { %4135 = vmatpush3.bf16.msra.mxu1 %v4730_v32  ;;  %v5339_v32 = vsel %vm1844_vm3, %v1876_v36, %v5160_v39  ;;  %v5372_v39 = vld [vmem:[%s6300_s1 + $0x80] sm:$0xff]   ;;  %v3106_v36 = vld [vmem:[%s6301_s2 + $0x48] sm:$0xff] }
  0x6d   : > { %4172 = vmatprep.subr.bf16.mxu1 %v5272_v45 }
  0x6f   : > { %4101 = vmatmul.mubr.msk.bf16.gmra.mrb[4].mxu1 %vm427_vm1, %v4838_v20 }
  0x70   : > { %4104 = vmatprep.mubr.msk.bf16.mxu1 %vm427_vm1, %v4855_v29 }
  0x71   : > { %4277 = vmatmul.mubr.msk.bf16.gmra.mrb[20].mxu0 %vm427_vm1, %v5287_v61 }
  0x72   : > { %4280 = vmatprep.mubr.msk.bf16.mxu0 %vm427_vm1, %v5292_v11 }
  0x77   : > { %4105 = vmatmul.mubr.msk.bf16.gmra.mrb[8].mxu1 %vm427_vm1, %v4895_v1 }
  0x78   : > { %4108 = vmatprep.mubr.msk.bf16.mxu1 %vm427_vm1, %v4897_v2 }
  0x79   : > { %4281 = vmatmul.mubr.msk.bf16.gmra.mrb[24].mxu0 %vm427_vm1, %v5314_v48 }
  0x7a   : > { %4284 = vmatprep.mubr.msk.bf16.mxu0 %vm427_vm1, %v5319_v35 }
  0x7f   : > { %4109 = vmatmul.mubr.msk.bf16.gmra.mrb[12].mxu1 %vm427_vm1, %v4905_v9 }
  0x80   : > { %4112 = vmatprep.mubr.msk.bf16.mxu1 %vm427_vm1, %v4926_v18 }
  0x81   : > { %4285 = vmatmul.mubr.msk.bf16.gmra.mrb[28].mxu0 %vm427_vm1, %v5329_v59 }
  0x82   : > { %4288 = vmatprep.mubr.msk.bf16.mxu0 %vm427_vm1, %v5339_v32 }
  0x87   : > { %4113 = vmatmul.mubr.msk.bf16.gmra.mrb[16].mxu1 %vm427_vm1, %v4972_v55 }
  0x88   : > { %4116 = vmatprep.mubr.msk.bf16.mxu1 %vm427_vm1, %v4975_v57 }
  0x89   : > { %4289 = vmatmul.mubr.msk.bf16.gmra.mrb[32].mxu0 %vm427_vm1, %v1881_v49  ;;  %v237_v49 = vld [vmem:[%s4812_s5 + $0x140] sm:$0xff] }
  0x8a   : > { %4296 = vmatprep.mubr.msk.bf16.mxu0 %vm427_vm1, %v5110_v41  ;;  %v910_v41 = vrot.slane %v4828_v13, 1  ;;  %v4746_v13 = vmov 0  }
  0x8b   : > { %4717 = vset.pattern.permute.xlu1 %v4746_v13  ;;  %4716 = vset.pattern.permute.xlu0 %v4746_v13  ;;  %v3109_v13 = vld [vmem:[%s6301_s2 + $0x60] sm:$0xff] }
  0x8c   : > { %3135 = vperm.xlu0 %4716, %v3097_v52  }
  0x8f   : > { %4117 = vmatmul.mubr.msk.bf16.gmra.mrb[20].mxu1 %vm427_vm1, %v4995_v21 }
  0x90   : > { %4120 = vmatprep.mubr.msk.bf16.mxu1 %vm427_vm1, %v5028_v58  ;;  %3140 = vperm.xlu0 %4716, %v3098_v42  }
  0x91   : > { %4297 = vmatmul.mubr.msk.bf16.vlgmr.msra.gmra.mrb[0].mxu0 %vm427_vm1, %v5115_v53 }
  0x92   : > { %4333 = vmatpush3.bf16.msra.mxu0 %v5146_v22  ;;  %4300 = vmatprep.mubr.msk.bf16.mxu0 %vm427_vm1, %v5164_v0  ;;  %v909_v0 = vrot.slane %v4823_v10, 1  ;;  %v912_v22 = vrot.slane %v4830_v14, 1  ;;  %v914_v10 = vrot.slane %v4838_v20, 1 }
  0x93   : > { %4334 = vmatprep.subr.bf16.mxu0 %v4731_v28 }
  0x94   : > { %v911_v53 = vsel %vm908_vm5, %v909_v0, %v910_v41  ;;  %3155 = vperm.xlu0 %4716, %v3101_v62   ;;  %v3107_v0 = vld [vmem:[%s6301_s2 + $0x50] sm:$0xff]  ;;  %v932_v62 = vrot.slane %v5028_v58, 1 }
  0x96   : > { %4335 = vmatpush3.bf16.msra.mxu0 %v4731_v28  ;;  %v5491_v28 = vsel %vm908_vm5, %v922_v23, %v924_v33 }
  0x97   : > { %4121 = vmatmul.mubr.msk.bf16.gmra.mrb[24].mxu1 %vm427_vm1, %v5035_v7  ;;  %4372 = vmatprep.subr.bf16.mxu0 %v5372_v39 }
  0x98   : > { %4124 = vmatprep.mubr.msk.bf16.mxu1 %vm427_vm1, %v5074_v54  ;;  %3165 = vperm.xlu0 %4716, %v3103_v12   ;;  %v3114_v12 = vld [vmem:[%s6301_s2 + $0x88] sm:$0xff] }
  0x99   : > { %4301 = vmatmul.mubr.msk.bf16.gmra.mrb[4].mxu0 %vm427_vm1, %v5168_v34  ;;  %v5404_v34 = vsel %vm908_vm5, %v910_v41, %v912_v22 }
  0x9a   : > { %4304 = vmatprep.mubr.msk.bf16.mxu0 %vm427_vm1, %v5198_v26  ;;  %v5407_v26 = vsel %vm908_vm5, %v912_v22, %v914_v10  ;;  %v930_v22 = vrot.slane %v4995_v21, 1 }
  0x9c   : > { %3175 = vperm.xlu0 %4716, %v3105_v25   ;;  %v3116_v25 = vld [vmem:[%s6301_s2 + $0x98] sm:$0xff] }
  0x9f   : > { %4125 = vmatmul.mubr.msk.bf16.gmra.mrb[28].mxu1 %vm427_vm1, %v5085_v31 }
  0xa0   : > { %4128 = vmatprep.mubr.msk.bf16.mxu1 %vm427_vm1, %v5118_v60  ;;  %3185 = vperm.xlu0 %4716, %v3107_v0   ;;  %v3115_v0 = vld [vmem:[%s6301_s2 + $0x90] sm:$0xff] }
  0xa1   : > { %4305 = vmatmul.mubr.msk.bf16.gmra.mrb[8].mxu0 %vm427_vm1, %v5205_v37  ;;  %v4734_v37 = vld [vmem:[%s6300_s1 + $0x38] sm:$0xff]  }
  0xa2   : > { %4308 = vmatprep.mubr.msk.bf16.mxu0 %vm427_vm1, %v5222_v19  ;;  %v916_v19 = vrot.slane %v4855_v29, 1 }
  0xa4   : > { %3195 = vperm.xlu0 %4716, %v3109_v13   ;;  %v3118_v13 = vld [vmem:[%s6301_s2 + $0xa8] sm:$0xff] }
  0xa7   : > { %4129 = vmatmul.mubr.msk.bf16.gmra.mrb[32].mxu1 %vm427_vm1, %v5037_v8 }
  0xa8   : > { %4136 = vmatprep.mubr.msk.bf16.mxu1 %vm427_vm1, %v911_v53  ;;  %v5499_v53 = vpack.c.bf16 %v237_v49, %v237_v49 }
  0xa9   : > { %4309 = vmatmul.mubr.msk.bf16.gmra.mrb[12].mxu0 %vm427_vm1, %v5230_v15  ;;  %v918_v15 = vrot.slane %v4895_v1, 1 }
  0xaa   : > { %4312 = vmatprep.mubr.msk.bf16.mxu0 %vm427_vm1, %v5254_v17  ;;  %v3099_v17 = vld [vmem:[%s6301_s2 + $0x10] sm:$0xff] }
  0xab   : > { %3145 = vperm.xlu1 %4717, %v3099_v17   ;;  %v5439_v30 = vsel %vm908_vm5, %v916_v19, %v918_v15  ;;  %v5462_v6 = vsel %vm908_vm5, %v918_v15, %v920_v44  ;;  %v3111_v17 = vld [vmem:[%s6301_s2 + $0x70] sm:$0xff]  ;;  %v6358_v44 = vld [vmem:[#allocation13_spill] sm:$0xff] }
  0xac   : > { %v1543_v23 = vshrl.u32 %v6358_v44, 16  ;;  %3205 = vperm.xlu0 %4716, %v3111_v17   ;;  %v5608_v17 = vrot.slane %v5037_v8, 1 }
  0xaf   : > { %4137 = vmatmul.mubr.msk.bf16.vlgmr.msra.gmra.mrb[0].mxu1 %vm427_vm1, %v5404_v34 }
  0xb0   : > { %4140 = vmatprep.mubr.msk.bf16.mxu1 %vm427_vm1, %v5407_v26  ;;  %4173 = vmatpush3.bf16.msra.mxu1 %v5272_v45  ;;  %v5433_v45 = vsel %vm908_vm5, %v914_v10, %v916_v19  ;;  %v3110_v10 = vld [vmem:[%s6301_s2 + $0x68] sm:$0xff]  ;;  %v2172_v19 = vrot.slane %v5499_v53, 2 }
  0xb1   : > { %4313 = vmatmul.mubr.msk.bf16.gmra.mrb[16].mxu0 %vm427_vm1, %v5259_v24  ;;  %4174 = vmatprep.subr.bf16.mxu1 %v4734_v37  ;;  %v3100_v24 = vld [vmem:[%s6301_s2 + $0x18] sm:$0xff] }
  0xb2   : > { %4316 = vmatprep.mubr.msk.bf16.mxu0 %vm427_vm1, %v5287_v61  ;;  %3150 = vperm.xlu1 %4717, %v3100_v24   ;;  %v3102_v61 = vld [vmem:[%s6301_s2 + $0x28] sm:$0xff] }
  0xb3   : > { %v6356_v24 = vld [vmem:[#allocation15_spill] sm:$0xff] }
  0xb4   : > { %4175 = vmatpush3.bf16.msra.mxu1 %v4734_v37  ;;  %v6355_v37 = vld [vmem:[#allocation18_spill] sm:$0xff]  ;;  %v6357_v42 = vrot.slane %v6356_v24, 2 }
  0xb5   : > { %4412 = vmatprep.subr.bf16.mxu1 %v6354_v43 }
  0xb6   : > { %3160 = vperm.xlu1 %4717, %v3102_v61   ;;  %v2173_v43 = vsel %vm1844_vm3, %v6357_v42, %v2172_v19  ;;  %v6335_v61 = vshll.u32 %v6358_v44, 16  ;;  %v3122_v42 = vld [vmem:[%s6301_s2 + $0xc8] sm:$0xff] }
  0xb7   : > { %4141 = vmatmul.mubr.msk.bf16.gmra.mrb[4].mxu1 %vm427_vm1, %v5433_v45 }
  0xb8   : > { %4144 = vmatprep.mubr.msk.bf16.mxu1 %vm427_vm1, %v5439_v30 }
  0xb9   : > { %4317 = vmatmul.mubr.msk.bf16.gmra.mrb[20].mxu0 %vm427_vm1, %v5292_v11  ;;  %v3104_v11 = vld [vmem:[%s6301_s2 + $0x38] sm:$0xff] }
  0xba   : > { %4320 = vmatprep.mubr.msk.bf16.mxu0 %vm427_vm1, %v5314_v48  ;;  %3170 = vperm.xlu1 %4717, %v3104_v11   ;;  %v926_v48 = vrot.slane %v4972_v55, 1  ;;  %v934_v11 = vrot.slane %v5035_v7, 1 }
  0xbc   : > { %v5497_v41 = vsel %vm908_vm5, %v924_v33, %v926_v48  ;;  %v3113_v33 = vld [vmem:[%s6301_s2 + $0x80] sm:$0xff] }
  0xbd   : > { %3215 = vperm.xlu0 %4716, %v3113_v33  }
  0xbe   : > { %3180 = vperm.xlu1 %4717, %v3106_v36   ;;  %v1548_v36 = vrot.slane %v6335_v61, 2  ;;  %v2471_v61 = vrot.slane %v5053_v38, 3 }
  0xbf   : > { %4145 = vmatmul.mubr.msk.bf16.gmra.mrb[8].mxu1 %vm427_vm1, %v5462_v6 }
  0xc0   : > { %4148 = vmatprep.mubr.msk.bf16.mxu1 %vm427_vm1, %v5468_v5 }
  0xc1   : > { %4321 = vmatmul.mubr.msk.bf16.gmra.mrb[24].mxu0 %vm427_vm1, %v5319_v35  ;;  %v3108_v35 = vld [vmem:[%s6301_s2 + $0x58] sm:$0xff]  ;;  %3225 = vperm.xlu0 %4716, %v3115_v0  }
  0xc2   : > { %4324 = vmatprep.mubr.msk.bf16.mxu0 %vm427_vm1, %v5329_v59  ;;  %3190 = vperm.xlu1 %4717, %v3108_v35   ;;  %v928_v59 = vrot.slane %v4975_v57, 1  ;;  %v5560_v35 = vsel %vm908_vm5, %v930_v22, %v932_v62  ;;  %v3128_v0 = vld [vmem:[%s6301_s2 + $0xf8] sm:$0xff] }
  0xc4   : > { %v5522_v15 = vsel %vm908_vm5, %v926_v48, %v928_v59  ;;  %v5528_v52 = vsel %vm908_vm5, %v928_v59, %v930_v22  ;;  %v1545_v48 = vrot.slane %v1543_v23, 1  ;;  %v5566_v59 = vsel %vm908_vm5, %v932_v62, %v934_v11 }
  0xc5   : > { %v936_v22 = vrot.slane %v5074_v54, 1 }
  0xc6   : > { %3200 = vperm.xlu1 %4717, %v3110_v10   ;;  %v5557_v49 = vor.u32 %v1548_v36, %v1545_v48  ;;  %v938_v10 = vrot.slane %v5085_v31, 1  ;;  %v3126_v48 = vld [vmem:[%s6301_s2 + $0xe8] sm:$0xff]  ;;  %v3125_v36 = vld [vmem:[%s6301_s2 + $0xe0] sm:$0xff] }
  0xc7   : > { %4149 = vmatmul.mubr.msk.bf16.gmra.mrb[12].mxu1 %vm427_vm1, %v5491_v28  ;;  %v5589_v19 = vsel %vm908_vm5, %v934_v11, %v936_v22 }
  0xc8   : > { %4152 = vmatprep.mubr.msk.bf16.mxu1 %vm427_vm1, %v5497_v41 }
  0xc9   : > { %4325 = vmatmul.mubr.msk.bf16.gmra.mrb[28].mxu0 %vm427_vm1, %v5339_v32  ;;  %v3112_v32 = vld [vmem:[%s6301_s2 + $0x78] sm:$0xff] }
  0xca   : > { %4328 = vmatprep.mubr.msk.bf16.mxu0 %vm427_vm1, %v6355_v37  ;;  %3210 = vperm.xlu1 %4717, %v3112_v32   ;;  %v3117_v37 = vld [vmem:[%s6301_s2 + $0xa0] sm:$0xff]  ;;  %v5595_v32 = vsel %vm908_vm5, %v936_v22, %v938_v10 }
  0xcb   : > { %3235 = vperm.xlu0 %4716, %v3117_v37  }
  0xce   : > { %3220 = vperm.xlu1 %4717, %v3114_v12   ;;  %v3123_v12 = vld [vmem:[%s6301_s2 + $0xd0] sm:$0xff] }
  0xcf   : > { %4153 = vmatmul.mubr.msk.bf16.gmra.mrb[16].mxu1 %vm427_vm1, %v5522_v15 }
  0xd0   : > { %4156 = vmatprep.mubr.msk.bf16.mxu1 %vm427_vm1, %v5528_v52 }
  0xd1   : > { %4329 = vmatmul.mubr.msk.bf16.gmra.mrb[32].mxu0 %vm427_vm1, %v2173_v43  ;;  %v3121_v43 = vld [vmem:[%s6301_s2 + $0xc0] sm:$0xff] }
  0xd2   : > { %4336 = vmatprep.mubr.msk.bf16.mxu0 %vm427_vm1, %v5201_v27  ;;  %3230 = vperm.xlu1 %4717, %v3116_v25   ;;  %v4735_v27 = vld [vmem:[%s6300_s1 + $0x88] sm:$0xff]  }
  0xd6   : > { %3240 = vperm.xlu1 %4717, %v3118_v13  }
  0xd7   : > { %4157 = vmatmul.mubr.msk.bf16.gmra.mrb[20].mxu1 %vm427_vm1, %v5560_v35 }
  0xd8   : > { %4160 = vmatprep.mubr.msk.bf16.mxu1 %vm427_vm1, %v5566_v59 }
  0xd9   : > { %4337 = vmatmul.mubr.msk.bf16.vlgmr.msra.gmra.mrb[0].mxu0 %vm427_vm1, %v5209_v47  ;;  %v3120_v47 = vld [vmem:[%s6301_s2 + $0xb8] sm:$0xff] }
  0xda   : > { %4373 = vmatpush3.bf16.msra.mxu0 %v5372_v39  ;;  %4340 = vmatprep.mubr.msk.bf16.mxu0 %vm427_vm1, %v5225_v63  ;;  %v3119_v39 = vld [vmem:[%s6301_s2 + $0xb0] sm:$0xff]  ;;  %v940_v63 = vrot.slane %v5118_v60, 1 }
  0xdb   : > { %4374 = vmatprep.subr.bf16.mxu0 %v4735_v27  ;;  %3250 = vperm.xlu1 %4717, %v3120_v47   ;;  %v6363_v47 = vld [vmem:[#allocation6_spill] sm:$0xff] }
  0xdc   : > { %3245 = vperm.xlu0 %4716, %v3119_v39   ;;  %v5619_v62 = vsel %vm908_vm5, %v938_v10, %v940_v63  ;;  %v5626_v11 = vsel %vm908_vm5, %v940_v63, %v5608_v17  ;;  %v6361_v10 = vld [vmem:[#allocation4_spill] sm:$0xff]  ;;  %v2455_v39 = vrot.slane %v6363_v47, 3  ;;  %v3130_v63 = vld [vmem:[%s6301_s2 + $0x108] sm:$0xff] }
  0xdd   : > { %v2451_v13 = vrot.slane %v6361_v10, 3 }
  0xde   : > { %4375 = vmatpush3.bf16.msra.mxu0 %v4735_v27  ;;  %v6360_v27 = vld [vmem:[#allocation5_spill] sm:$0xff] }
  0xdf   : > { %4161 = vmatmul.mubr.msk.bf16.gmra.mrb[24].mxu1 %vm427_vm1, %v5589_v19  ;;  %3260 = vperm.xlu1 %4717, %v3122_v42   ;;  %v2450_v22 = vrot.slane %v6360_v27, 2  ;;  %v3129_v42 = vld [vmem:[%s6301_s2 + $0x100] sm:$0xff] }
  0xe0   : > { %4164 = vmatprep.mubr.msk.bf16.mxu1 %vm427_vm1, %v5595_v32  ;;  %3255 = vperm.xlu0 %4716, %v3121_v43  }
  0xe1   : > { %4341 = vmatmul.mubr.msk.bf16.gmra.mrb[4].mxu0 %vm427_vm1, %v5237_v16  ;;  %v3124_v16 = vld [vmem:[%s6301_s2 + $0xd8] sm:$0xff]  ;;  %v2452_v43 = vor.u32 %v2451_v13, %v2450_v22  ;;  %v3131_v22 = vld [vmem:[%s6301_s2 + $0x110] sm:$0xff] }
  0xe2   : > { %4344 = vmatprep.mubr.msk.bf16.mxu0 %vm427_vm1, %v5251_v4  ;;  %v6359_v4 = vld [vmem:[#allocation7_spill] sm:$0xff] }
  0xe3   : > { %3270 = vperm.xlu1 %4717, %v3124_v16   ;;  %v944_v33 = vrot.slane %v6359_v4, 1  ;;  %v6364_v4 = vld [vmem:[#allocation11_spill] sm:$0xff] }
  0xe4   : > { %3265 = vperm.xlu0 %4716, %v3123_v12   ;;  %v2453_v12 = vsel %vm2410_vm4, %v5307_v50, %v2452_v43  ;;  %v4736_v50 = vld [vmem:[%s6300_s1 + $0x40] sm:$0xff]  }
  0xe5   : > { %v945_v25 = vsel %vm908_vm5, %v5608_v17, %v944_v33  ;;  %v6365_v33 = vld [vmem:[#allocation9_spill] sm:$0xff] }
  0xe7   : > { %4165 = vmatmul.mubr.msk.bf16.gmra.mrb[28].mxu1 %vm427_vm1, %v5619_v62  ;;  %3280 = vperm.xlu1 %4717, %v3126_v48   ;;  %v2459_v48 = vrot.slane %v6365_v33, 3 }
  0xe8   : > { %4168 = vmatprep.mubr.msk.bf16.mxu1 %vm427_vm1, %v5626_v11  ;;  %3275 = vperm.xlu0 %4716, %v3125_v36   ;;  %v6366_v36 = vld [vmem:[#allocation16_spill] sm:$0xff] }
  0xe9   : > { %4345 = vmatmul.mubr.msk.bf16.gmra.mrb[8].mxu0 %vm427_vm1, %v5265_v40  ;;  %v3127_v40 = vld [vmem:[%s6301_s2 + $0xf0] sm:$0xff] }
  0xea   : > { %4348 = vmatprep.mubr.msk.bf16.mxu0 %vm427_vm1, %v5284_v56  ;;  %v6362_v56 = vld [vmem:[#allocation10_spill] sm:$0xff] }
  0xeb   : > { %v2454_v37 = vrot.slane %v6362_v56, 2  ;;  %3290 = vperm.xlu1 %4717, %v3128_v0   ;;  %v6367_v0 = vld [vmem:[#allocation12_spill] sm:$0xff] }
  0xec   : > { %3285 = vperm.xlu0 %4716, %v3127_v40   ;;  %v2463_v40 = vrot.slane %v6367_v0, 3 }
  0xed   : > { %v2456_v16 = vor.u32 %v2455_v39, %v2454_v37  ;;  %v6368_v39 = vld [vmem:[#allocation17_spill] sm:$0xff] }
  0xef   : > { %4169 = vmatmul.mubr.msk.bf16.gmra.mrb[32].mxu1 %vm427_vm1, %v945_v25  ;;  %3300 = vperm.xlu1 %4717, %v3130_v63   ;;  %v2462_v25 = vrot.slane %v6366_v36, 2  ;;  %v2466_v63 = vrot.slane %v6368_v39, 2 }
  0xf0   : > { %4176 = vmatprep.mubr.msk.bf16.mxu1 %vm427_vm1, %v5404_v34  ;;  %3295 = vperm.xlu0 %4716, %v3129_v42   ;;  %v3132_v34 = vld [vmem:[%s6301_s2 + $0x118] sm:$0xff]  ;;  %v6369_v42 = vld [vmem:[#allocation14_spill] sm:$0xff] }
  0xf1   : > { %4349 = vmatmul.mubr.msk.bf16.gmra.mrb[12].mxu0 %vm427_vm1, %v5297_v3  ;;  %v2458_v3 = vrot.slane %v6364_v4, 2  ;;  %v2464_v37 = vor.u32 %v2463_v40, %v2462_v25  ;;  %v2474_v25 = vrot.slane %v1543_v23, 2  ;;  %v6371_v40 = vshll.u32 %v6358_v44, 16 }
  0xf2   : > { %4352 = vmatprep.mubr.msk.bf16.mxu0 %vm427_vm1, %v5311_v46  ;;  %v2457_v46 = vsel %vm2410_vm4, %v2452_v43, %v2456_v16  ;;  %v2467_v43 = vrot.slane %v6369_v42, 3  ;;  %v2488_v23 = vshrl.u32 %v5499_v53, 16 }
  0xf3   : > { %3310 = vperm.xlu1 %4717, %v3132_v34   ;;  %v2460_v13 = vor.u32 %v2459_v48, %v2458_v3  ;;  %v2479_v48 = vshrl.u32 %v6356_v24, 16 }
  0xf4   : > { %3305 = vperm.xlu0 %4716, %v3131_v22   ;;  %v2475_v22 = vrot.slane %v6371_v40, 3  ;;  %v6372_v40 = vld [vmem:[#allocation3_spill] sm:$0xff] }
  0xf5   : > { %v2465_v34 = vsel %vm2410_vm4, %v2460_v13, %v2464_v37 }
  0xf7   : > { %4177 = vmatmul.mubr.msk.bf16.vlgmr.msra.gmra.mrb[0].mxu1 %vm427_vm1, %v5407_v26  ;;  %v4737_v26 = vld [vmem:[%s6300_s1 + $0x48] sm:$0xff]  }
  0xf8   : > { %4180 = vmatprep.mubr.msk.bf16.mxu1 %vm427_vm1, %v5433_v45  ;;  %4414 = vmatpush3.bf16.msra.mxu1 %v4736_v50  ;;  %v2461_v45 = vsel %vm2410_vm4, %v2456_v16, %v2460_v13  ;;  %v2468_v16 = vor.u32 %v2467_v43, %v2466_v63 }
  0xf9   : > { %4353 = vmatmul.mubr.msk.bf16.gmra.mrb[16].mxu0 %vm427_vm1, %v2453_v12  ;;  %4413 = vmatprep.subr.bf16.mxu1 %v4737_v26  ;;  %v6370_v12 = vld [vmem:[#allocation8_spill] sm:$0xff] }
  0xfa   : > { %4356 = vmatprep.mubr.msk.bf16.mxu0 %vm427_vm1, %v2457_v46  ;;  %v2470_v50 = vrot.slane %v6370_v12, 2  ;;  %v2482_v46 = vshll.u32 %v6356_v24, 16 }
  0xfc   : > { %4415 = vmatpush3.bf16.msra.mxu1 %v4737_v26  ;;  %v2472_v3 = vor.u32 %v2471_v61, %v2470_v50  ;;  %v2481_v26 = vrot.slane %v2479_v48, 2  ;;  %v2484_v13 = vrot.slane %v2482_v46, 3  ;;  %v2476_v61 = vor.u32 %v2475_v22, %v2474_v25 }
  0xfd   : > { %v2781_v50 = vrot.slane %v4830_v14, 3  ;;  %v2786_v14 = vrot.slane %v4895_v1, 3  ;;  %v1519_v46 = vrot.slane %v6361_v10, 2  ;;  %v1522_v25 = vrot.slane %v6362_v56, 1 }
  0xfe   : > { %v2477_v63 = vsel %vm2410_vm4, %v2472_v3, %v2476_v61 }
  0xff   : > { %4181 = vmatmul.mubr.msk.bf16.gmra.mrb[4].mxu1 %vm427_vm1, %v5439_v30  ;;  %v2469_v30 = vsel %vm2410_vm4, %v2464_v37, %v2468_v16  ;;  %v2491_v37 = vshll.u32 %v5499_v53, 16 }
 0x100   : > { %4184 = vmatprep.mubr.msk.bf16.mxu1 %vm427_vm1, %v5462_v6  ;;  %v2473_v6 = vsel %vm2410_vm4, %v2468_v16, %v2472_v3  ;;  %v2782_v16 = vrot.slane %v4838_v20, 3 }
 0x101   : > { %4357 = vmatmul.mubr.msk.bf16.gmra.mrb[20].mxu0 %vm427_vm1, %v2461_v45  ;;  %v2485_v45 = vor.u32 %v2484_v13, %v2481_v26  ;;  %v2493_v43 = vrot.slane %v2491_v37, 3  ;;  %v1527_v26 = vrot.slane %v6365_v33, 2 }
 0x102   : > { %4360 = vmatprep.mubr.msk.bf16.mxu0 %vm427_vm1, %v2465_v34 }
 0x103   : > { %v2486_v34 = vsel %vm2410_vm4, %v2476_v61, %v2485_v45  ;;  %v1530_v61 = vrot.slane %v6366_v36, 1 }
 0x107   : > { %4185 = vmatmul.mubr.msk.bf16.gmra.mrb[8].mxu1 %vm427_vm1, %v5468_v5  ;;  %v2490_v5 = vrot.slane %v2488_v23, 2  ;;  %v1531_v23 = vrot.slane %v6367_v0, 2  ;;  %v2804_v0 = vrot.slane %v5074_v54, 3  ;;  %v1552_v54 = vshrl.u32 %v5333_v51, 16 }
 0x108   : > { %4188 = vmatprep.mubr.msk.bf16.mxu1 %vm427_vm1, %v5491_v28 }
 0x109   : > { %4361 = vmatmul.mubr.msk.bf16.gmra.mrb[24].mxu0 %vm427_vm1, %v2469_v30  ;;  %v2494_v28 = vor.u32 %v2493_v43, %v2490_v5  ;;  %v1538_v43 = vrot.slane %v6370_v12, 1  ;;  %v2810_v12 = vrot.slane %v5037_v8, 3  ;;  %v2812_v8 = vrot.slane %v6358_v44, 3 }
 0x10a   : > { %4364 = vmatprep.mubr.msk.bf16.mxu0 %vm427_vm1, %v2473_v6  ;;  %v1526_v6 = vrot.slane %v6364_v4, 1  ;;  %v2802_v4 = vrot.slane %v5035_v7, 3  ;;  %v1532_v7 = vor.u32 %v1531_v23, %v1530_v61 }
 0x10b   : > { %v2495_v3 = vsel %vm2410_vm4, %v2485_v45, %v2494_v28  ;;  %v1534_v45 = vrot.slane %v6368_v39, 1  ;;  %v2806_v39 = vrot.slane %v5085_v31, 3  ;;  %v1555_v31 = vshll.u32 %v5333_v51, 16 }
 0x10c   : > { %v1528_v56 = vor.u32 %v1527_v26, %v1526_v6 }
 0x10f   : > { %4189 = vmatmul.mubr.msk.bf16.gmra.mrb[12].mxu1 %vm427_vm1, %v5497_v41  ;;  %v2783_v41 = vsel %vm2780_vm6, %v2781_v50, %v2782_v16  ;;  %v2805_v50 = vsel %vm2780_vm6, %v2802_v4, %v2804_v0 }
 0x110   : > { %4192 = vmatprep.mubr.msk.bf16.mxu1 %vm427_vm1, %v5522_v15  ;;  %v2784_v15 = vrot.slane %v4855_v29, 3  ;;  %v2790_v29 = vrot.slane %v4905_v9, 3  ;;  %v2794_v9 = vrot.slane %v4972_v55, 3 }
 0x111   : > { %4365 = vmatmul.mubr.msk.bf16.gmra.mrb[28].mxu0 %vm427_vm1, %v2477_v63  ;;  %v1535_v63 = vrot.slane %v6369_v42, 2  ;;  %v1533_v42 = vsel %vm1474_vm2, %v1528_v56, %v1532_v7 }
 0x112   : > { %4368 = vmatprep.mubr.msk.bf16.mxu0 %vm427_vm1, %v2486_v34  ;;  %v2785_v20 = vsel %vm2780_vm6, %v2782_v16, %v2784_v15  ;;  %v1539_v34 = vrot.slane %v5053_v38, 2  ;;  %v2807_v16 = vsel %vm2780_vm6, %v2804_v0, %v2806_v39  ;;  %v2808_v38 = vrot.slane %v5118_v60, 3 }
 0x113   : > { %v1536_v36 = vor.u32 %v1535_v63, %v1534_v45  ;;  %v2814_v60 = vrot.slane %v6356_v24, 3 }
 0x115   : > { %v1537_v28 = vsel %vm1474_vm2, %v1532_v7, %v1536_v36 }
 0x117   : > { %4193 = vmatmul.mubr.msk.bf16.gmra.mrb[16].mxu1 %vm427_vm1, %v5528_v52  ;;  %v2787_v52 = vsel %vm2780_vm6, %v2784_v15, %v2786_v14  ;;  %v1554_v15 = vrot.slane %v1552_v54, 1 }
 0x118   : > { %4196 = vmatprep.mubr.msk.bf16.mxu1 %vm427_vm1, %v5560_v35  ;;  %v2788_v35 = vrot.slane %v4897_v2, 3  ;;  %v2792_v2 = vrot.slane %v4926_v18, 3  ;;  %v1236_v18 = vrot.slane %v5333_v51, 1  ;;  %v2811_v51 = vsel %vm2780_vm6, %v2808_v38, %v2810_v12 }
 0x119   : > { %4369 = vmatmul.mubr.msk.bf16.gmra.mrb[32].mxu0 %vm427_vm1, %v2495_v3  ;;  %v1540_v3 = vor.u32 %v1539_v34, %v1538_v43 }
 0x11a   : > { %4376 = vmatprep.mubr.msk.bf16.mxu0 %vm427_vm1, %v2783_v41  ;;  %v2789_v1 = vsel %vm2780_vm6, %v2786_v14, %v2788_v35  ;;  %v2793_v30 = vsel %vm2780_vm6, %v2790_v29, %v2792_v2  ;;  %v1557_v14 = vrot.slane %v1555_v31, 2 }
 0x11b   : > { %v1541_v41 = vsel %vm1474_vm2, %v1536_v36, %v1540_v3 }
 0x11f   : > { %4197 = vmatmul.mubr.msk.bf16.gmra.mrb[20].mxu1 %vm427_vm1, %v5566_v59  ;;  %v2791_v59 = vsel %vm2780_vm6, %v2788_v35, %v2790_v29  ;;  %v1558_v35 = vor.u32 %v1557_v14, %v1554_v15 }
 0x120   : > { %4200 = vmatprep.mubr.msk.bf16.mxu1 %vm427_vm1, %v5589_v19  ;;  %v1234_v19 = vrot.slane %v6358_v44, 1 }
 0x121   : > { %4377 = vmatmul.mubr.msk.bf16.vlgmr.msra.gmra.mrb[0].mxu0 %vm427_vm1, %v2785_v20  ;;  %v1550_v20 = vsel %vm1474_vm2, %v1540_v3, %v5557_v49  ;;  %v1559_v29 = vsel %vm1474_vm2, %v5557_v49, %v1558_v35 }
 0x122   : > { %4380 = vmatprep.mubr.msk.bf16.mxu0 %vm427_vm1, %v2787_v52  ;;  %v1235_v48 = vsel %vm908_vm5, %v5608_v17, %v1234_v19  ;;  %v2796_v17 = vrot.slane %v4975_v57, 3  ;;  %v1237_v10 = vsel %vm908_vm5, %v1234_v19, %v1236_v18  ;;  %v2809_v52 = vsel %vm2780_vm6, %v2806_v39, %v2808_v38 }
 0x123   : > { %v2816_v19 = vrot.slane %v5499_v53, 3 }
 0x124   : > { %v2797_v13 = vsel %vm2780_vm6, %v2794_v9, %v2796_v17 }
 0x127   : > { %4201 = vmatmul.mubr.msk.bf16.gmra.mrb[24].mxu1 %vm427_vm1, %v5595_v32  ;;  %v1518_v32 = vrot.slane %v6360_v27, 1  ;;  %v2798_v27 = vrot.slane %v4995_v21, 3 }
 0x128   : > { %4204 = vmatprep.mubr.msk.bf16.mxu1 %vm427_vm1, %v5619_v62  ;;  %v2795_v62 = vsel %vm2780_vm6, %v2792_v2, %v2794_v9  ;;  %v2817_v2 = vsel %vm2780_vm6, %v2814_v60, %v2816_v19  ;;  %v3136_v9 = vpop.permute.xlu0 %3135 }
 0x129   : > { %4381 = vmatmul.mubr.msk.bf16.gmra.mrb[4].mxu0 %vm427_vm1, %v2789_v1  ;;  %v1520_v55 = vor.u32 %v1519_v46, %v1518_v32  ;;  %v2799_v57 = vsel %vm2780_vm6, %v2796_v17, %v2798_v27  ;;  %v2813_v1 = vsel %vm2780_vm6, %v2810_v12, %v2812_v8 }
 0x12a   : > { %4384 = vmatprep.mubr.msk.bf16.mxu0 %vm427_vm1, %v2791_v59  ;;  %v2815_v59 = vsel %vm2780_vm6, %v2812_v8, %v2814_v60  ;;  %v3146_v24 = vpop.permute.xlu1 %3145 }
 0x12b   : > { %v1521_v22 = vsel %vm1474_vm2, %v6372_v40, %v1520_v55 }
 0x12f   : > { %4205 = vmatmul.mubr.msk.bf16.gmra.mrb[28].mxu1 %vm427_vm1, %v5626_v11  ;;  %v1523_v11 = vrot.slane %v6363_v47, 2  ;;  %v2800_v47 = vrot.slane %v5028_v58, 3 }
 0x130   : > { %4208 = vmatprep.mubr.msk.bf16.mxu1 %vm427_vm1, %v1235_v48 }
 0x131   : > { %4385 = vmatmul.mubr.msk.bf16.gmra.mrb[8].mxu0 %vm427_vm1, %v2793_v30  ;;  %v1524_v21 = vor.u32 %v1523_v11, %v1522_v25  ;;  %v2801_v5 = vsel %vm2780_vm6, %v2798_v27, %v2800_v47  ;;  %v2803_v58 = vsel %vm2780_vm6, %v2800_v47, %v2802_v4  ;;  %v3151_v46 = vpop.permute.xlu1 %3150  ;;  %v3141_v30 = vpop.permute.xlu0 %3140 }
 0x132   : > { %4388 = vmatprep.mubr.msk.bf16.mxu0 %vm427_vm1, %v2795_v62 }
 0x133   : > { %v1525_v33 = vsel %vm1474_vm2, %v1520_v55, %v1524_v21  ;;  %v1529_v37 = vsel %vm1474_vm2, %v1524_v21, %v1528_v56 }
 0x135   : > { %v3161_v27 = vpop.permute.xlu1 %3160 }
 0x137   : > { %4209 = vmatmul.mubr.msk.bf16.gmra.mrb[32].mxu1 %vm427_vm1, %v1237_v10  ;;  %v3156_v10 = vpop.permute.xlu0 %3155 }
 0x138   : > { %4236 = vmatprep.mubr.msk.bf16.mxu1 %vm427_vm1, %v1521_v22 }
 0x139   : > { %4389 = vmatmul.mubr.msk.bf16.gmra.mrb[12].mxu0 %vm427_vm1, %v2797_v13  ;;  %v3171_v11 = vpop.permute.xlu1 %3170 }
 0x13a   : > { %4392 = vmatprep.mubr.msk.bf16.mxu0 %vm427_vm1, %v2799_v57 }
 0x13b   : > { %v3166_v22 = vpop.permute.xlu0 %3165 }
 0x13d   : > { %v5849_v26 = vpop.permute.xlu1 %3180 }
 0x13f   : > { %4237 = vmatmul.mubr.msk.bf16.vlgmr.msra.gmra.mrb[20].mxu1 %vm427_vm1, %v1525_v33  ;;  %v5853_v57 = vpop.permute.xlu0 %3175 }
 0x140   : > { %4240 = vmatprep.mubr.msk.bf16.mxu1 %vm427_vm1, %v1529_v37 }
 0x141   : > { %4393 = vmatmul.mubr.msk.bf16.gmra.mrb[16].mxu0 %vm427_vm1, %v2801_v5  ;;  %v3191_v4 = vpop.permute.xlu1 %3190 }
 0x142   : > { %4396 = vmatprep.mubr.msk.bf16.mxu0 %vm427_vm1, %v2803_v58 }
 0x143   : > { %v3186_v33 = vpop.permute.xlu0 %3185 }
 0x145   : > { %v5869_v63 = vpop.permute.xlu1 %3200 }
 0x147   : > { %4241 = vmatmul.mubr.msk.bf16.gmra.mrb[24].mxu1 %vm427_vm1, %v1533_v42  ;;  %v5871_v5 = vpop.permute.xlu0 %3195 }
 0x148   : > { %4244 = vmatprep.mubr.msk.bf16.mxu1 %vm427_vm1, %v1537_v28 }
 0x149   : > { %4397 = vmatmul.mubr.msk.bf16.gmra.mrb[20].mxu0 %vm427_vm1, %v2805_v50  ;;  %v5874_v58 = vpop.permute.xlu1 %3210 }
 0x14a   : > { %4400 = vmatprep.mubr.msk.bf16.mxu0 %vm427_vm1, %v2807_v16 }
 0x14b   : > { %v5876_v36 = vpop.permute.xlu0 %3205 }
 0x14d   : > { %v5892_v31 = vpop.permute.xlu1 %3220 }
 0x14f   : > { %4245 = vmatmul.mubr.msk.bf16.gmra.mrb[28].mxu1 %vm427_vm1, %v1541_v41  ;;  %v5899_v12 = vpop.permute.xlu0 %3215 }
 0x150   : > { %4248 = vmatprep.mubr.msk.bf16.mxu1 %vm427_vm1, %v1550_v20 }
 0x151   : > { %4401 = vmatmul.mubr.msk.bf16.gmra.mrb[24].mxu0 %vm427_vm1, %v2809_v52  ;;  %v5909_v60 = vpop.permute.xlu1 %3230 }
 0x152   : > { %4404 = vmatprep.mubr.msk.bf16.mxu0 %vm427_vm1, %v2811_v51 }
 0x157   : > { %4249 = vmatmul.mubr.msk.bf16.gmra.mrb[32].mxu1 %vm427_vm1, %v1559_v29 }
 0x159   : > { %4405 = vmatmul.mubr.msk.bf16.gmra.mrb[28].mxu0 %vm427_vm1, %v2813_v1 }
 0x15a   : > { %4408 = vmatprep.mubr.msk.bf16.mxu0 %vm427_vm1, %v2815_v59  ;;  %v3226_v59 = vpop.permute.xlu0 %3225 }
 0x161   : > { %4409 = vmatmul.mubr.msk.bf16.gmra.mrb[32].mxu0 %vm427_vm1, %v2817_v2 }
 0x1ca   : > { %v4178_v44 = vpop.f32.mrb[0].mxu1 }
 0x1cb   : > { %v1290_v49 = vpop.f32.mrb[1].mxu1 }
 0x1cc   : > { %v4179_v48 = vpop.f32.mrb[2].mxu1 }
 0x1cd   : > { %v1293_v32 = vpop.f32.mrb[3].mxu1 }
 0x1d2   : > { %v4182_v62 = vpop.f32.mrb[4].mxu1 }
 0x1d3   : > { %v1306_v18 = vpop.f32.mrb[5].mxu1 }
 0x1d4   : > { %v4183_v55 = vpop.f32.mrb[6].mxu1 }
 0x1d5   : > { %v1309_v17 = vpop.f32.mrb[7].mxu1 }
 0x1da   : > { %v4186_v25 = vpop.f32.mrb[8].mxu1 }
 0x1db   : > { %v5843_v53 = vpop.f32.mrb[9].mxu1 }
 0x1dc   : > { %v5845_v40 = vpop.f32.mrb[10].mxu1 }
 0x1dd   : > { %v5847_v6 = vpop.f32.mrb[11].mxu1 }
 0x1e2   : > { %v5851_v13 = vpop.f32.mrb[12].mxu1 }
 0x1e3   : > { %v5855_v21 = vpop.f32.mrb[13].mxu1 }
 0x1e4   : > { %v5857_v56 = vpop.f32.mrb[14].mxu1 }
 0x1e5   : > { %v5859_v47 = vpop.f32.mrb[15].mxu1 }
 0x1ea   : > { %v5861_v61 = vpop.f32.mrb[16].mxu1 }
 0x1eb   : > { %v5863_v23 = vpop.f32.mrb[17].mxu1 }
 0x1ec   : > { %v5865_v37 = vpop.f32.mrb[18].mxu1 }
 0x1ed   : > { %v5867_v45 = vpop.f32.mrb[19].mxu1 }
 0x1f4   : > { %v4378_v7 = vpop.f32.mrb[0].mxu0 }
 0x1f5   : > { %v4416_v0 = vadd.f32 %v4378_v7, %v4178_v44  ;;  %v2918_v39 = vpop.f32.mrb[1].mxu0 }
 0x1f6   : > { %v4417_v42 = vadd.f32 %v2918_v39, %v1290_v49  ;;  %v4379_v43 = vpop.f32.mrb[2].mxu0  ;;  %v5929_v49 = vpop.permute.xlu1 %3240 }
 0x1f7   : > { %v5883_v34 = vmul.f32 %v4416_v0, %v3146_v24  ;;  %v4418_v28 = vadd.f32 %v4379_v43, %v4179_v48  ;;  %v2921_v50 = vpop.f32.mrb[3].mxu0 }
 0x1f8   : > { %v5885_v16 = vmul.f32 %v4417_v42, %v3136_v9  ;;  %v4419_v3 = vadd.f32 %v2921_v50, %v1293_v32 }
 0x1f9   : > { %3352 = vst.msk [vmem:[%s5881_s22 + $0x10] sm:$0xff] %vm3349_vm7, %v5883_v34  ;;  %v5890_v54 = vmul.f32 %v4418_v28, %v3151_v46  ;;  %v5932_v46 = vpop.permute.xlu0 %3235 }
 0x1fa   : > { %3350 = vst.msk [vmem:[%s5881_s22] sm:$0xff] %vm3349_vm7, %v5885_v16  ;;  %v5897_v38 = vmul.f32 %v4419_v3, %v3141_v30 }
 0x1fb   : > { %3353 = vst.msk [vmem:[%s5881_s22 + $0x18] sm:$0xff] %vm3349_vm7, %v5890_v54 }
 0x1fc   : > { %3351 = vst.msk [vmem:[%s5881_s22 + $0x8] sm:$0xff] %vm3349_vm7, %v5897_v38  ;;  %v4382_v41 = vpop.f32.mrb[4].mxu0 }
 0x1fd   : > { %v4420_v15 = vadd.f32 %v4382_v41, %v4182_v62  ;;  %v2934_v14 = vpop.f32.mrb[5].mxu0 }
 0x1fe   : > { %v4421_v20 = vadd.f32 %v2934_v14, %v1306_v18  ;;  %v4383_v52 = vpop.f32.mrb[6].mxu0 }
 0x1ff   : > { %v5907_v51 = vmul.f32 %v4420_v15, %v3166_v22  ;;  %v4422_v35 = vadd.f32 %v4383_v52, %v4183_v55  ;;  %v2937_v8 = vpop.f32.mrb[7].mxu0 }
 0x200   : > { %v5911_v29 = vmul.f32 %v4421_v20, %v3156_v10  ;;  %v4423_v1 = vadd.f32 %v2937_v8, %v1309_v17 }
 0x201   : > { %3356 = vst.msk [vmem:[%s5881_s22 + $0x30] sm:$0xff] %vm3349_vm7, %v5907_v51  ;;  %v5916_v19 = vmul.f32 %v4422_v35, %v3171_v11  ;;  %v3246_v11 = vpop.permute.xlu0 %3245 }
 0x202   : > { %3354 = vst.msk [vmem:[%s5881_s22 + $0x20] sm:$0xff] %vm3349_vm7, %v5911_v29  ;;  %v5921_v2 = vmul.f32 %v4423_v1, %v3161_v27 }
 0x203   : > { %3357 = vst.msk [vmem:[%s5881_s22 + $0x38] sm:$0xff] %vm3349_vm7, %v5916_v19 }
 0x204   : > { %3355 = vst.msk [vmem:[%s5881_s22 + $0x28] sm:$0xff] %vm3349_vm7, %v5921_v2  ;;  %v4386_v24 = vpop.f32.mrb[8].mxu0 }
 0x205   : > { %v4424_v44 = vadd.f32 %v4386_v24, %v4186_v25  ;;  %v2950_v9 = vpop.f32.mrb[9].mxu0  ;;  %v3251_v25 = vpop.permute.xlu1 %3250 }
 0x206   : > { %v4425_v48 = vadd.f32 %v2950_v9, %v5843_v53  ;;  %v4387_v32 = vpop.f32.mrb[10].mxu0  ;;  %v3256_v39 = vpop.permute.xlu0 %3255 }
 0x207   : > { %v5934_v30 = vmul.f32 %v4424_v44, %v3186_v33  ;;  %v4426_v62 = vadd.f32 %v4387_v32, %v5845_v40  ;;  %v2953_v18 = vpop.f32.mrb[11].mxu0 }
 0x208   : > { %v5938_v55 = vmul.f32 %v4425_v48, %v5853_v57  ;;  %v4427_v17 = vadd.f32 %v2953_v18, %v5847_v6 }
 0x209   : > { %3360 = vst.msk [vmem:[%s5881_s22 + $0x50] sm:$0xff] %vm3349_vm7, %v5934_v30  ;;  %v5944_v27 = vmul.f32 %v4426_v62, %v3191_v4 }
 0x20a   : > { %3358 = vst.msk [vmem:[%s5881_s22 + $0x40] sm:$0xff] %vm3349_vm7, %v5938_v55  ;;  %v5950_v10 = vmul.f32 %v4427_v17, %v5849_v26  ;;  %v3266_v35 = vpop.permute.xlu0 %3265 }
 0x20b   : > { %3361 = vst.msk [vmem:[%s5881_s22 + $0x58] sm:$0xff] %vm3349_vm7, %v5944_v27 }
 0x20c   : > { %3359 = vst.msk [vmem:[%s5881_s22 + $0x48] sm:$0xff] %vm3349_vm7, %v5950_v10  ;;  %v4390_v53 = vpop.f32.mrb[12].mxu0 }
 0x20d   : > { %v4428_v40 = vadd.f32 %v4390_v53, %v5851_v13  ;;  %v2966_v22 = vpop.f32.mrb[13].mxu0 }
 0x20e   : > { %v4429_v6 = vadd.f32 %v2966_v22, %v5855_v21  ;;  %v4391_v57 = vpop.f32.mrb[14].mxu0  ;;  %v5974_v21 = vpop.permute.xlu1 %3260 }
 0x20f   : > { %v5961_v26 = vmul.f32 %v4428_v40, %v5876_v36  ;;  %v4430_v4 = vadd.f32 %v4391_v57, %v5857_v56  ;;  %v2969_v33 = vpop.f32.mrb[15].mxu0  ;;  %v3276_v40 = vpop.permute.xlu0 %3275 }
 0x210   : > { %v5965_v7 = vmul.f32 %v4429_v6, %v5871_v5  ;;  %v4431_v0 = vadd.f32 %v2969_v33, %v5859_v47 }
 0x211   : > { %3364 = vst.msk [vmem:[%s5881_s22 + $0x70] sm:$0xff] %vm3349_vm7, %v5961_v26  ;;  %v5972_v13 = vmul.f32 %v4430_v4, %v5874_v58 }
 0x212   : > { %3362 = vst.msk [vmem:[%s5881_s22 + $0x60] sm:$0xff] %vm3349_vm7, %v5965_v7  ;;  %v5980_v36 = vmul.f32 %v4431_v0, %v5869_v63  ;;  %v4238_v56 = vpop.f32.mrb[20].mxu1  ;;  %v3271_v52 = vpop.permute.xlu1 %3270 }
 0x213   : > { %3365 = vst.msk [vmem:[%s5881_s22 + $0x78] sm:$0xff] %vm3349_vm7, %v5972_v13  ;;  %v1740_v47 = vpop.f32.mrb[21].mxu1 }
 0x214   : > { %3363 = vst.msk [vmem:[%s5881_s22 + $0x68] sm:$0xff] %vm3349_vm7, %v5980_v36  ;;  %v4394_v5 = vpop.f32.mrb[16].mxu0  ;;  %v4239_v58 = vpop.f32.mrb[22].mxu1 }
 0x215   : > { %v4432_v42 = vadd.f32 %v4394_v5, %v5861_v61  ;;  %v2982_v43 = vpop.f32.mrb[17].mxu0  ;;  %v1743_v28 = vpop.f32.mrb[23].mxu1 }
 0x216   : > { %v4433_v63 = vadd.f32 %v2982_v43, %v5863_v23  ;;  %v4395_v50 = vpop.f32.mrb[18].mxu0  ;;  %v3281_v17 = vpop.permute.xlu1 %3280 }
 0x217   : > { %v5990_v3 = vmul.f32 %v4432_v42, %v3226_v59  ;;  %v4434_v41 = vadd.f32 %v4395_v50, %v5865_v37  ;;  %v2985_v15 = vpop.f32.mrb[19].mxu0  ;;  %v3286_v43 = vpop.permute.xlu0 %3285 }
 0x218   : > { %v5994_v14 = vmul.f32 %v4433_v63, %v5899_v12  ;;  %v4435_v20 = vadd.f32 %v2985_v15, %v5867_v45 }
 0x219   : > { %3368 = vst.msk [vmem:[%s5881_s22 + $0x90] sm:$0xff] %vm3349_vm7, %v5990_v3  ;;  %v6001_v61 = vmul.f32 %v4434_v41, %v5909_v60 }
 0x21a   : > { %3366 = vst.msk [vmem:[%s5881_s22 + $0x80] sm:$0xff] %vm3349_vm7, %v5994_v14  ;;  %v6007_v23 = vmul.f32 %v4435_v20, %v5892_v31  ;;  %v4242_v37 = vpop.f32.mrb[24].mxu1  ;;  %v3291_v50 = vpop.permute.xlu1 %3290 }
 0x21b   : > { %3369 = vst.msk [vmem:[%s5881_s22 + $0x98] sm:$0xff] %vm3349_vm7, %v6001_v61  ;;  %v1756_v45 = vpop.f32.mrb[25].mxu1 }
 0x21c   : > { %3367 = vst.msk [vmem:[%s5881_s22 + $0x88] sm:$0xff] %vm3349_vm7, %v6007_v23  ;;  %v4398_v12 = vpop.f32.mrb[20].mxu0  ;;  %v4243_v8 = vpop.f32.mrb[26].mxu1 }
 0x21d   : > { %v4436_v60 = vadd.f32 %v4398_v12, %v4238_v56  ;;  %v2998_v1 = vpop.f32.mrb[21].mxu0  ;;  %v1759_v59 = vpop.f32.mrb[27].mxu1 }
 0x21e   : > { %v4437_v24 = vadd.f32 %v2998_v1, %v1740_v47  ;;  %v4399_v31 = vpop.f32.mrb[22].mxu0 }
 0x21f   : > { %v6015_v44 = vmul.f32 %v4436_v60, %v3246_v11  ;;  %v4438_v9 = vadd.f32 %v4399_v31, %v4239_v58  ;;  %v3001_v48 = vpop.f32.mrb[23].mxu0  ;;  %v3296_v60 = vpop.permute.xlu0 %3295 }
 0x220   : > { %v6018_v32 = vmul.f32 %v4437_v24, %v5932_v46  ;;  %v4439_v62 = vadd.f32 %v3001_v48, %v1743_v28  ;;  %v3301_v31 = vpop.permute.xlu1 %3300 }
 0x221   : > { %3372 = vst.msk [vmem:[%s5881_s22 + $0xb0] sm:$0xff] %vm3349_vm7, %v6015_v44  ;;  %v6023_v18 = vmul.f32 %v4438_v9, %v3251_v25 }
 0x222   : > { %3370 = vst.msk [vmem:[%s5881_s22 + $0xa0] sm:$0xff] %vm3349_vm7, %v6018_v32  ;;  %v6029_v53 = vmul.f32 %v4439_v62, %v5929_v49  ;;  %v4246_v11 = vpop.f32.mrb[28].mxu1 }
 0x223   : > { %3373 = vst.msk [vmem:[%s5881_s22 + $0xb8] sm:$0xff] %vm3349_vm7, %v6023_v18  ;;  %v1772_v46 = vpop.f32.mrb[29].mxu1 }
 0x224   : > { %3371 = vst.msk [vmem:[%s5881_s22 + $0xa8] sm:$0xff] %vm3349_vm7, %v6029_v53  ;;  %v4402_v25 = vpop.f32.mrb[24].mxu0  ;;  %v4247_v22 = vpop.f32.mrb[30].mxu1 }
 0x225   : > { %v4440_v6 = vadd.f32 %v4402_v25, %v4242_v37  ;;  %v3014_v57 = vpop.f32.mrb[25].mxu0  ;;  %v1775_v4 = vpop.f32.mrb[31].mxu1 }
 0x226   : > { %v4441_v33 = vadd.f32 %v3014_v57, %v1756_v45  ;;  %v4403_v49 = vpop.f32.mrb[26].mxu0  ;;  %v3311_v57 = vpop.permute.xlu1 %3310 }
 0x227   : > { %v6037_v0 = vmul.f32 %v4440_v6, %v3266_v35  ;;  %v4442_v56 = vadd.f32 %v4403_v49, %v4243_v8  ;;  %v3017_v47 = vpop.f32.mrb[27].mxu0 }
 0x228   : > { %v6039_v5 = vmul.f32 %v4441_v33, %v3256_v39  ;;  %v4443_v58 = vadd.f32 %v3017_v47, %v1759_v59  ;;  %v4747_v47 = vmov (!%p3869_p4), 0.0  }
 0x229   : > { %3376 = vst.msk [vmem:[%s5881_s22 + $0xd0] sm:$0xff] %vm3349_vm7, %v6037_v0  ;;  %v6044_v42 = vmul.f32 %v4442_v56, %v3271_v52 }
 0x22a   : > { %3374 = vst.msk [vmem:[%s5881_s22 + $0xc0] sm:$0xff] %vm3349_vm7, %v6039_v5  ;;  %v6050_v28 = vmul.f32 %v4443_v58, %v5974_v21  ;;  %v4250_v63 = vpop.f32.mrb[32].mxu1 }
 0x22b   : > { %3377 = vst.msk [vmem:[%s5881_s22 + $0xd8] sm:$0xff] %vm3349_vm7, %v6044_v42  ;;  %v1788_v39 = vpop.f32.mrb[33].mxu1 }
 0x22c   : > { %3375 = vst.msk [vmem:[%s5881_s22 + $0xc8] sm:$0xff] %vm3349_vm7, %v6050_v28  ;;  %v4406_v41 = vpop.f32.mrb[28].mxu0  ;;  %v4251_v15 = vpop.f32.mrb[34].mxu1 }
 0x22d   : > { %v4444_v20 = vadd.f32 %v4406_v41, %v4246_v11  ;;  %v3030_v52 = vpop.f32.mrb[29].mxu0  ;;  %v1791_v37 = vpop.f32.mrb[35].mxu1  ;;  %3391 = vst.msk [vmem:[%s6303_s4] sm:$0x3] (!%p3869_p4), %vm3390_vm8, %v4747_v47 }
 0x22e   : > { %v4445_v21 = vadd.f32 %v3030_v52, %v1772_v46  ;;  %v4407_v35 = vpop.f32.mrb[30].mxu0 }
 0x22f   : > { %v6058_v45 = vmul.f32 %v4444_v20, %v3286_v43  ;;  %v4446_v12 = vadd.f32 %v4407_v35, %v4247_v22  ;;  %v3033_v8 = vpop.f32.mrb[31].mxu0 }
 0x230   : > { %v6060_v1 = vmul.f32 %v4445_v21, %v3276_v40  ;;  %v4447_v59 = vadd.f32 %v3033_v8, %v1775_v4  ;;  %v3306_v40 = vpop.permute.xlu0 %3305 }
 0x231   : > { %3380 = vst.msk [vmem:[%s5881_s22 + $0xf0] sm:$0xff] %vm3349_vm7, %v6058_v45  ;;  %v6065_v24 = vmul.f32 %v4446_v12, %v3291_v50 }
 0x232   : > { %3378 = vst.msk [vmem:[%s5881_s22 + $0xe0] sm:$0xff] %vm3349_vm7, %v6060_v1  ;;  %v6070_v9 = vmul.f32 %v4447_v59, %v3281_v17 }
 0x233   : > { %3381 = vst.msk [vmem:[%s5881_s22 + $0xf8] sm:$0xff] %vm3349_vm7, %v6065_v24 }
 0x234   : > { %3379 = vst.msk [vmem:[%s5881_s22 + $0xe8] sm:$0xff] %vm3349_vm7, %v6070_v9  ;;  %v4410_v48 = vpop.f32.mrb[32].mxu0 }
 0x235   : > { %v4448_v62 = vadd.f32 %v4410_v48, %v4250_v63  ;;  %v3046_v11 = vpop.f32.mrb[33].mxu0 }
 0x236   : > { %v4449_v46 = vadd.f32 %v3046_v11, %v1788_v39  ;;  %v4411_v25 = vpop.f32.mrb[34].mxu0  ;;  %3389 = sbr.rel (%p3869_p4) target bundleno = 573 (0x23d), region = 36 }
 0x237   : > { %v6078_v22 = vmul.f32 %v4448_v62, %v3306_v40  ;;  %v4450_v6 = vadd.f32 %v4411_v25, %v4251_v15  ;;  %v3049_v17 = vpop.f32.mrb[35].mxu0 }
 0x238   : > { %v6080_v4 = vmul.f32 %v4449_v46, %v3296_v60  ;;  %v4451_v33 = vadd.f32 %v3049_v17, %v1791_v37 }
 0x239   : > { %3384 = vst.msk [vmem:[%s5881_s22 + $0x110] sm:$0xff] %vm3349_vm7, %v6078_v22  ;;  %v6085_v49 = vmul.f32 %v4450_v6, %v3311_v57 }
 0x23a   : > { %3382 = vst.msk [vmem:[%s5881_s22 + $0x100] sm:$0xff] %vm3349_vm7, %v6080_v4  ;;  %v6090_v56 = vmul.f32 %v4451_v33, %v3301_v31 }
 0x23b   : > { %3385 = vst.msk [vmem:[%s5881_s22 + $0x118] sm:$0xff] %vm3349_vm7, %v6085_v49 }
 0x23c   : > { %3383 = vst.msk [vmem:[%s5881_s22 + $0x108] sm:$0xff] %vm3349_vm7, %v6090_v56 }
 0x23d PF: > { %v3393_v58 = vsel %vm3349_vm7, %v5885_v16, 0.0  ;;  %v3394_v43 = vsel %vm3349_vm7, %v5897_v38, 0.0  ;;  %v3396_v63 = vsel %vm3349_vm7, %v5883_v34, 0.0  ;;  %v3398_v39 = vsel %vm3349_vm7, %v5890_v54, 0.0 }
 0x23e   : > { %v3395_v50 = vadd.f32 %v3394_v43, %v3393_v58  ;;  %v3400_v15 = vsel %vm3349_vm7, %v5911_v29, 0.0  ;;  %v3402_v52 = vsel %vm3349_vm7, %v5921_v2, 0.0  ;;  %v3404_v21 = vsel %vm3349_vm7, %v5907_v51, 0.0 }
 0x23f   : > { %v3406_v12 = vsel %vm3349_vm7, %v5916_v19, 0.0  ;;  %v3408_v60 = vsel %vm3349_vm7, %v5938_v55, 0.0  ;;  %v3410_v31 = vsel %vm3349_vm7, %v5950_v10, 0.0  ;;  %v3412_v62 = vsel %vm3349_vm7, %v5934_v30, 0.0 }
 0x240   : > { %v3397_v41 = vadd.f32 %v3396_v63, %v3395_v50  ;;  %v3474_v11 = vmul.f32 %v5885_v16, %v5885_v16  ;;  %v3475_v46 = vmul.f32 %v5897_v38, %v5897_v38  ;;  %v3476_v25 = vmul.f32 %v5883_v34, %v5883_v34 }
 0x241   : > { %v3414_v6 = vsel %vm3349_vm7, %v5944_v27, 0.0  ;;  %v3477_v57 = vmul.f32 %v5890_v54, %v5890_v54  ;;  %v3416_v33 = vsel %vm3349_vm7, %v5965_v7, 0.0  ;;  %v3478_v58 = vmul.f32 %v5911_v29, %v5911_v29 }
 0x242   : > { %v3399_v20 = vadd.f32 %v3398_v39, %v3397_v41  ;;  %v3510_v47 = vsel %vm3349_vm7, %v3474_v11, 0.0  ;;  %v3511_v38 = vsel %vm3349_vm7, %v3475_v46, 0.0  ;;  %v3513_v34 = vsel %vm3349_vm7, %v3476_v25, 0.0 }
 0x243   : > { %v3418_v43 = vsel %vm3349_vm7, %v5980_v36, 0.0  ;;  %v3512_v63 = vadd.f32 %v3511_v38, %v3510_v47  ;;  %v3479_v54 = vmul.f32 %v5921_v2, %v5921_v2  ;;  %v3515_v39 = vsel %vm3349_vm7, %v3477_v57, 0.0 }
 0x244   : > { %v3401_v37 = vadd.f32 %v3400_v15, %v3399_v20  ;;  %v3420_v41 = vsel %vm3349_vm7, %v5961_v26, 0.0  ;;  %v3480_v29 = vmul.f32 %v5907_v51, %v5907_v51  ;;  %v3481_v2 = vmul.f32 %v5916_v19, %v5916_v19 }
 0x245   : > { %v3514_v15 = vadd.f32 %v3513_v34, %v3512_v63  ;;  %v3482_v51 = vmul.f32 %v5938_v55, %v5938_v55  ;;  %v3483_v19 = vmul.f32 %v5950_v10, %v5950_v10  ;;  %v3428_v46 = vsel %vm3349_vm7, %v5990_v3, 0.0 }
 0x246   : > { %v3403_v35 = vadd.f32 %v3402_v52, %v3401_v37  ;;  %v3517_v52 = vsel %vm3349_vm7, %v3478_v58, 0.0  ;;  %v3422_v37 = vsel %vm3349_vm7, %v5972_v13, 0.0  ;;  %v3484_v55 = vmul.f32 %v5934_v30, %v5934_v30 }
 0x247   : > { %v3430_v57 = vsel %vm3349_vm7, %v6001_v61, 0.0  ;;  %v3485_v10 = vmul.f32 %v5944_v27, %v5944_v27  ;;  %v3432_v58 = vsel %vm3349_vm7, %v6018_v32, 0.0  ;;  %v3486_v30 = vmul.f32 %v5965_v7, %v5965_v7 }
 0x248   : > { %v3405_v8 = vadd.f32 %v3404_v21, %v3403_v35  ;;  %v3516_v21 = vadd.f32 %v3515_v39, %v3514_v15  ;;  %v3434_v63 = vsel %vm3349_vm7, %v6029_v53, 0.0  ;;  %v3487_v27 = vmul.f32 %v5980_v36, %v5980_v36 }
 0x249   : > { %v3531_v39 = vsel %vm3349_vm7, %v3485_v10, 0.0  ;;  %v3488_v7 = vmul.f32 %v5961_v26, %v5961_v26  ;;  %v3489_v36 = vmul.f32 %v5972_v13, %v5972_v13  ;;  %v3490_v26 = vmul.f32 %v5994_v14, %v5994_v14 }
 0x24a   : > { %v3407_v59 = vadd.f32 %v3406_v12, %v3405_v8  ;;  %v3519_v12 = vsel %vm3349_vm7, %v3479_v54, 0.0  ;;  %v3424_v8 = vsel %vm3349_vm7, %v5994_v14, 0.0  ;;  %v3491_v13 = vmul.f32 %v6007_v23, %v6007_v23 }
 0x24b   : > { %v3492_v14 = vmul.f32 %v5990_v3, %v5990_v3  ;;  %v3494_v3 = vmul.f32 %v6018_v32, %v6018_v32  ;;  %v3450_v10 = vsel %vm3349_vm7, %v6070_v9, 0.0  ;;  %v3496_v32 = vmul.f32 %v6015_v44, %v6015_v44 }
 0x24c   : > { %v3409_v48 = vadd.f32 %v3408_v60, %v3407_v59  ;;  %v3518_v60 = vadd.f32 %v3517_v52, %v3516_v21  ;;  %v3438_v52 = vsel %vm3349_vm7, %v6023_v18, 0.0  ;;  %vm3471_vm9 = vcmask 516096  }
 0x24e   : > { %v3411_v40 = vadd.f32 %v3410_v31, %v3409_v48  ;;  %v3521_v31 = vsel %vm3349_vm7, %v3480_v29, 0.0  ;;  %v3426_v48 = vsel %vm3349_vm7, %v6007_v23, 0.0  ;;  %v3533_v29 = vsel %vm3349_vm7, %v3486_v30, 0.0 }
 0x24f   : > { %v3493_v23 = vmul.f32 %v6001_v61, %v6001_v61  ;;  %v3495_v61 = vmul.f32 %v6029_v53, %v6029_v53  ;;  %v3497_v53 = vmul.f32 %v6023_v18, %v6023_v18  ;;  %v3499_v18 = vmul.f32 %v6050_v28, %v6050_v28 }
 0x250   : > { %v3413_v17 = vadd.f32 %v3412_v62, %v3411_v40  ;;  %v3520_v62 = vadd.f32 %v3519_v12, %v3518_v60  ;;  %v3523_v40 = vsel %vm3349_vm7, %v3481_v2, 0.0  ;;  %v3440_v2 = vsel %vm3349_vm7, %v6039_v5, 0.0 }
 0x251   : > { %v3537_v60 = vsel %vm3349_vm7, %v3488_v7, 0.0  ;;  %v3553_v7 = vsel %vm3349_vm7, %v3496_v32, 0.0 }
 0x252   : > { %v3415_v16 = vadd.f32 %v3414_v6, %v3413_v17  ;;  %v3522_v25 = vadd.f32 %v3521_v31, %v3520_v62  ;;  %v3525_v17 = vsel %vm3349_vm7, %v3482_v51, 0.0  ;;  %v3444_v62 = vsel %vm3349_vm7, %v6037_v0, 0.0 }
 0x254   : > { %v3417_v50 = vadd.f32 %v3416_v33, %v3415_v16  ;;  %v3524_v33 = vadd.f32 %v3523_v40, %v3522_v25  ;;  %v3527_v16 = vsel %vm3349_vm7, %v3483_v19, 0.0  ;;  %v3541_v40 = vsel %vm3349_vm7, %v3490_v26, 0.0 }
 0x256   : > { %v3419_v20 = vadd.f32 %v3418_v43, %v3417_v50  ;;  %v3526_v38 = vadd.f32 %v3525_v17, %v3524_v33  ;;  %v3529_v43 = vsel %vm3349_vm7, %v3484_v55, 0.0  ;;  %v3543_v55 = vsel %vm3349_vm7, %v3491_v13, 0.0 }
 0x257   : > { %v3448_v17 = vsel %vm3349_vm7, %v6060_v1, 0.0  ;;  %v3502_v13 = vmul.f32 %v6060_v1, %v6060_v1  ;;  %v3505_v1 = vmul.f32 %v6065_v24, %v6065_v24 }
 0x258   : > { %v3421_v35 = vadd.f32 %v3420_v41, %v3419_v20  ;;  %v3528_v50 = vadd.f32 %v3527_v16, %v3526_v38  ;;  %v3436_v41 = vsel %vm3349_vm7, %v6015_v44, 0.0  ;;  %v3547_v38 = vsel %vm3349_vm7, %v3493_v23, 0.0 }
 0x259   : > { %v3498_v44 = vmul.f32 %v6039_v5, %v6039_v5  ;;  %v3500_v5 = vmul.f32 %v6037_v0, %v6037_v0 }
 0x25a   : > { %v3423_v59 = vadd.f32 %v3422_v37, %v3421_v35  ;;  %v3530_v15 = vadd.f32 %v3529_v43, %v3528_v50  ;;  %v3535_v35 = vsel %vm3349_vm7, %v3487_v27, 0.0  ;;  %v3454_v50 = vsel %vm3349_vm7, %v6065_v24, 0.0  ;;  %v3392_v24 = vld [vmem:[%s6303_s4] sm:$0x1] }
 0x25c   : > { %v3425_v11 = vadd.f32 %v3424_v8, %v3423_v59  ;;  %v3532_v37 = vadd.f32 %v3531_v39, %v3530_v15  ;;  %v3442_v59 = vsel %vm3349_vm7, %v6050_v28, 0.0  ;;  %v3551_v39 = vsel %vm3349_vm7, %v3495_v61, 0.0 }
 0x25d   : > { %v3501_v28 = vmul.f32 %v6044_v42, %v6044_v42 }
 0x25e   : > { %v3427_v6 = vadd.f32 %v3426_v48, %v3425_v11  ;;  %v3534_v12 = vadd.f32 %v3533_v29, %v3532_v37  ;;  %v3539_v48 = vsel %vm3349_vm7, %v3489_v36, 0.0  ;;  %v3458_v29 = vsel %vm3349_vm7, %v6090_v56, 0.0 }
 0x25f   : > { %v3460_v36 = vsel %vm3349_vm7, %v6078_v22, 0.0 }
 0x260   : > { %v3429_v47 = vadd.f32 %v3428_v46, %v3427_v6  ;;  %v3536_v51 = vadd.f32 %v3535_v35, %v3534_v12  ;;  %v3446_v46 = vsel %vm3349_vm7, %v6044_v42, 0.0  ;;  %v3557_v12 = vsel %vm3349_vm7, %v3498_v44, 0.0 }
 0x261   : > { %v3504_v42 = vmul.f32 %v6058_v45, %v6058_v45 }
 0x262   : > { %v3431_v34 = vadd.f32 %v3430_v57, %v3429_v47  ;;  %v3538_v11 = vadd.f32 %v3537_v60, %v3536_v51  ;;  %v3545_v47 = vsel %vm3349_vm7, %v3492_v14, 0.0 }
 0x264   : > { %v3433_v54 = vadd.f32 %v3432_v58, %v3431_v34  ;;  %v3540_v25 = vadd.f32 %v3539_v48, %v3538_v11  ;;  %v3452_v34 = vsel %vm3349_vm7, %v6058_v45, 0.0  ;;  %v3561_v48 = vsel %vm3349_vm7, %v3500_v5, 0.0 }
 0x265   : > { %v3503_v11 = vmul.f32 %v6070_v9, %v6070_v9  ;;  %v3506_v9 = vmul.f32 %v6080_v4, %v6080_v4  ;;  %v3507_v45 = vmul.f32 %v6090_v56, %v6090_v56 }
 0x266   : > { %v3435_v20 = vadd.f32 %v3434_v63, %v3433_v54  ;;  %v3542_v57 = vadd.f32 %v3541_v40, %v3540_v25  ;;  %v3549_v63 = vsel %vm3349_vm7, %v3494_v3, 0.0 }
 0x267   : > { %v3567_v23 = vsel %vm3349_vm7, %v3503_v11, 0.0  ;;  %v3575_v56 = vsel %vm3349_vm7, %v3507_v45, 0.0 }
 0x268   : > { %v3437_v21 = vadd.f32 %v3436_v41, %v3435_v20  ;;  %v3544_v16 = vadd.f32 %v3543_v55, %v3542_v57  ;;  %v3456_v41 = vsel %vm3349_vm7, %v6080_v4, 0.0  ;;  %v3569_v57 = vsel %vm3349_vm7, %v3504_v42, 0.0 }
 0x269   : > { %v3573_v4 = vsel %vm3349_vm7, %v3506_v9, 0.0 }
 0x26a   : > { %v3439_v8 = vadd.f32 %v3438_v52, %v3437_v21  ;;  %v3546_v30 = vadd.f32 %v3545_v47, %v3544_v16  ;;  %v3555_v21 = vsel %vm3349_vm7, %v3497_v53, 0.0  ;;  %v3571_v47 = vsel %vm3349_vm7, %v3505_v1, 0.0 }
 0x26c   : > { %v3441_v31 = vadd.f32 %v3440_v2, %v3439_v8  ;;  %v3548_v54 = vadd.f32 %v3547_v38, %v3546_v30  ;;  %v3462_v8 = vsel %vm3349_vm7, %v6085_v49, 0.0 }
 0x26e   : > { %v3443_v19 = vadd.f32 %v3442_v59, %v3441_v31  ;;  %v3550_v15 = vadd.f32 %v3549_v63, %v3548_v54  ;;  %v3559_v59 = vsel %vm3349_vm7, %v3499_v18, 0.0 }
 0x270   : > { %v3445_v6 = vadd.f32 %v3444_v62, %v3443_v19  ;;  %v3552_v52 = vadd.f32 %v3551_v39, %v3550_v15  ;;  %v3563_v19 = vsel %vm3349_vm7, %v3501_v28, 0.0 }
 0x272   : > { %v3447_v33 = vadd.f32 %v3446_v46, %v3445_v6  ;;  %v3554_v35 = vadd.f32 %v3553_v7, %v3552_v52  ;;  %v3565_v46 = vsel %vm3349_vm7, %v3502_v13, 0.0 }
 0x274   : > { %v3449_v58 = vadd.f32 %v3448_v17, %v3447_v33  ;;  %v3556_v26 = vadd.f32 %v3555_v21, %v3554_v35 }
 0x276   : > { %v3451_v43 = vadd.f32 %v3450_v10, %v3449_v58  ;;  %v3558_v51 = vadd.f32 %v3557_v12, %v3556_v26  ;;  %v3508_v58 = vmul.f32 %v6078_v22, %v6078_v22 }
 0x278   : > { %v3453_v27 = vadd.f32 %v3452_v34, %v3451_v43  ;;  %v3560_v0 = vadd.f32 %v3559_v59, %v3558_v51  ;;  %v3509_v34 = vmul.f32 %v6085_v49, %v6085_v49  ;;  %v3577_v43 = vsel %vm3349_vm7, %v3508_v58, 0.0 }
 0x27a   : > { %v3455_v20 = vadd.f32 %v3454_v50, %v3453_v27  ;;  %v3562_v14 = vadd.f32 %v3561_v48, %v3560_v0  ;;  %v3579_v22 = vsel %vm3349_vm7, %v3509_v34, 0.0 }
 0x27c   : > { %v3457_v37 = vadd.f32 %v3456_v41, %v3455_v20  ;;  %v3564_v25 = vadd.f32 %v3563_v19, %v3562_v14  ;;  %v3473_v41 = vld [vmem:[%s6303_s4 + $0x1] sm:$0x1] }
 0x27e   : > { %v3459_v2 = vadd.f32 %v3458_v29, %v3457_v37  ;;  %v3566_v55 = vadd.f32 %v3565_v46, %v3564_v25 }
 0x280   : > { %v3461_v60 = vadd.f32 %v3460_v36, %v3459_v2  ;;  %v3568_v33 = vadd.f32 %v3567_v23, %v3566_v55 }
 0x282   : > { %v3463_v31 = vadd.f32 %v3462_v8, %v3461_v60  ;;  %v3570_v10 = vadd.f32 %v3569_v57, %v3568_v33 }
 0x284   : > { %v3464_v62 = vrot.slane %v3463_v31, 4  ;;  %v3572_v61 = vadd.f32 %v3571_v47, %v3570_v10 }
 0x286   : > { %v3465_v40 = vadd.f32 %v3464_v62, %v3463_v31  ;;  %v3574_v30 = vadd.f32 %v3573_v4, %v3572_v61 }
 0x288   : > { %v3466_v6 = vrot.slane %v3465_v40, 2  ;;  %v3576_v32 = vadd.f32 %v3575_v56, %v3574_v30 }
 0x28a   : > { %v3467_v17 = vadd.f32 %v3466_v6, %v3465_v40  ;;  %v3578_v63 = vadd.f32 %v3577_v43, %v3576_v32 }
 0x28c   : > { %v3468_v3 = vrot.slane %v3467_v17, 1  ;;  %v3580_v50 = vadd.f32 %v3579_v22, %v3578_v63 }
 0x28e   : > { %v3469_v16 = vadd.f32 %v3468_v3, %v3467_v17  ;;  %v3581_v54 = vrot.slane %v3580_v50, 4 }
 0x290   : > { %v3470_v38 = vadd.f32 %v3469_v16, %v3392_v24  ;;  %v3582_v27 = vadd.f32 %v3581_v54, %v3580_v50 }
 0x292   : > { %3472 = vst.msk [vmem:[%s6303_s4] sm:$0x1] %vm3471_vm9, %v3470_v38  ;;  %v3583_v53 = vrot.slane %v3582_v27, 2 }
 0x294   : > { %v3584_v39 = vadd.f32 %v3583_v53, %v3582_v27 }
 0x296   : > { %v3585_v49 = vrot.slane %v3584_v39, 1 }
 0x298   : > { %v3586_v15 = vadd.f32 %v3585_v49, %v3584_v39 }
 0x29a   : > { %v3587_v20 = vadd.f32 %v3586_v15, %v3473_v41 }
 0x29c   : > { %3588 = vst.msk [vmem:[%s6303_s4 + $0x1] sm:$0x1] %vm3471_vm9, %v3587_v20 }
 0x29d PF: > { %s15_s15 = sadd.s32 1, %s4744_s15  }
 0x29e   : > { %p12_p5 = scmp.ge.s32.totalorder %s15_s15, 4  }
 0x2a0   :  { %14 = sbr.rel (!%p12_p5) target bundleno = 1 (0x1), region = 82 }

</bundles_post_ra>
